<compile_context>
chip_gen: v7x
topology: tpu7x:2x2x1
jax: 0.10.0
libtpu: 0.0.40
codegen_flags: <defaults>
</compile_context>

<pallas_src>
import functools

import jax
import jax.numpy as jnp
from jax import lax
from jax.experimental import pallas as pl
from jax.experimental.pallas import tpu as pltpu


NUM_HEADS = 4  # LinformerEncoderBlock default num_heads


# ----------------------------------------------------------------------------
# In-kernel building blocks (all operate on 2-D (T, C) tiles of one sample)
# ----------------------------------------------------------------------------
def _layernorm(v, g, b, eps=1e-5):
    mu = jnp.mean(v, axis=-1, keepdims=True)
    var = jnp.mean((v - mu) ** 2, axis=-1, keepdims=True)
    return (v - mu) * lax.rsqrt(var + eps) * g + b


def _encoder_block(xin, p, qkv_ref, att_ref, *, num_heads):
    """Pre-LN MHA (fused QKV, heads via scratch lane slices) + pre-LN Swish FF."""
    (ln1g, ln1b, wqkv, bqkv, wo, bo, ln2g, ln2b, wf1, bf1, wf2, bf2) = p
    T, E = xin.shape
    Dh = E // num_heads
    scale = 1.0 / (Dh ** 0.5)

    xn = _layernorm(xin, ln1g[...], ln1b[...])
    # single fused QKV matmul, staged through VMEM so heads are cheap ref slices
    qkv_ref[...] = (jnp.dot(xn, wqkv[...], preferred_element_type=jnp.float32)
                    + bqkv[...])
    for h in range(num_heads):
        # fold the attention scale into Q: (T,Dh) multiply, not (T,T)
        qh = qkv_ref[:, pl.ds(h * Dh, Dh)] * scale
        kh = qkv_ref[:, pl.ds(E + h * Dh, Dh)]
        vh = qkv_ref[:, pl.ds(2 * E + h * Dh, Dh)]
        en = lax.dot_general(qh, kh, (((1,), (1,)), ((), ())),
                             preferred_element_type=jnp.float32)
        en = en - jnp.max(en, axis=-1, keepdims=True)
        pexp = jnp.exp(en)
        inv = pl.reciprocal(jnp.sum(pexp, axis=-1, keepdims=True), approx=True)
        # normalise AFTER P@V: (T,Dh) multiply instead of (T,T)
        att_ref[:, pl.ds(h * Dh, Dh)] = jnp.dot(
            pexp, vh, preferred_element_type=jnp.float32) * inv

    attn = (jnp.dot(att_ref[...], wo[...], preferred_element_type=jnp.float32)
            + bo[...])
    x = xin + attn

    xn2 = _layernorm(x, ln2g[...], ln2b[...])
    hff = jnp.dot(xn2, wf1[...], preferred_element_type=jnp.float32) + bf1[...]
    hff = hff * jax.nn.sigmoid(hff)                     # Swish
    return x + jnp.dot(hff, wf2[...], preferred_element_type=jnp.float32) + bf2[...]


def _conv3_bn(h_ref, w_ref, b_ref, out_ref):
    """Conv1d(k=3, s=1, p=1) with folded BN (no activation).

    h_ref: (T, Cin) VMEM, w_ref: (3, Cin, Cout), out_ref: (T, Cout) VMEM.
    The +/-1 taps are realised as offset ref loads/stores instead of shift
    matrices -> no MXU/iota work spent on data movement.  ReLU is fused into
    the consumer (pool / next matmul), saving a full VMEM pass."""
    T = h_ref.shape[0]
    out_ref[...] = (jnp.dot(h_ref[...], w_ref[1],
                            preferred_element_type=jnp.float32) + b_ref[...])
    out_ref[pl.ds(1, T - 1), :] += jnp.dot(
        h_ref[pl.ds(0, T - 1), :], w_ref[0], preferred_element_type=jnp.float32)
    out_ref[pl.ds(0, T - 1), :] += jnp.dot(
        h_ref[pl.ds(1, T - 1), :], w_ref[2], preferred_element_type=jnp.float32)


def _relu_pool(c_ref, half):
    """AvgPool1d(2,2) of relu(c): strided sublane reads + fused max(.,0)."""
    return 0.5 * (jnp.maximum(c_ref[pl.ds(0, half, stride=2), :], 0.0)
                  + jnp.maximum(c_ref[pl.ds(1, half, stride=2), :], 0.0))


# ----------------------------------------------------------------------------
# Fused full-network kernel
# ----------------------------------------------------------------------------
def linformer_ext_kernel(x_ref, *refs, block_b, num_heads):
    params = refs[:32]
    o_ref = refs[32]
    (c1_ref, h1_ref, qkv1_ref, att1_ref,
     c2_ref, h2_ref, qkv2_ref, att2_ref, c3_ref) = refs[33:]

    w1, b1 = params[0:2]            # conv1 (Cin=1): w1 (3, 32), b1 (1, 32)
    t1 = params[2:14]               # encoder block 1 (E=32)
    w2, b2 = params[14:16]          # conv2: (3, 32, 64)
    t2 = params[16:28]              # encoder block 2 (E=64)
    w3, b3 = params[28:30]          # conv3: (3, 64, 32)
    g_up, b_up = params[30:32]      # conv_transpose packed: (32, 128), (1, 128)

    L = x_ref.shape[1]
    T1 = L // 2
    T2 = L // 4

    @pl.loop(0, block_b)
    def _per_sample(n):
        # ---- conv1 (Cin=1) + BN: VPU broadcast taps, no K=1 matmuls ----
        c1_ref[...] = x_ref[n] * w1[pl.ds(1, 1), :] + b1[...]
        c1_ref[pl.ds(1, L - 1), :] += (x_ref[n, pl.ds(0, L - 1), :]
                                       * w1[pl.ds(0, 1), :])
        c1_ref[pl.ds(0, L - 1), :] += (x_ref[n, pl.ds(1, L - 1), :]
                                       * w1[pl.ds(2, 1), :])
        # ReLU + AvgPool1d(2, 2) fused into the strided reads
        h = _relu_pool(c1_ref, T1)                                # (T1, 32)

        # ---- LinformerEncoderBlock 1 (E=32) ----
        h = _encoder_block(h, t1, qkv1_ref, att1_ref, num_heads=num_heads)

        # ---- conv2 + BN, then fused ReLU + pool ----
        h1_ref[...] = h
        _conv3_bn(h1_ref, w2, b2, c2_ref)
        h = _relu_pool(c2_ref, T2)                                # (T2, 64)

        # ---- LinformerEncoderBlock 2 (E=64) ----
        h = _encoder_block(h, t2, qkv2_ref, att2_ref, num_heads=num_heads)

        # ---- conv3 + BN (ReLU fused into the up-sampling matmul operand) ----
        h2_ref[...] = h
        _conv3_bn(h2_ref, w3, b3, c3_ref)                         # (T2, 32)

        # ---- ConvTranspose1d(32, 32, k=4, s=4): one lane-dense matmul ----
        # output columns are (d*4 + k); de-interleave happens in the wrapper.
        o_ref[n] = (jnp.dot(jnp.maximum(c3_ref[...], 0.0), g_up[...],
                            preferred_element_type=jnp.float32) + b_up[...])


def linformer_ext_forward(x, params, *, block_b=8):
    """x: (B, 1, L) float32 -> (B, 32, L), matching LinformerEXt.forward (eval)."""
    B, cin, L = x.shape
    assert cin == 1 and L % 4 == 0 and B % block_b == 0
    T1, T2 = L // 2, L // 4
    flat = params['flat']

    x3 = jnp.transpose(x, (0, 2, 1))                         # (B, L, 1)

    in_specs = [pl.BlockSpec((block_b, L, 1), lambda i: (i, 0, 0))]
    for a in flat:                                           # resident constants
        nd = a.ndim
        in_specs.append(pl.BlockSpec(a.shape, lambda i, _nd=nd: (0,) * _nd))

    scratch = [
        pltpu.VMEM((L, 32), jnp.float32),     # c1: conv1 output (pre-pool)
        pltpu.VMEM((T1, 32), jnp.float32),    # h1: encoder1 output staging
        pltpu.VMEM((T1, 96), jnp.float32),    # qkv1
        pltpu.VMEM((T1, 32), jnp.float32),    # att1 (concatenated heads)
        pltpu.VMEM((T1, 64), jnp.float32),    # c2: conv2 output (pre-pool)
        pltpu.VMEM((T2, 64), jnp.float32),    # h2: encoder2 output staging
        pltpu.VMEM((T2, 192), jnp.float32),   # qkv2
        pltpu.VMEM((T2, 64), jnp.float32),    # att2
        pltpu.VMEM((T2, 32), jnp.float32),    # c3: conv3 output
    ]

    y = pl.pallas_call(
        functools.partial(linformer_ext_kernel,
                          block_b=block_b, num_heads=NUM_HEADS),
        out_shape=jax.ShapeDtypeStruct((B, T2, 128), jnp.float32),
        grid=(B // block_b,),
        in_specs=in_specs,
        out_specs=pl.BlockSpec((block_b, T2, 128), lambda i: (i, 0, 0)),
        scratch_shapes=scratch,
        compiler_params=pltpu.CompilerParams(
            # On v7x this axis would use pltpu.CORE_PARALLEL to shard across TCs.
            dimension_semantics=("parallel",)),
    )(x3, *flat)

    # lane-dense (B, T2, d*4+k) slab -> PyTorch (B, 32, L) layout (XLA plumbing)
    return y.reshape(B, T2, 32, 4).transpose(0, 2, 1, 3).reshape(B, 32, L)


# ----------------------------------------------------------------------------
# Deterministic parameters (BatchNorm folded into convs, eval mode)
# ----------------------------------------------------------------------------
def make_params(key):
    keys = iter(jax.random.split(key, 128))

    def u(shape, bound):
        return jax.random.uniform(next(keys), shape, jnp.float32, -bound, bound)

    def conv_bn_folded(cin, cout, k=3):
        bound = 1.0 / (cin * k) ** 0.5
        w = u((k, cin, cout), bound)                         # (K, Cin, Cout)
        b = u((cout,), bound)
        gamma = 1.0 + 0.1 * u((cout,), 1.0)
        beta = 0.1 * u((cout,), 1.0)
        mean = 0.1 * u((cout,), 1.0)
        var = jax.random.uniform(next(keys), (cout,), jnp.float32, 0.5, 1.5)
        s = gamma / jnp.sqrt(var + 1e-5)
        return w * s[None, None, :], ((b - mean) * s + beta).reshape(1, cout)

    def linear(din, dout):
        bound = 1.0 / din ** 0.5
        return u((din, dout), bound), u((1, dout), bound)

    def encoder(E):
        ln1g = 1.0 + 0.1 * u((1, E), 1.0)
        ln1b = 0.1 * u((1, E), 1.0)
        wq, bq = linear(E, E)
        wk, bk = linear(E, E)
        wv, bv = linear(E, E)
        wqkv = jnp.concatenate([wq, wk, wv], axis=1)          # fused QKV (E, 3E)
        bqkv = jnp.concatenate([bq, bk, bv], axis=1)
        wo, bo = linear(E, E)
        ln2g = 1.0 + 0.1 * u((1, E), 1.0)
        ln2b = 0.1 * u((1, E), 1.0)
        wf1, bf1 = linear(E, E)                               # forward_expansion=1
        wf2, bf2 = linear(E, E)
        return [ln1g, ln1b, wqkv, bqkv, wo, bo, ln2g, ln2b, wf1, bf1, wf2, bf2]

    w1, b1 = conv_bn_folded(1, 32)
    w2, b2 = conv_bn_folded(32, 64)
    w3, b3 = conv_bn_folded(64, 32)
    t1 = encoder(32)
    t2 = encoder(64)
    up_bound = 1.0 / (32 * 4) ** 0.5
    w_up = u((32, 32, 4), up_bound)                           # (Cin, Cout, K)
    b_up = u((32,), up_bound)

    params = dict(w1=w1, b1=b1, t1=t1, w2=w2, b2=b2, t2=t2,
                  w3=w3, b3=b3, w_up=w_up, b_up=b_up)
    # kernel-ready packing
    g_up = w_up.reshape(32, 128)                              # G[c, d*4+k]
    b_up_vec = jnp.repeat(b_up, 4).reshape(1, 128)            # bias[d*4+k] = b[d]
    params['flat'] = ([w1[:, 0, :], b1] + t1 + [w2, b2] + t2
                      + [w3, b3] + [g_up, b_up_vec])
    return params


# ----------------------------------------------------------------------------
# Pure-JAX reference (independent of the kernel's packing tricks)
# ----------------------------------------------------------------------------
def reference_forward(x, params):
    B, _, L = x.shape
    h = jnp.transpose(x, (0, 2, 1))                           # (B, L, 1)

    def conv(h, w, b):
        hm1 = jnp.pad(h, ((0, 0), (1, 0), (0, 0)))[:, :-1, :]
        hp1 = jnp.pad(h, ((0, 0), (0, 1), (0, 0)))[:, 1:, :]
        y = (jnp.einsum('btc,cd->btd', hm1, w[0])
             + jnp.einsum('btc,cd->btd', h, w[1])
             + jnp.einsum('btc,cd->btd', hp1, w[2]) + b)
        return jnp.maximum(y, 0.0)

    def pool(y):
        Bb, T, C = y.shape
        return y.reshape(Bb, T // 2, 2, C).mean(axis=2)

    def encoder(x, p, H):
        (ln1g, ln1b, wqkv, bqkv, wo, bo, ln2g, ln2b, wf1, bf1, wf2, bf2) = p
        Bb, T, E = x.shape
        Dh = E // H

        def ln(v, g, b):
            mu = v.mean(-1, keepdims=True)
            var = ((v - mu) ** 2).mean(-1, keepdims=True)
            return (v - mu) / jnp.sqrt(var + 1e-5) * g + b

        xn = ln(x, ln1g, ln1b)
        qkv = xn @ wqkv + bqkv
        q, k, v = jnp.split(qkv, 3, axis=-1)
        q = q.reshape(Bb, T, H, Dh).transpose(0, 2, 1, 3)
        k = k.reshape(Bb, T, H, Dh).transpose(0, 2, 1, 3)
        v = v.reshape(Bb, T, H, Dh).transpose(0, 2, 1, 3)
        att = jax.nn.softmax(
            jnp.einsum('bhtd,bhsd->bhts', q, k) / (Dh ** 0.5), axis=-1)
        o = jnp.einsum('bhts,bhsd->bhtd', att, v).transpose(0, 2, 1, 3)
        o = o.reshape(Bb, T, E)
        x = x + (o @ wo + bo)
        xn2 = ln(x, ln2g, ln2b)
        f = xn2 @ wf1 + bf1
        f = f * jax.nn.sigmoid(f)
        return x + (f @ wf2 + bf2)

    h = pool(conv(h, params['w1'], params['b1']))
    h = encoder(h, params['t1'], NUM_HEADS)
    h = pool(conv(h, params['w2'], params['b2']))
    h = encoder(h, params['t2'], NUM_HEADS)
    h = conv(h, params['w3'], params['b3'])
    # ConvTranspose1d(32, 32, 4, stride=4): out[b, d, 4t+k]
    y = (jnp.einsum('btc,cdk->btdk', h, params['w_up'])
         + params['b_up'][None, None, :, None])
    Bb, T4, D, K = y.shape
    return y.transpose(0, 2, 1, 3).reshape(Bb, D, T4 * K)


# ----------------------------------------------------------------------------
if __name__ == "__main__":
    B, L = 16, 32                       # batch, sequence length (L % 4 == 0)
    key = jax.random.PRNGKey(0)
    kx, kp = jax.random.split(key)
    x = jax.random.normal(kx, (B, 1, L), jnp.float32)
    params = make_params(kp)

    out = jax.block_until_ready(linformer_ext_forward(x, params, block_b=8))
    ref = jax.block_until_ready(reference_forward(x, params))

    assert out.shape == (B, 32, L), out.shape
    assert bool(jnp.all(jnp.isfinite(out)))
    max_err = float(jnp.max(jnp.abs(out - ref)))
    # tolerance budget covers the EUP approximate-reciprocal softmax and MXU
    # f32 accumulation differences vs the XLA reference
    assert max_err < 2e-2, f"max abs error vs reference: {max_err}"
    print("KERNEL_OK")
</pallas_src>

<mosaic_0001>
module attributes {stable_mosaic.version = 11 : i64} {
  func.func @linformer_ext_kernel(%arg0: i32, %arg1: memref<8x32x1xf32, #tpu.memory_space<vmem>>, %arg2: memref<3x32xf32, #tpu.memory_space<vmem>>, %arg3: memref<1x32xf32, #tpu.memory_space<vmem>>, %arg4: memref<1x32xf32, #tpu.memory_space<vmem>>, %arg5: memref<1x32xf32, #tpu.memory_space<vmem>>, %arg6: memref<32x96xf32, #tpu.memory_space<vmem>>, %arg7: memref<1x96xf32, #tpu.memory_space<vmem>>, %arg8: memref<32x32xf32, #tpu.memory_space<vmem>>, %arg9: memref<1x32xf32, #tpu.memory_space<vmem>>, %arg10: memref<1x32xf32, #tpu.memory_space<vmem>>, %arg11: memref<1x32xf32, #tpu.memory_space<vmem>>, %arg12: memref<32x32xf32, #tpu.memory_space<vmem>>, %arg13: memref<1x32xf32, #tpu.memory_space<vmem>>, %arg14: memref<32x32xf32, #tpu.memory_space<vmem>>, %arg15: memref<1x32xf32, #tpu.memory_space<vmem>>, %arg16: memref<3x32x64xf32, #tpu.memory_space<vmem>>, %arg17: memref<1x64xf32, #tpu.memory_space<vmem>>, %arg18: memref<1x64xf32, #tpu.memory_space<vmem>>, %arg19: memref<1x64xf32, #tpu.memory_space<vmem>>, %arg20: memref<64x192xf32, #tpu.memory_space<vmem>>, %arg21: memref<1x192xf32, #tpu.memory_space<vmem>>, %arg22: memref<64x64xf32, #tpu.memory_space<vmem>>, %arg23: memref<1x64xf32, #tpu.memory_space<vmem>>, %arg24: memref<1x64xf32, #tpu.memory_space<vmem>>, %arg25: memref<1x64xf32, #tpu.memory_space<vmem>>, %arg26: memref<64x64xf32, #tpu.memory_space<vmem>>, %arg27: memref<1x64xf32, #tpu.memory_space<vmem>>, %arg28: memref<64x64xf32, #tpu.memory_space<vmem>>, %arg29: memref<1x64xf32, #tpu.memory_space<vmem>>, %arg30: memref<3x64x32xf32, #tpu.memory_space<vmem>>, %arg31: memref<1x32xf32, #tpu.memory_space<vmem>>, %arg32: memref<32x128xf32, #tpu.memory_space<vmem>>, %arg33: memref<1x128xf32, #tpu.memory_space<vmem>>, %arg34: memref<8x8x128xf32, #tpu.memory_space<vmem>>, %arg35: memref<32x32xf32, #tpu.memory_space<vmem>>, %arg36: memref<16x32xf32, #tpu.memory_space<vmem>>, %arg37: memref<16x96xf32, #tpu.memory_space<vmem>>, %arg38: memref<16x32xf32, #tpu.memory_space<vmem>>, %arg39: memref<16x64xf32, #tpu.memory_space<vmem>>, %arg40: memref<8x64xf32, #tpu.memory_space<vmem>>, %arg41: memref<8x192xf32, #tpu.memory_space<vmem>>, %arg42: memref<8x64xf32, #tpu.memory_space<vmem>>, %arg43: memref<8x32xf32, #tpu.memory_space<vmem>>) attributes {dimension_semantics = [#tpu.dimension_semantics<parallel>], iteration_bounds = array<i64: 2>, scalar_prefetch = 0 : i64, scratch_operands = 9 : i64, tpu.core_type = #tpu.core_type<tc>, window_params = [{transform_indices = @transform_0, window_bounds = array<i64: 8, 32, 1>}, {pipeline_mode = #tpu.pipeline_mode<synchronous>, transform_indices = @transform_1, window_bounds = array<i64: 3, 32>}, {pipeline_mode = #tpu.pipeline_mode<synchronous>, transform_indices = @transform_2, window_bounds = array<i64: 1, 32>}, {pipeline_mode = #tpu.pipeline_mode<synchronous>, transform_indices = @transform_3, window_bounds = array<i64: 1, 32>}, {pipeline_mode = #tpu.pipeline_mode<synchronous>, transform_indices = @transform_4, window_bounds = array<i64: 1, 32>}, {pipeline_mode = #tpu.pipeline_mode<synchronous>, transform_indices = @transform_5, window_bounds = array<i64: 32, 96>}, {pipeline_mode = #tpu.pipeline_mode<synchronous>, transform_indices = @transform_6, window_bounds = array<i64: 1, 96>}, {pipeline_mode = #tpu.pipeline_mode<synchronous>, transform_indices = @transform_7, window_bounds = array<i64: 32, 32>}, {pipeline_mode = #tpu.pipeline_mode<synchronous>, transform_indices = @transform_8, window_bounds = array<i64: 1, 32>}, {pipeline_mode = #tpu.pipeline_mode<synchronous>, transform_indices = @transform_9, window_bounds = array<i64: 1, 32>}, {pipeline_mode = #tpu.pipeline_mode<synchronous>, transform_indices = @transform_10, window_bounds = array<i64: 1, 32>}, {pipeline_mode = #tpu.pipeline_mode<synchronous>, transform_indices = @transform_11, window_bounds = array<i64: 32, 32>}, {pipeline_mode = #tpu.pipeline_mode<synchronous>, transform_indices = @transform_12, window_bounds = array<i64: 1, 32>}, {pipeline_mode = #tpu.pipeline_mode<synchronous>, transform_indices = @transform_13, window_bounds = array<i64: 32, 32>}, {pipeline_mode = #tpu.pipeline_mode<synchronous>, transform_indices = @transform_14, window_bounds = array<i64: 1, 32>}, {pipeline_mode = #tpu.pipeline_mode<synchronous>, transform_indices = @transform_15, window_bounds = array<i64: 3, 32, 64>}, {pipeline_mode = #tpu.pipeline_mode<synchronous>, transform_indices = @transform_16, window_bounds = array<i64: 1, 64>}, {pipeline_mode = #tpu.pipeline_mode<synchronous>, transform_indices = @transform_17, window_bounds = array<i64: 1, 64>}, {pipeline_mode = #tpu.pipeline_mode<synchronous>, transform_indices = @transform_18, window_bounds = array<i64: 1, 64>}, {pipeline_mode = #tpu.pipeline_mode<synchronous>, transform_indices = @transform_19, window_bounds = array<i64: 64, 192>}, {pipeline_mode = #tpu.pipeline_mode<synchronous>, transform_indices = @transform_20, window_bounds = array<i64: 1, 192>}, {pipeline_mode = #tpu.pipeline_mode<synchronous>, transform_indices = @transform_21, window_bounds = array<i64: 64, 64>}, {pipeline_mode = #tpu.pipeline_mode<synchronous>, transform_indices = @transform_22, window_bounds = array<i64: 1, 64>}, {pipeline_mode = #tpu.pipeline_mode<synchronous>, transform_indices = @transform_23, window_bounds = array<i64: 1, 64>}, {pipeline_mode = #tpu.pipeline_mode<synchronous>, transform_indices = @transform_24, window_bounds = array<i64: 1, 64>}, {pipeline_mode = #tpu.pipeline_mode<synchronous>, transform_indices = @transform_25, window_bounds = array<i64: 64, 64>}, {pipeline_mode = #tpu.pipeline_mode<synchronous>, transform_indices = @transform_26, window_bounds = array<i64: 1, 64>}, {pipeline_mode = #tpu.pipeline_mode<synchronous>, transform_indices = @transform_27, window_bounds = array<i64: 64, 64>}, {pipeline_mode = #tpu.pipeline_mode<synchronous>, transform_indices = @transform_28, window_bounds = array<i64: 1, 64>}, {pipeline_mode = #tpu.pipeline_mode<synchronous>, transform_indices = @transform_29, window_bounds = array<i64: 3, 64, 32>}, {pipeline_mode = #tpu.pipeline_mode<synchronous>, transform_indices = @transform_30, window_bounds = array<i64: 1, 32>}, {pipeline_mode = #tpu.pipeline_mode<synchronous>, transform_indices = @transform_31, window_bounds = array<i64: 32, 128>}, {pipeline_mode = #tpu.pipeline_mode<synchronous>, transform_indices = @transform_32, window_bounds = array<i64: 1, 128>}, {transform_indices = @transform_33, window_bounds = array<i64: 8, 8, 128>}]} {
    %c0_i32 = arith.constant 0 : i32
    %c8_i32 = arith.constant 8 : i32
    %0 = arith.addi %c0_i32, %c8_i32 : i32
    %c1_i32 = arith.constant 1 : i32
    scf.for %arg44 = %c0_i32 to %0 step %c1_i32  : i32 {
      %c1_i32_1 = arith.constant 1 : i32
      %1 = arith.muli %arg44, %c1_i32_1 : i32
      %c0_i32_2 = arith.constant 0 : i32
      %2 = arith.addi %c0_i32_2, %1 : i32
      %3 = arith.index_cast %2 : i32 to index
      %c0 = arith.constant 0 : index
      %c0_3 = arith.constant 0 : index
      %4 = vector.load %arg1[%3, %c0, %c0_3] : memref<8x32x1xf32, #tpu.memory_space<vmem>>, vector<1x32x1xf32>
      %5 = vector.shape_cast %4 : vector<1x32x1xf32> to vector<32x1xf32>
      %c1 = arith.constant 1 : index
      %c0_4 = arith.constant 0 : index
      %6 = vector.load %arg2[%c1, %c0_4] : memref<3x32xf32, #tpu.memory_space<vmem>>, vector<1x32xf32>
      %7 = vector.broadcast %5 : vector<32x1xf32> to vector<32x32xf32>
      %8 = vector.broadcast %6 : vector<1x32xf32> to vector<32x32xf32>
      %9 = arith.mulf %7, %8 : vector<32x32xf32>
      %c0_5 = arith.constant 0 : index
      %c0_6 = arith.constant 0 : index
      %10 = vector.load %arg3[%c0_5, %c0_6] : memref<1x32xf32, #tpu.memory_space<vmem>>, vector<1x32xf32>
      %11 = vector.broadcast %10 : vector<1x32xf32> to vector<32x32xf32>
      %12 = arith.addf %9, %11 : vector<32x32xf32>
      %c0_7 = arith.constant 0 : index
      %c0_8 = arith.constant 0 : index
      %13 = vector.load %arg35[%c0_7, %c0_8] : memref<32x32xf32, #tpu.memory_space<vmem>>, vector<32x32xf32>
      tpu.vector_store %arg35[%c0_7, %c0_8], %12 {strides = array<i32>} : memref<32x32xf32, #tpu.memory_space<vmem>>, vector<32x32xf32>,
      %c1_9 = arith.constant 1 : index
      %c0_10 = arith.constant 0 : index
      %14 = vector.load %arg35[%c1_9, %c0_10] : memref<32x32xf32, #tpu.memory_space<vmem>>, vector<31x32xf32>
      %15 = arith.index_cast %2 : i32 to index
      %c0_11 = arith.constant 0 : index
      %c0_12 = arith.constant 0 : index
      %16 = vector.load %arg1[%15, %c0_11, %c0_12] : memref<8x32x1xf32, #tpu.memory_space<vmem>>, vector<1x31x1xf32>
      %17 = vector.shape_cast %16 : vector<1x31x1xf32> to vector<31x1xf32>
      %c0_13 = arith.constant 0 : index
      %c0_14 = arith.constant 0 : index
      %18 = vector.load %arg2[%c0_13, %c0_14] : memref<3x32xf32, #tpu.memory_space<vmem>>, vector<1x32xf32>
      %19 = vector.broadcast %17 : vector<31x1xf32> to vector<31x32xf32>
      %20 = vector.broadcast %18 : vector<1x32xf32> to vector<31x32xf32>
      %21 = arith.mulf %19, %20 : vector<31x32xf32>
      %22 = arith.addf %14, %21 : vector<31x32xf32>
      %c1_15 = arith.constant 1 : index
      %c0_16 = arith.constant 0 : index
      %23 = vector.load %arg35[%c1_15, %c0_16] : memref<32x32xf32, #tpu.memory_space<vmem>>, vector<31x32xf32>
      tpu.vector_store %arg35[%c1_15, %c0_16], %22 {strides = array<i32>} : memref<32x32xf32, #tpu.memory_space<vmem>>, vector<31x32xf32>,
      %c0_17 = arith.constant 0 : index
      %c0_18 = arith.constant 0 : index
      %24 = vector.load %arg35[%c0_17, %c0_18] : memref<32x32xf32, #tpu.memory_space<vmem>>, vector<31x32xf32>
      %25 = arith.index_cast %2 : i32 to index
      %c1_19 = arith.constant 1 : index
      %c0_20 = arith.constant 0 : index
      %26 = vector.load %arg1[%25, %c1_19, %c0_20] : memref<8x32x1xf32, #tpu.memory_space<vmem>>, vector<1x31x1xf32>
      %27 = vector.shape_cast %26 : vector<1x31x1xf32> to vector<31x1xf32>
      %c2 = arith.constant 2 : index
      %c0_21 = arith.constant 0 : index
      %28 = vector.load %arg2[%c2, %c0_21] : memref<3x32xf32, #tpu.memory_space<vmem>>, vector<1x32xf32>
      %29 = vector.broadcast %27 : vector<31x1xf32> to vector<31x32xf32>
      %30 = vector.broadcast %28 : vector<1x32xf32> to vector<31x32xf32>
      %31 = arith.mulf %29, %30 : vector<31x32xf32>
      %32 = arith.addf %24, %31 : vector<31x32xf32>
      %c0_22 = arith.constant 0 : index
      %c0_23 = arith.constant 0 : index
      %33 = vector.load %arg35[%c0_22, %c0_23] : memref<32x32xf32, #tpu.memory_space<vmem>>, vector<31x32xf32>
      tpu.vector_store %arg35[%c0_22, %c0_23], %32 {strides = array<i32>} : memref<32x32xf32, #tpu.memory_space<vmem>>, vector<31x32xf32>,
      %c0_24 = arith.constant 0 : index
      %c0_25 = arith.constant 0 : index
      %34 = tpu.strided_load %arg35[%c0_24, %c0_25] {strides = array<i32: 2, 1>} : memref<32x32xf32, #tpu.memory_space<vmem>>, vector<16x32xf32>
      %cst = arith.constant 0.000000e+00 : f32
      %35 = vector.broadcast %cst : f32 to vector<16x32xf32>
      %36 = arith.maximumf %34, %35 : vector<16x32xf32>
      %c1_26 = arith.constant 1 : index
      %c0_27 = arith.constant 0 : index
      %37 = tpu.strided_load %arg35[%c1_26, %c0_27] {strides = array<i32: 2, 1>} : memref<32x32xf32, #tpu.memory_space<vmem>>, vector<16x32xf32>
      %cst_28 = arith.constant 0.000000e+00 : f32
      %38 = vector.broadcast %cst_28 : f32 to vector<16x32xf32>
      %39 = arith.maximumf %37, %38 : vector<16x32xf32>
      %40 = arith.addf %36, %39 : vector<16x32xf32>
      %cst_29 = arith.constant 5.000000e-01 : f32
      %41 = vector.broadcast %cst_29 : f32 to vector<16x32xf32>
      %42 = arith.mulf %41, %40 : vector<16x32xf32>
      %c0_30 = arith.constant 0 : index
      %c0_31 = arith.constant 0 : index
      %43 = vector.load %arg4[%c0_30, %c0_31] : memref<1x32xf32, #tpu.memory_space<vmem>>, vector<1x32xf32>
      %c0_32 = arith.constant 0 : index
      %c0_33 = arith.constant 0 : index
      %44 = vector.load %arg5[%c0_32, %c0_33] : memref<1x32xf32, #tpu.memory_space<vmem>>, vector<1x32xf32>
      %cst_34 = arith.constant dense<0.000000e+00> : vector<16xf32>
      %45 = vector.multi_reduction <add>, %42, %cst_34 [1] : vector<16x32xf32> to vector<16xf32>
      %46 = vector.shape_cast %45 : vector<16xf32> to vector<16x1xf32>
      %cst_35 = arith.constant 3.200000e+01 : f32
      %47 = vector.broadcast %cst_35 : f32 to vector<16x1xf32>
      %48 = arith.divf %46, %47 : vector<16x1xf32>
      %49 = vector.broadcast %48 : vector<16x1xf32> to vector<16x32xf32>
      %50 = arith.subf %42, %49 : vector<16x32xf32>
      %51 = arith.mulf %50, %50 : vector<16x32xf32>
      %cst_36 = arith.constant dense<0.000000e+00> : vector<16xf32>
      %52 = vector.multi_reduction <add>, %51, %cst_36 [1] : vector<16x32xf32> to vector<16xf32>
      %53 = vector.shape_cast %52 : vector<16xf32> to vector<16x1xf32>
      %cst_37 = arith.constant 3.200000e+01 : f32
      %54 = vector.broadcast %cst_37 : f32 to vector<16x1xf32>
      %55 = arith.divf %53, %54 : vector<16x1xf32>
      %56 = vector.broadcast %48 : vector<16x1xf32> to vector<16x32xf32>
      %57 = arith.subf %42, %56 : vector<16x32xf32>
      %cst_38 = arith.constant 9.99999974E-6 : f32
      %58 = vector.broadcast %cst_38 : f32 to vector<16x1xf32>
      %59 = arith.addf %55, %58 : vector<16x1xf32>
      %60 = math.rsqrt %59 : vector<16x1xf32>
      %61 = vector.broadcast %60 : vector<16x1xf32> to vector<16x32xf32>
      %62 = arith.mulf %57, %61 : vector<16x32xf32>
      %63 = vector.broadcast %43 : vector<1x32xf32> to vector<16x32xf32>
      %64 = arith.mulf %62, %63 : vector<16x32xf32>
      %65 = vector.broadcast %44 : vector<1x32xf32> to vector<16x32xf32>
      %66 = arith.addf %64, %65 : vector<16x32xf32>
      %c0_39 = arith.constant 0 : index
      %c0_40 = arith.constant 0 : index
      %67 = vector.load %arg6[%c0_39, %c0_40] : memref<32x96xf32, #tpu.memory_space<vmem>>, vector<32x96xf32>
      %cst_41 = arith.constant dense<0.000000e+00> : vector<16x96xf32>
      %68 = tpu.matmul %66, %67, %cst_41 {dimension_numbers = #tpu.dot_dimension_numbers<[1], [0], [0], [1], [0, 0, 1, 1], [], []>} : vector<16x32xf32>, vector<32x96xf32>, vector<16x96xf32> -> vector<16x96xf32>
      %c0_42 = arith.constant 0 : index
      %c0_43 = arith.constant 0 : index
      %69 = vector.load %arg7[%c0_42, %c0_43] : memref<1x96xf32, #tpu.memory_space<vmem>>, vector<1x96xf32>
      %70 = vector.broadcast %69 : vector<1x96xf32> to vector<16x96xf32>
      %71 = arith.addf %68, %70 : vector<16x96xf32>
      %c0_44 = arith.constant 0 : index
      %c0_45 = arith.constant 0 : index
      %72 = vector.load %arg37[%c0_44, %c0_45] : memref<16x96xf32, #tpu.memory_space<vmem>>, vector<16x96xf32>
      tpu.vector_store %arg37[%c0_44, %c0_45], %71 {strides = array<i32>} : memref<16x96xf32, #tpu.memory_space<vmem>>, vector<16x96xf32>,
      %c0_46 = arith.constant 0 : index
      %c0_47 = arith.constant 0 : index
      %73 = vector.load %arg37[%c0_46, %c0_47] : memref<16x96xf32, #tpu.memory_space<vmem>>, vector<16x8xf32>
      %cst_48 = arith.constant 0.353553385 : f32
      %74 = vector.broadcast %cst_48 : f32 to vector<16x8xf32>
      %75 = arith.mulf %73, %74 : vector<16x8xf32>
      %c0_49 = arith.constant 0 : index
      %c32 = arith.constant 32 : index
      %76 = vector.load %arg37[%c0_49, %c32] : memref<16x96xf32, #tpu.memory_space<vmem>>, vector<16x8xf32>
      %c0_50 = arith.constant 0 : index
      %c64 = arith.constant 64 : index
      %77 = vector.load %arg37[%c0_50, %c64] : memref<16x96xf32, #tpu.memory_space<vmem>>, vector<16x8xf32>
      %cst_51 = arith.constant dense<0.000000e+00> : vector<16x16xf32>
      %78 = tpu.matmul %75, %76, %cst_51 {dimension_numbers = #tpu.dot_dimension_numbers<[1], [1], [0], [0], [0, 0, 1, 0], [], []>} : vector<16x8xf32>, vector<16x8xf32>, vector<16x16xf32> -> vector<16x16xf32>
      %cst_52 = arith.constant dense<0xFF800000> : vector<16xf32>
      %79 = vector.multi_reduction <maximumf>, %78, %cst_52 [1] : vector<16x16xf32> to vector<16xf32>
      %80 = vector.shape_cast %79 : vector<16xf32> to vector<16x1xf32>
      %81 = vector.broadcast %80 : vector<16x1xf32> to vector<16x16xf32>
      %82 = arith.subf %78, %81 : vector<16x16xf32>
      %83 = math.exp %82 : vector<16x16xf32>
      %cst_53 = arith.constant dense<0.000000e+00> : vector<16xf32>
      %84 = vector.multi_reduction <add>, %83, %cst_53 [1] : vector<16x16xf32> to vector<16xf32>
      %85 = vector.shape_cast %84 : vector<16xf32> to vector<16x1xf32>
      %86 = tpu.reciprocal %85 {approx = true} : vector<16x1xf32> -> vector<16x1xf32>
      %cst_54 = arith.constant dense<0.000000e+00> : vector<16x8xf32>
      %87 = tpu.matmul %83, %77, %cst_54 {dimension_numbers = #tpu.dot_dimension_numbers<[1], [0], [0], [1], [0, 0, 1, 1], [], []>} : vector<16x16xf32>, vector<16x8xf32>, vector<16x8xf32> -> vector<16x8xf32>
      %88 = vector.broadcast %86 : vector<16x1xf32> to vector<16x8xf32>
      %89 = arith.mulf %87, %88 : vector<16x8xf32>
      %c0_55 = arith.constant 0 : index
      %c0_56 = arith.constant 0 : index
      %90 = vector.load %arg38[%c0_55, %c0_56] : memref<16x32xf32, #tpu.memory_space<vmem>>, vector<16x8xf32>
      tpu.vector_store %arg38[%c0_55, %c0_56], %89 {strides = array<i32>} : memref<16x32xf32, #tpu.memory_space<vmem>>, vector<16x8xf32>,
      %c0_57 = arith.constant 0 : index
      %c8 = arith.constant 8 : index
      %91 = vector.load %arg37[%c0_57, %c8] : memref<16x96xf32, #tpu.memory_space<vmem>>, vector<16x8xf32>
      %cst_58 = arith.constant 0.353553385 : f32
      %92 = vector.broadcast %cst_58 : f32 to vector<16x8xf32>
      %93 = arith.mulf %91, %92 : vector<16x8xf32>
      %c0_59 = arith.constant 0 : index
      %c40 = arith.constant 40 : index
      %94 = vector.load %arg37[%c0_59, %c40] : memref<16x96xf32, #tpu.memory_space<vmem>>, vector<16x8xf32>
      %c0_60 = arith.constant 0 : index
      %c72 = arith.constant 72 : index
      %95 = vector.load %arg37[%c0_60, %c72] : memref<16x96xf32, #tpu.memory_space<vmem>>, vector<16x8xf32>
      %cst_61 = arith.constant dense<0.000000e+00> : vector<16x16xf32>
      %96 = tpu.matmul %93, %94, %cst_61 {dimension_numbers = #tpu.dot_dimension_numbers<[1], [1], [0], [0], [0, 0, 1, 0], [], []>} : vector<16x8xf32>, vector<16x8xf32>, vector<16x16xf32> -> vector<16x16xf32>
      %cst_62 = arith.constant dense<0xFF800000> : vector<16xf32>
      %97 = vector.multi_reduction <maximumf>, %96, %cst_62 [1] : vector<16x16xf32> to vector<16xf32>
      %98 = vector.shape_cast %97 : vector<16xf32> to vector<16x1xf32>
      %99 = vector.broadcast %98 : vector<16x1xf32> to vector<16x16xf32>
      %100 = arith.subf %96, %99 : vector<16x16xf32>
      %101 = math.exp %100 : vector<16x16xf32>
      %cst_63 = arith.constant dense<0.000000e+00> : vector<16xf32>
      %102 = vector.multi_reduction <add>, %101, %cst_63 [1] : vector<16x16xf32> to vector<16xf32>
      %103 = vector.shape_cast %102 : vector<16xf32> to vector<16x1xf32>
      %104 = tpu.reciprocal %103 {approx = true} : vector<16x1xf32> -> vector<16x1xf32>
      %cst_64 = arith.constant dense<0.000000e+00> : vector<16x8xf32>
      %105 = tpu.matmul %101, %95, %cst_64 {dimension_numbers = #tpu.dot_dimension_numbers<[1], [0], [0], [1], [0, 0, 1, 1], [], []>} : vector<16x16xf32>, vector<16x8xf32>, vector<16x8xf32> -> vector<16x8xf32>
      %106 = vector.broadcast %104 : vector<16x1xf32> to vector<16x8xf32>
      %107 = arith.mulf %105, %106 : vector<16x8xf32>
      %c0_65 = arith.constant 0 : index
      %c8_66 = arith.constant 8 : index
      %108 = vector.load %arg38[%c0_65, %c8_66] : memref<16x32xf32, #tpu.memory_space<vmem>>, vector<16x8xf32>
      tpu.vector_store %arg38[%c0_65, %c8_66], %107 {strides = array<i32>} : memref<16x32xf32, #tpu.memory_space<vmem>>, vector<16x8xf32>,
      %c0_67 = arith.constant 0 : index
      %c16 = arith.constant 16 : index
      %109 = vector.load %arg37[%c0_67, %c16] : memref<16x96xf32, #tpu.memory_space<vmem>>, vector<16x8xf32>
      %cst_68 = arith.constant 0.353553385 : f32
      %110 = vector.broadcast %cst_68 : f32 to vector<16x8xf32>
      %111 = arith.mulf %109, %110 : vector<16x8xf32>
      %c0_69 = arith.constant 0 : index
      %c48 = arith.constant 48 : index
      %112 = vector.load %arg37[%c0_69, %c48] : memref<16x96xf32, #tpu.memory_space<vmem>>, vector<16x8xf32>
      %c0_70 = arith.constant 0 : index
      %c80 = arith.constant 80 : index
      %113 = vector.load %arg37[%c0_70, %c80] : memref<16x96xf32, #tpu.memory_space<vmem>>, vector<16x8xf32>
      %cst_71 = arith.constant dense<0.000000e+00> : vector<16x16xf32>
      %114 = tpu.matmul %111, %112, %cst_71 {dimension_numbers = #tpu.dot_dimension_numbers<[1], [1], [0], [0], [0, 0, 1, 0], [], []>} : vector<16x8xf32>, vector<16x8xf32>, vector<16x16xf32> -> vector<16x16xf32>
      %cst_72 = arith.constant dense<0xFF800000> : vector<16xf32>
      %115 = vector.multi_reduction <maximumf>, %114, %cst_72 [1] : vector<16x16xf32> to vector<16xf32>
      %116 = vector.shape_cast %115 : vector<16xf32> to vector<16x1xf32>
      %117 = vector.broadcast %116 : vector<16x1xf32> to vector<16x16xf32>
      %118 = arith.subf %114, %117 : vector<16x16xf32>
      %119 = math.exp %118 : vector<16x16xf32>
      %cst_73 = arith.constant dense<0.000000e+00> : vector<16xf32>
      %120 = vector.multi_reduction <add>, %119, %cst_73 [1] : vector<16x16xf32> to vector<16xf32>
      %121 = vector.shape_cast %120 : vector<16xf32> to vector<16x1xf32>
      %122 = tpu.reciprocal %121 {approx = true} : vector<16x1xf32> -> vector<16x1xf32>
      %cst_74 = arith.constant dense<0.000000e+00> : vector<16x8xf32>
      %123 = tpu.matmul %119, %113, %cst_74 {dimension_numbers = #tpu.dot_dimension_numbers<[1], [0], [0], [1], [0, 0, 1, 1], [], []>} : vector<16x16xf32>, vector<16x8xf32>, vector<16x8xf32> -> vector<16x8xf32>
      %124 = vector.broadcast %122 : vector<16x1xf32> to vector<16x8xf32>
      %125 = arith.mulf %123, %124 : vector<16x8xf32>
      %c0_75 = arith.constant 0 : index
      %c16_76 = arith.constant 16 : index
      %126 = vector.load %arg38[%c0_75, %c16_76] : memref<16x32xf32, #tpu.memory_space<vmem>>, vector<16x8xf32>
      tpu.vector_store %arg38[%c0_75, %c16_76], %125 {strides = array<i32>} : memref<16x32xf32, #tpu.memory_space<vmem>>, vector<16x8xf32>,
      %c0_77 = arith.constant 0 : index
      %c24 = arith.constant 24 : index
      %127 = vector.load %arg37[%c0_77, %c24] : memref<16x96xf32, #tpu.memory_space<vmem>>, vector<16x8xf32>
      %cst_78 = arith.constant 0.353553385 : f32
      %128 = vector.broadcast %cst_78 : f32 to vector<16x8xf32>
      %129 = arith.mulf %127, %128 : vector<16x8xf32>
      %c0_79 = arith.constant 0 : index
      %c56 = arith.constant 56 : index
      %130 = vector.load %arg37[%c0_79, %c56] : memref<16x96xf32, #tpu.memory_space<vmem>>, vector<16x8xf32>
      %c0_80 = arith.constant 0 : index
      %c88 = arith.constant 88 : index
      %131 = vector.load %arg37[%c0_80, %c88] : memref<16x96xf32, #tpu.memory_space<vmem>>, vector<16x8xf32>
      %cst_81 = arith.constant dense<0.000000e+00> : vector<16x16xf32>
      %132 = tpu.matmul %129, %130, %cst_81 {dimension_numbers = #tpu.dot_dimension_numbers<[1], [1], [0], [0], [0, 0, 1, 0], [], []>} : vector<16x8xf32>, vector<16x8xf32>, vector<16x16xf32> -> vector<16x16xf32>
      %cst_82 = arith.constant dense<0xFF800000> : vector<16xf32>
      %133 = vector.multi_reduction <maximumf>, %132, %cst_82 [1] : vector<16x16xf32> to vector<16xf32>
      %134 = vector.shape_cast %133 : vector<16xf32> to vector<16x1xf32>
      %135 = vector.broadcast %134 : vector<16x1xf32> to vector<16x16xf32>
      %136 = arith.subf %132, %135 : vector<16x16xf32>
      %137 = math.exp %136 : vector<16x16xf32>
      %cst_83 = arith.constant dense<0.000000e+00> : vector<16xf32>
      %138 = vector.multi_reduction <add>, %137, %cst_83 [1] : vector<16x16xf32> to vector<16xf32>
      %139 = vector.shape_cast %138 : vector<16xf32> to vector<16x1xf32>
      %140 = tpu.reciprocal %139 {approx = true} : vector<16x1xf32> -> vector<16x1xf32>
      %cst_84 = arith.constant dense<0.000000e+00> : vector<16x8xf32>
      %141 = tpu.matmul %137, %131, %cst_84 {dimension_numbers = #tpu.dot_dimension_numbers<[1], [0], [0], [1], [0, 0, 1, 1], [], []>} : vector<16x16xf32>, vector<16x8xf32>, vector<16x8xf32> -> vector<16x8xf32>
      %142 = vector.broadcast %140 : vector<16x1xf32> to vector<16x8xf32>
      %143 = arith.mulf %141, %142 : vector<16x8xf32>
      %c0_85 = arith.constant 0 : index
      %c24_86 = arith.constant 24 : index
      %144 = vector.load %arg38[%c0_85, %c24_86] : memref<16x32xf32, #tpu.memory_space<vmem>>, vector<16x8xf32>
      tpu.vector_store %arg38[%c0_85, %c24_86], %143 {strides = array<i32>} : memref<16x32xf32, #tpu.memory_space<vmem>>, vector<16x8xf32>,
      %c0_87 = arith.constant 0 : index
      %c0_88 = arith.constant 0 : index
      %145 = vector.load %arg38[%c0_87, %c0_88] : memref<16x32xf32, #tpu.memory_space<vmem>>, vector<16x32xf32>
      %c0_89 = arith.constant 0 : index
      %c0_90 = arith.constant 0 : index
      %146 = vector.load %arg8[%c0_89, %c0_90] : memref<32x32xf32, #tpu.memory_space<vmem>>, vector<32x32xf32>
      %cst_91 = arith.constant dense<0.000000e+00> : vector<16x32xf32>
      %147 = tpu.matmul %145, %146, %cst_91 {dimension_numbers = #tpu.dot_dimension_numbers<[1], [0], [0], [1], [0, 0, 1, 1], [], []>} : vector<16x32xf32>, vector<32x32xf32>, vector<16x32xf32> -> vector<16x32xf32>
      %c0_92 = arith.constant 0 : index
      %c0_93 = arith.constant 0 : index
      %148 = vector.load %arg9[%c0_92, %c0_93] : memref<1x32xf32, #tpu.memory_space<vmem>>, vector<1x32xf32>
      %149 = vector.broadcast %148 : vector<1x32xf32> to vector<16x32xf32>
      %150 = arith.addf %147, %149 : vector<16x32xf32>
      %151 = arith.addf %42, %150 : vector<16x32xf32>
      %c0_94 = arith.constant 0 : index
      %c0_95 = arith.constant 0 : index
      %152 = vector.load %arg10[%c0_94, %c0_95] : memref<1x32xf32, #tpu.memory_space<vmem>>, vector<1x32xf32>
      %c0_96 = arith.constant 0 : index
      %c0_97 = arith.constant 0 : index
      %153 = vector.load %arg11[%c0_96, %c0_97] : memref<1x32xf32, #tpu.memory_space<vmem>>, vector<1x32xf32>
      %cst_98 = arith.constant dense<0.000000e+00> : vector<16xf32>
      %154 = vector.multi_reduction <add>, %151, %cst_98 [1] : vector<16x32xf32> to vector<16xf32>
      %155 = vector.shape_cast %154 : vector<16xf32> to vector<16x1xf32>
      %cst_99 = arith.constant 3.200000e+01 : f32
      %156 = vector.broadcast %cst_99 : f32 to vector<16x1xf32>
      %157 = arith.divf %155, %156 : vector<16x1xf32>
      %158 = vector.broadcast %157 : vector<16x1xf32> to vector<16x32xf32>
      %159 = arith.subf %151, %158 : vector<16x32xf32>
      %160 = arith.mulf %159, %159 : vector<16x32xf32>
      %cst_100 = arith.constant dense<0.000000e+00> : vector<16xf32>
      %161 = vector.multi_reduction <add>, %160, %cst_100 [1] : vector<16x32xf32> to vector<16xf32>
      %162 = vector.shape_cast %161 : vector<16xf32> to vector<16x1xf32>
      %cst_101 = arith.constant 3.200000e+01 : f32
      %163 = vector.broadcast %cst_101 : f32 to vector<16x1xf32>
      %164 = arith.divf %162, %163 : vector<16x1xf32>
      %165 = vector.broadcast %157 : vector<16x1xf32> to vector<16x32xf32>
      %166 = arith.subf %151, %165 : vector<16x32xf32>
      %cst_102 = arith.constant 9.99999974E-6 : f32
      %167 = vector.broadcast %cst_102 : f32 to vector<16x1xf32>
      %168 = arith.addf %164, %167 : vector<16x1xf32>
      %169 = math.rsqrt %168 : vector<16x1xf32>
      %170 = vector.broadcast %169 : vector<16x1xf32> to vector<16x32xf32>
      %171 = arith.mulf %166, %170 : vector<16x32xf32>
      %172 = vector.broadcast %152 : vector<1x32xf32> to vector<16x32xf32>
      %173 = arith.mulf %171, %172 : vector<16x32xf32>
      %174 = vector.broadcast %153 : vector<1x32xf32> to vector<16x32xf32>
      %175 = arith.addf %173, %174 : vector<16x32xf32>
      %c0_103 = arith.constant 0 : index
      %c0_104 = arith.constant 0 : index
      %176 = vector.load %arg12[%c0_103, %c0_104] : memref<32x32xf32, #tpu.memory_space<vmem>>, vector<32x32xf32>
      %cst_105 = arith.constant dense<0.000000e+00> : vector<16x32xf32>
      %177 = tpu.matmul %175, %176, %cst_105 {dimension_numbers = #tpu.dot_dimension_numbers<[1], [0], [0], [1], [0, 0, 1, 1], [], []>} : vector<16x32xf32>, vector<32x32xf32>, vector<16x32xf32> -> vector<16x32xf32>
      %c0_106 = arith.constant 0 : index
      %c0_107 = arith.constant 0 : index
      %178 = vector.load %arg13[%c0_106, %c0_107] : memref<1x32xf32, #tpu.memory_space<vmem>>, vector<1x32xf32>
      %179 = vector.broadcast %178 : vector<1x32xf32> to vector<16x32xf32>
      %180 = arith.addf %177, %179 : vector<16x32xf32>
      %181 = arith.negf %180 : vector<16x32xf32>
      %182 = math.exp %181 : vector<16x32xf32>
      %cst_108 = arith.constant 1.000000e+00 : f32
      %183 = vector.broadcast %cst_108 : f32 to vector<16x32xf32>
      %184 = arith.addf %183, %182 : vector<16x32xf32>
      %185 = arith.divf %183, %184 : vector<16x32xf32>
      %186 = arith.mulf %180, %185 : vector<16x32xf32>
      %c0_109 = arith.constant 0 : index
      %c0_110 = arith.constant 0 : index
      %187 = vector.load %arg14[%c0_109, %c0_110] : memref<32x32xf32, #tpu.memory_space<vmem>>, vector<32x32xf32>
      %cst_111 = arith.constant dense<0.000000e+00> : vector<16x32xf32>
      %188 = tpu.matmul %186, %187, %cst_111 {dimension_numbers = #tpu.dot_dimension_numbers<[1], [0], [0], [1], [0, 0, 1, 1], [], []>} : vector<16x32xf32>, vector<32x32xf32>, vector<16x32xf32> -> vector<16x32xf32>
      %189 = arith.addf %151, %188 : vector<16x32xf32>
      %c0_112 = arith.constant 0 : index
      %c0_113 = arith.constant 0 : index
      %190 = vector.load %arg15[%c0_112, %c0_113] : memref<1x32xf32, #tpu.memory_space<vmem>>, vector<1x32xf32>
      %191 = vector.broadcast %190 : vector<1x32xf32> to vector<16x32xf32>
      %192 = arith.addf %189, %191 : vector<16x32xf32>
      %c0_114 = arith.constant 0 : index
      %c0_115 = arith.constant 0 : index
      %193 = vector.load %arg36[%c0_114, %c0_115] : memref<16x32xf32, #tpu.memory_space<vmem>>, vector<16x32xf32>
      tpu.vector_store %arg36[%c0_114, %c0_115], %192 {strides = array<i32>} : memref<16x32xf32, #tpu.memory_space<vmem>>, vector<16x32xf32>,
      %c0_116 = arith.constant 0 : index
      %c0_117 = arith.constant 0 : index
      %194 = vector.load %arg36[%c0_116, %c0_117] : memref<16x32xf32, #tpu.memory_space<vmem>>, vector<16x32xf32>
      %c1_118 = arith.constant 1 : index
      %c0_119 = arith.constant 0 : index
      %c0_120 = arith.constant 0 : index
      %195 = vector.load %arg16[%c1_118, %c0_119, %c0_120] : memref<3x32x64xf32, #tpu.memory_space<vmem>>, vector<1x32x64xf32>
      %196 = vector.shape_cast %195 : vector<1x32x64xf32> to vector<32x64xf32>
      %cst_121 = arith.constant dense<0.000000e+00> : vector<16x64xf32>
      %197 = tpu.matmul %194, %196, %cst_121 {dimension_numbers = #tpu.dot_dimension_numbers<[1], [0], [0], [1], [0, 0, 1, 1], [], []>} : vector<16x32xf32>, vector<32x64xf32>, vector<16x64xf32> -> vector<16x64xf32>
      %c0_122 = arith.constant 0 : index
      %c0_123 = arith.constant 0 : index
      %198 = vector.load %arg17[%c0_122, %c0_123] : memref<1x64xf32, #tpu.memory_space<vmem>>, vector<1x64xf32>
      %199 = vector.broadcast %198 : vector<1x64xf32> to vector<16x64xf32>
      %200 = arith.addf %197, %199 : vector<16x64xf32>
      %c0_124 = arith.constant 0 : index
      %c0_125 = arith.constant 0 : index
      %201 = vector.load %arg39[%c0_124, %c0_125] : memref<16x64xf32, #tpu.memory_space<vmem>>, vector<16x64xf32>
      tpu.vector_store %arg39[%c0_124, %c0_125], %200 {strides = array<i32>} : memref<16x64xf32, #tpu.memory_space<vmem>>, vector<16x64xf32>,
      %c1_126 = arith.constant 1 : index
      %c0_127 = arith.constant 0 : index
      %202 = vector.load %arg39[%c1_126, %c0_127] : memref<16x64xf32, #tpu.memory_space<vmem>>, vector<15x64xf32>
      %c0_128 = arith.constant 0 : index
      %c0_129 = arith.constant 0 : index
      %203 = vector.load %arg36[%c0_128, %c0_129] : memref<16x32xf32, #tpu.memory_space<vmem>>, vector<15x32xf32>
      %c0_130 = arith.constant 0 : index
      %c0_131 = arith.constant 0 : index
      %c0_132 = arith.constant 0 : index
      %204 = vector.load %arg16[%c0_130, %c0_131, %c0_132] : memref<3x32x64xf32, #tpu.memory_space<vmem>>, vector<1x32x64xf32>
      %205 = vector.shape_cast %204 : vector<1x32x64xf32> to vector<32x64xf32>
      %cst_133 = arith.constant dense<0.000000e+00> : vector<15x64xf32>
      %206 = tpu.matmul %203, %205, %cst_133 {dimension_numbers = #tpu.dot_dimension_numbers<[1], [0], [0], [1], [0, 0, 1, 1], [], []>} : vector<15x32xf32>, vector<32x64xf32>, vector<15x64xf32> -> vector<15x64xf32>
      %207 = arith.addf %202, %206 : vector<15x64xf32>
      %c1_134 = arith.constant 1 : index
      %c0_135 = arith.constant 0 : index
      %208 = vector.load %arg39[%c1_134, %c0_135] : memref<16x64xf32, #tpu.memory_space<vmem>>, vector<15x64xf32>
      tpu.vector_store %arg39[%c1_134, %c0_135], %207 {strides = array<i32>} : memref<16x64xf32, #tpu.memory_space<vmem>>, vector<15x64xf32>,
      %c0_136 = arith.constant 0 : index
      %c0_137 = arith.constant 0 : index
      %209 = vector.load %arg39[%c0_136, %c0_137] : memref<16x64xf32, #tpu.memory_space<vmem>>, vector<15x64xf32>
      %c1_138 = arith.constant 1 : index
      %c0_139 = arith.constant 0 : index
      %210 = vector.load %arg36[%c1_138, %c0_139] : memref<16x32xf32, #tpu.memory_space<vmem>>, vector<15x32xf32>
      %c2_140 = arith.constant 2 : index
      %c0_141 = arith.constant 0 : index
      %c0_142 = arith.constant 0 : index
      %211 = vector.load %arg16[%c2_140, %c0_141, %c0_142] : memref<3x32x64xf32, #tpu.memory_space<vmem>>, vector<1x32x64xf32>
      %212 = vector.shape_cast %211 : vector<1x32x64xf32> to vector<32x64xf32>
      %cst_143 = arith.constant dense<0.000000e+00> : vector<15x64xf32>
      %213 = tpu.matmul %210, %212, %cst_143 {dimension_numbers = #tpu.dot_dimension_numbers<[1], [0], [0], [1], [0, 0, 1, 1], [], []>} : vector<15x32xf32>, vector<32x64xf32>, vector<15x64xf32> -> vector<15x64xf32>
      %214 = arith.addf %209, %213 : vector<15x64xf32>
      %c0_144 = arith.constant 0 : index
      %c0_145 = arith.constant 0 : index
      %215 = vector.load %arg39[%c0_144, %c0_145] : memref<16x64xf32, #tpu.memory_space<vmem>>, vector<15x64xf32>
      tpu.vector_store %arg39[%c0_144, %c0_145], %214 {strides = array<i32>} : memref<16x64xf32, #tpu.memory_space<vmem>>, vector<15x64xf32>,
      %c0_146 = arith.constant 0 : index
      %c0_147 = arith.constant 0 : index
      %216 = tpu.strided_load %arg39[%c0_146, %c0_147] {strides = array<i32: 2, 1>} : memref<16x64xf32, #tpu.memory_space<vmem>>, vector<8x64xf32>
      %cst_148 = arith.constant 0.000000e+00 : f32
      %217 = vector.broadcast %cst_148 : f32 to vector<8x64xf32>
      %218 = arith.maximumf %216, %217 : vector<8x64xf32>
      %c1_149 = arith.constant 1 : index
      %c0_150 = arith.constant 0 : index
      %219 = tpu.strided_load %arg39[%c1_149, %c0_150] {strides = array<i32: 2, 1>} : memref<16x64xf32, #tpu.memory_space<vmem>>, vector<8x64xf32>
      %cst_151 = arith.constant 0.000000e+00 : f32
      %220 = vector.broadcast %cst_151 : f32 to vector<8x64xf32>
      %221 = arith.maximumf %219, %220 : vector<8x64xf32>
      %222 = arith.addf %218, %221 : vector<8x64xf32>
      %cst_152 = arith.constant 5.000000e-01 : f32
      %223 = vector.broadcast %cst_152 : f32 to vector<8x64xf32>
      %224 = arith.mulf %223, %222 : vector<8x64xf32>
      %c0_153 = arith.constant 0 : index
      %c0_154 = arith.constant 0 : index
      %225 = vector.load %arg18[%c0_153, %c0_154] : memref<1x64xf32, #tpu.memory_space<vmem>>, vector<1x64xf32>
      %c0_155 = arith.constant 0 : index
      %c0_156 = arith.constant 0 : index
      %226 = vector.load %arg19[%c0_155, %c0_156] : memref<1x64xf32, #tpu.memory_space<vmem>>, vector<1x64xf32>
      %cst_157 = arith.constant dense<0.000000e+00> : vector<8xf32>
      %227 = vector.multi_reduction <add>, %224, %cst_157 [1] : vector<8x64xf32> to vector<8xf32>
      %228 = vector.shape_cast %227 : vector<8xf32> to vector<8x1xf32>
      %cst_158 = arith.constant 6.400000e+01 : f32
      %229 = vector.broadcast %cst_158 : f32 to vector<8x1xf32>
      %230 = arith.divf %228, %229 : vector<8x1xf32>
      %231 = vector.broadcast %230 : vector<8x1xf32> to vector<8x64xf32>
      %232 = arith.subf %224, %231 : vector<8x64xf32>
      %233 = arith.mulf %232, %232 : vector<8x64xf32>
      %cst_159 = arith.constant dense<0.000000e+00> : vector<8xf32>
      %234 = vector.multi_reduction <add>, %233, %cst_159 [1] : vector<8x64xf32> to vector<8xf32>
      %235 = vector.shape_cast %234 : vector<8xf32> to vector<8x1xf32>
      %cst_160 = arith.constant 6.400000e+01 : f32
      %236 = vector.broadcast %cst_160 : f32 to vector<8x1xf32>
      %237 = arith.divf %235, %236 : vector<8x1xf32>
      %238 = vector.broadcast %230 : vector<8x1xf32> to vector<8x64xf32>
      %239 = arith.subf %224, %238 : vector<8x64xf32>
      %cst_161 = arith.constant 9.99999974E-6 : f32
      %240 = vector.broadcast %cst_161 : f32 to vector<8x1xf32>
      %241 = arith.addf %237, %240 : vector<8x1xf32>
      %242 = math.rsqrt %241 : vector<8x1xf32>
      %243 = vector.broadcast %242 : vector<8x1xf32> to vector<8x64xf32>
      %244 = arith.mulf %239, %243 : vector<8x64xf32>
      %245 = vector.broadcast %225 : vector<1x64xf32> to vector<8x64xf32>
      %246 = arith.mulf %244, %245 : vector<8x64xf32>
      %247 = vector.broadcast %226 : vector<1x64xf32> to vector<8x64xf32>
      %248 = arith.addf %246, %247 : vector<8x64xf32>
      %c0_162 = arith.constant 0 : index
      %c0_163 = arith.constant 0 : index
      %249 = vector.load %arg20[%c0_162, %c0_163] : memref<64x192xf32, #tpu.memory_space<vmem>>, vector<64x192xf32>
      %cst_164 = arith.constant dense<0.000000e+00> : vector<8x192xf32>
      %250 = tpu.matmul %248, %249, %cst_164 {dimension_numbers = #tpu.dot_dimension_numbers<[1], [0], [0], [1], [0, 0, 1, 1], [], []>} : vector<8x64xf32>, vector<64x192xf32>, vector<8x192xf32> -> vector<8x192xf32>
      %c0_165 = arith.constant 0 : index
      %c0_166 = arith.constant 0 : index
      %251 = vector.load %arg21[%c0_165, %c0_166] : memref<1x192xf32, #tpu.memory_space<vmem>>, vector<1x192xf32>
      %252 = vector.broadcast %251 : vector<1x192xf32> to vector<8x192xf32>
      %253 = arith.addf %250, %252 : vector<8x192xf32>
      %c0_167 = arith.constant 0 : index
      %c0_168 = arith.constant 0 : index
      %254 = vector.load %arg41[%c0_167, %c0_168] : memref<8x192xf32, #tpu.memory_space<vmem>>, vector<8x192xf32>
      tpu.vector_store %arg41[%c0_167, %c0_168], %253 {strides = array<i32>} : memref<8x192xf32, #tpu.memory_space<vmem>>, vector<8x192xf32>,
      %c0_169 = arith.constant 0 : index
      %c0_170 = arith.constant 0 : index
      %255 = vector.load %arg41[%c0_169, %c0_170] : memref<8x192xf32, #tpu.memory_space<vmem>>, vector<8x16xf32>
      %cst_171 = arith.constant 2.500000e-01 : f32
      %256 = vector.broadcast %cst_171 : f32 to vector<8x16xf32>
      %257 = arith.mulf %255, %256 : vector<8x16xf32>
      %c0_172 = arith.constant 0 : index
      %c64_173 = arith.constant 64 : index
      %258 = vector.load %arg41[%c0_172, %c64_173] : memref<8x192xf32, #tpu.memory_space<vmem>>, vector<8x16xf32>
      %c0_174 = arith.constant 0 : index
      %c128 = arith.constant 128 : index
      %259 = vector.load %arg41[%c0_174, %c128] : memref<8x192xf32, #tpu.memory_space<vmem>>, vector<8x16xf32>
      %cst_175 = arith.constant dense<0.000000e+00> : vector<8x8xf32>
      %260 = tpu.matmul %257, %258, %cst_175 {dimension_numbers = #tpu.dot_dimension_numbers<[1], [1], [0], [0], [0, 0, 1, 0], [], []>} : vector<8x16xf32>, vector<8x16xf32>, vector<8x8xf32> -> vector<8x8xf32>
      %cst_176 = arith.constant dense<0xFF800000> : vector<8xf32>
      %261 = vector.multi_reduction <maximumf>, %260, %cst_176 [1] : vector<8x8xf32> to vector<8xf32>
      %262 = vector.shape_cast %261 : vector<8xf32> to vector<8x1xf32>
      %263 = vector.broadcast %262 : vector<8x1xf32> to vector<8x8xf32>
      %264 = arith.subf %260, %263 : vector<8x8xf32>
      %265 = math.exp %264 : vector<8x8xf32>
      %cst_177 = arith.constant dense<0.000000e+00> : vector<8xf32>
      %266 = vector.multi_reduction <add>, %265, %cst_177 [1] : vector<8x8xf32> to vector<8xf32>
      %267 = vector.shape_cast %266 : vector<8xf32> to vector<8x1xf32>
      %268 = tpu.reciprocal %267 {approx = true} : vector<8x1xf32> -> vector<8x1xf32>
      %cst_178 = arith.constant dense<0.000000e+00> : vector<8x16xf32>
      %269 = tpu.matmul %265, %259, %cst_178 {dimension_numbers = #tpu.dot_dimension_numbers<[1], [0], [0], [1], [0, 0, 1, 1], [], []>} : vector<8x8xf32>, vector<8x16xf32>, vector<8x16xf32> -> vector<8x16xf32>
      %270 = vector.broadcast %268 : vector<8x1xf32> to vector<8x16xf32>
      %271 = arith.mulf %269, %270 : vector<8x16xf32>
      %c0_179 = arith.constant 0 : index
      %c0_180 = arith.constant 0 : index
      %272 = vector.load %arg42[%c0_179, %c0_180] : memref<8x64xf32, #tpu.memory_space<vmem>>, vector<8x16xf32>
      tpu.vector_store %arg42[%c0_179, %c0_180], %271 {strides = array<i32>} : memref<8x64xf32, #tpu.memory_space<vmem>>, vector<8x16xf32>,
      %c0_181 = arith.constant 0 : index
      %c16_182 = arith.constant 16 : index
      %273 = vector.load %arg41[%c0_181, %c16_182] : memref<8x192xf32, #tpu.memory_space<vmem>>, vector<8x16xf32>
      %cst_183 = arith.constant 2.500000e-01 : f32
      %274 = vector.broadcast %cst_183 : f32 to vector<8x16xf32>
      %275 = arith.mulf %273, %274 : vector<8x16xf32>
      %c0_184 = arith.constant 0 : index
      %c80_185 = arith.constant 80 : index
      %276 = vector.load %arg41[%c0_184, %c80_185] : memref<8x192xf32, #tpu.memory_space<vmem>>, vector<8x16xf32>
      %c0_186 = arith.constant 0 : index
      %c144 = arith.constant 144 : index
      %277 = vector.load %arg41[%c0_186, %c144] : memref<8x192xf32, #tpu.memory_space<vmem>>, vector<8x16xf32>
      %cst_187 = arith.constant dense<0.000000e+00> : vector<8x8xf32>
      %278 = tpu.matmul %275, %276, %cst_187 {dimension_numbers = #tpu.dot_dimension_numbers<[1], [1], [0], [0], [0, 0, 1, 0], [], []>} : vector<8x16xf32>, vector<8x16xf32>, vector<8x8xf32> -> vector<8x8xf32>
      %cst_188 = arith.constant dense<0xFF800000> : vector<8xf32>
      %279 = vector.multi_reduction <maximumf>, %278, %cst_188 [1] : vector<8x8xf32> to vector<8xf32>
      %280 = vector.shape_cast %279 : vector<8xf32> to vector<8x1xf32>
      %281 = vector.broadcast %280 : vector<8x1xf32> to vector<8x8xf32>
      %282 = arith.subf %278, %281 : vector<8x8xf32>
      %283 = math.exp %282 : vector<8x8xf32>
      %cst_189 = arith.constant dense<0.000000e+00> : vector<8xf32>
      %284 = vector.multi_reduction <add>, %283, %cst_189 [1] : vector<8x8xf32> to vector<8xf32>
      %285 = vector.shape_cast %284 : vector<8xf32> to vector<8x1xf32>
      %286 = tpu.reciprocal %285 {approx = true} : vector<8x1xf32> -> vector<8x1xf32>
      %cst_190 = arith.constant dense<0.000000e+00> : vector<8x16xf32>
      %287 = tpu.matmul %283, %277, %cst_190 {dimension_numbers = #tpu.dot_dimension_numbers<[1], [0], [0], [1], [0, 0, 1, 1], [], []>} : vector<8x8xf32>, vector<8x16xf32>, vector<8x16xf32> -> vector<8x16xf32>
      %288 = vector.broadcast %286 : vector<8x1xf32> to vector<8x16xf32>
      %289 = arith.mulf %287, %288 : vector<8x16xf32>
      %c0_191 = arith.constant 0 : index
      %c16_192 = arith.constant 16 : index
      %290 = vector.load %arg42[%c0_191, %c16_192] : memref<8x64xf32, #tpu.memory_space<vmem>>, vector<8x16xf32>
      tpu.vector_store %arg42[%c0_191, %c16_192], %289 {strides = array<i32>} : memref<8x64xf32, #tpu.memory_space<vmem>>, vector<8x16xf32>,
      %c0_193 = arith.constant 0 : index
      %c32_194 = arith.constant 32 : index
      %291 = vector.load %arg41[%c0_193, %c32_194] : memref<8x192xf32, #tpu.memory_space<vmem>>, vector<8x16xf32>
      %cst_195 = arith.constant 2.500000e-01 : f32
      %292 = vector.broadcast %cst_195 : f32 to vector<8x16xf32>
      %293 = arith.mulf %291, %292 : vector<8x16xf32>
      %c0_196 = arith.constant 0 : index
      %c96 = arith.constant 96 : index
      %294 = vector.load %arg41[%c0_196, %c96] : memref<8x192xf32, #tpu.memory_space<vmem>>, vector<8x16xf32>
      %c0_197 = arith.constant 0 : index
      %c160 = arith.constant 160 : index
      %295 = vector.load %arg41[%c0_197, %c160] : memref<8x192xf32, #tpu.memory_space<vmem>>, vector<8x16xf32>
      %cst_198 = arith.constant dense<0.000000e+00> : vector<8x8xf32>
      %296 = tpu.matmul %293, %294, %cst_198 {dimension_numbers = #tpu.dot_dimension_numbers<[1], [1], [0], [0], [0, 0, 1, 0], [], []>} : vector<8x16xf32>, vector<8x16xf32>, vector<8x8xf32> -> vector<8x8xf32>
      %cst_199 = arith.constant dense<0xFF800000> : vector<8xf32>
      %297 = vector.multi_reduction <maximumf>, %296, %cst_199 [1] : vector<8x8xf32> to vector<8xf32>
      %298 = vector.shape_cast %297 : vector<8xf32> to vector<8x1xf32>
      %299 = vector.broadcast %298 : vector<8x1xf32> to vector<8x8xf32>
      %300 = arith.subf %296, %299 : vector<8x8xf32>
      %301 = math.exp %300 : vector<8x8xf32>
      %cst_200 = arith.constant dense<0.000000e+00> : vector<8xf32>
      %302 = vector.multi_reduction <add>, %301, %cst_200 [1] : vector<8x8xf32> to vector<8xf32>
      %303 = vector.shape_cast %302 : vector<8xf32> to vector<8x1xf32>
      %304 = tpu.reciprocal %303 {approx = true} : vector<8x1xf32> -> vector<8x1xf32>
      %cst_201 = arith.constant dense<0.000000e+00> : vector<8x16xf32>
      %305 = tpu.matmul %301, %295, %cst_201 {dimension_numbers = #tpu.dot_dimension_numbers<[1], [0], [0], [1], [0, 0, 1, 1], [], []>} : vector<8x8xf32>, vector<8x16xf32>, vector<8x16xf32> -> vector<8x16xf32>
      %306 = vector.broadcast %304 : vector<8x1xf32> to vector<8x16xf32>
      %307 = arith.mulf %305, %306 : vector<8x16xf32>
      %c0_202 = arith.constant 0 : index
      %c32_203 = arith.constant 32 : index
      %308 = vector.load %arg42[%c0_202, %c32_203] : memref<8x64xf32, #tpu.memory_space<vmem>>, vector<8x16xf32>
      tpu.vector_store %arg42[%c0_202, %c32_203], %307 {strides = array<i32>} : memref<8x64xf32, #tpu.memory_space<vmem>>, vector<8x16xf32>,
      %c0_204 = arith.constant 0 : index
      %c48_205 = arith.constant 48 : index
      %309 = vector.load %arg41[%c0_204, %c48_205] : memref<8x192xf32, #tpu.memory_space<vmem>>, vector<8x16xf32>
      %cst_206 = arith.constant 2.500000e-01 : f32
      %310 = vector.broadcast %cst_206 : f32 to vector<8x16xf32>
      %311 = arith.mulf %309, %310 : vector<8x16xf32>
      %c0_207 = arith.constant 0 : index
      %c112 = arith.constant 112 : index
      %312 = vector.load %arg41[%c0_207, %c112] : memref<8x192xf32, #tpu.memory_space<vmem>>, vector<8x16xf32>
      %c0_208 = arith.constant 0 : index
      %c176 = arith.constant 176 : index
      %313 = vector.load %arg41[%c0_208, %c176] : memref<8x192xf32, #tpu.memory_space<vmem>>, vector<8x16xf32>
      %cst_209 = arith.constant dense<0.000000e+00> : vector<8x8xf32>
      %314 = tpu.matmul %311, %312, %cst_209 {dimension_numbers = #tpu.dot_dimension_numbers<[1], [1], [0], [0], [0, 0, 1, 0], [], []>} : vector<8x16xf32>, vector<8x16xf32>, vector<8x8xf32> -> vector<8x8xf32>
      %cst_210 = arith.constant dense<0xFF800000> : vector<8xf32>
      %315 = vector.multi_reduction <maximumf>, %314, %cst_210 [1] : vector<8x8xf32> to vector<8xf32>
      %316 = vector.shape_cast %315 : vector<8xf32> to vector<8x1xf32>
      %317 = vector.broadcast %316 : vector<8x1xf32> to vector<8x8xf32>
      %318 = arith.subf %314, %317 : vector<8x8xf32>
      %319 = math.exp %318 : vector<8x8xf32>
      %cst_211 = arith.constant dense<0.000000e+00> : vector<8xf32>
      %320 = vector.multi_reduction <add>, %319, %cst_211 [1] : vector<8x8xf32> to vector<8xf32>
      %321 = vector.shape_cast %320 : vector<8xf32> to vector<8x1xf32>
      %322 = tpu.reciprocal %321 {approx = true} : vector<8x1xf32> -> vector<8x1xf32>
      %cst_212 = arith.constant dense<0.000000e+00> : vector<8x16xf32>
      %323 = tpu.matmul %319, %313, %cst_212 {dimension_numbers = #tpu.dot_dimension_numbers<[1], [0], [0], [1], [0, 0, 1, 1], [], []>} : vector<8x8xf32>, vector<8x16xf32>, vector<8x16xf32> -> vector<8x16xf32>
      %324 = vector.broadcast %322 : vector<8x1xf32> to vector<8x16xf32>
      %325 = arith.mulf %323, %324 : vector<8x16xf32>
      %c0_213 = arith.constant 0 : index
      %c48_214 = arith.constant 48 : index
      %326 = vector.load %arg42[%c0_213, %c48_214] : memref<8x64xf32, #tpu.memory_space<vmem>>, vector<8x16xf32>
      tpu.vector_store %arg42[%c0_213, %c48_214], %325 {strides = array<i32>} : memref<8x64xf32, #tpu.memory_space<vmem>>, vector<8x16xf32>,
      %c0_215 = arith.constant 0 : index
      %c0_216 = arith.constant 0 : index
      %327 = vector.load %arg42[%c0_215, %c0_216] : memref<8x64xf32, #tpu.memory_space<vmem>>, vector<8x64xf32>
      %c0_217 = arith.constant 0 : index
      %c0_218 = arith.constant 0 : index
      %328 = vector.load %arg22[%c0_217, %c0_218] : memref<64x64xf32, #tpu.memory_space<vmem>>, vector<64x64xf32>
      %cst_219 = arith.constant dense<0.000000e+00> : vector<8x64xf32>
      %329 = tpu.matmul %327, %328, %cst_219 {dimension_numbers = #tpu.dot_dimension_numbers<[1], [0], [0], [1], [0, 0, 1, 1], [], []>} : vector<8x64xf32>, vector<64x64xf32>, vector<8x64xf32> -> vector<8x64xf32>
      %c0_220 = arith.constant 0 : index
      %c0_221 = arith.constant 0 : index
      %330 = vector.load %arg23[%c0_220, %c0_221] : memref<1x64xf32, #tpu.memory_space<vmem>>, vector<1x64xf32>
      %331 = vector.broadcast %330 : vector<1x64xf32> to vector<8x64xf32>
      %332 = arith.addf %329, %331 : vector<8x64xf32>
      %333 = arith.addf %224, %332 : vector<8x64xf32>
      %c0_222 = arith.constant 0 : index
      %c0_223 = arith.constant 0 : index
      %334 = vector.load %arg24[%c0_222, %c0_223] : memref<1x64xf32, #tpu.memory_space<vmem>>, vector<1x64xf32>
      %c0_224 = arith.constant 0 : index
      %c0_225 = arith.constant 0 : index
      %335 = vector.load %arg25[%c0_224, %c0_225] : memref<1x64xf32, #tpu.memory_space<vmem>>, vector<1x64xf32>
      %cst_226 = arith.constant dense<0.000000e+00> : vector<8xf32>
      %336 = vector.multi_reduction <add>, %333, %cst_226 [1] : vector<8x64xf32> to vector<8xf32>
      %337 = vector.shape_cast %336 : vector<8xf32> to vector<8x1xf32>
      %cst_227 = arith.constant 6.400000e+01 : f32
      %338 = vector.broadcast %cst_227 : f32 to vector<8x1xf32>
      %339 = arith.divf %337, %338 : vector<8x1xf32>
      %340 = vector.broadcast %339 : vector<8x1xf32> to vector<8x64xf32>
      %341 = arith.subf %333, %340 : vector<8x64xf32>
      %342 = arith.mulf %341, %341 : vector<8x64xf32>
      %cst_228 = arith.constant dense<0.000000e+00> : vector<8xf32>
      %343 = vector.multi_reduction <add>, %342, %cst_228 [1] : vector<8x64xf32> to vector<8xf32>
      %344 = vector.shape_cast %343 : vector<8xf32> to vector<8x1xf32>
      %cst_229 = arith.constant 6.400000e+01 : f32
      %345 = vector.broadcast %cst_229 : f32 to vector<8x1xf32>
      %346 = arith.divf %344, %345 : vector<8x1xf32>
      %347 = vector.broadcast %339 : vector<8x1xf32> to vector<8x64xf32>
      %348 = arith.subf %333, %347 : vector<8x64xf32>
      %cst_230 = arith.constant 9.99999974E-6 : f32
      %349 = vector.broadcast %cst_230 : f32 to vector<8x1xf32>
      %350 = arith.addf %346, %349 : vector<8x1xf32>
      %351 = math.rsqrt %350 : vector<8x1xf32>
      %352 = vector.broadcast %351 : vector<8x1xf32> to vector<8x64xf32>
      %353 = arith.mulf %348, %352 : vector<8x64xf32>
      %354 = vector.broadcast %334 : vector<1x64xf32> to vector<8x64xf32>
      %355 = arith.mulf %353, %354 : vector<8x64xf32>
      %356 = vector.broadcast %335 : vector<1x64xf32> to vector<8x64xf32>
      %357 = arith.addf %355, %356 : vector<8x64xf32>
      %c0_231 = arith.constant 0 : index
      %c0_232 = arith.constant 0 : index
      %358 = vector.load %arg26[%c0_231, %c0_232] : memref<64x64xf32, #tpu.memory_space<vmem>>, vector<64x64xf32>
      %cst_233 = arith.constant dense<0.000000e+00> : vector<8x64xf32>
      %359 = tpu.matmul %357, %358, %cst_233 {dimension_numbers = #tpu.dot_dimension_numbers<[1], [0], [0], [1], [0, 0, 1, 1], [], []>} : vector<8x64xf32>, vector<64x64xf32>, vector<8x64xf32> -> vector<8x64xf32>
      %c0_234 = arith.constant 0 : index
      %c0_235 = arith.constant 0 : index
      %360 = vector.load %arg27[%c0_234, %c0_235] : memref<1x64xf32, #tpu.memory_space<vmem>>, vector<1x64xf32>
      %361 = vector.broadcast %360 : vector<1x64xf32> to vector<8x64xf32>
      %362 = arith.addf %359, %361 : vector<8x64xf32>
      %363 = arith.negf %362 : vector<8x64xf32>
      %364 = math.exp %363 : vector<8x64xf32>
      %cst_236 = arith.constant 1.000000e+00 : f32
      %365 = vector.broadcast %cst_236 : f32 to vector<8x64xf32>
      %366 = arith.addf %365, %364 : vector<8x64xf32>
      %367 = arith.divf %365, %366 : vector<8x64xf32>
      %368 = arith.mulf %362, %367 : vector<8x64xf32>
      %c0_237 = arith.constant 0 : index
      %c0_238 = arith.constant 0 : index
      %369 = vector.load %arg28[%c0_237, %c0_238] : memref<64x64xf32, #tpu.memory_space<vmem>>, vector<64x64xf32>
      %cst_239 = arith.constant dense<0.000000e+00> : vector<8x64xf32>
      %370 = tpu.matmul %368, %369, %cst_239 {dimension_numbers = #tpu.dot_dimension_numbers<[1], [0], [0], [1], [0, 0, 1, 1], [], []>} : vector<8x64xf32>, vector<64x64xf32>, vector<8x64xf32> -> vector<8x64xf32>
      %371 = arith.addf %333, %370 : vector<8x64xf32>
      %c0_240 = arith.constant 0 : index
      %c0_241 = arith.constant 0 : index
      %372 = vector.load %arg29[%c0_240, %c0_241] : memref<1x64xf32, #tpu.memory_space<vmem>>, vector<1x64xf32>
      %373 = vector.broadcast %372 : vector<1x64xf32> to vector<8x64xf32>
      %374 = arith.addf %371, %373 : vector<8x64xf32>
      %c0_242 = arith.constant 0 : index
      %c0_243 = arith.constant 0 : index
      %375 = vector.load %arg40[%c0_242, %c0_243] : memref<8x64xf32, #tpu.memory_space<vmem>>, vector<8x64xf32>
      tpu.vector_store %arg40[%c0_242, %c0_243], %374 {strides = array<i32>} : memref<8x64xf32, #tpu.memory_space<vmem>>, vector<8x64xf32>,
      %c0_244 = arith.constant 0 : index
      %c0_245 = arith.constant 0 : index
      %376 = vector.load %arg40[%c0_244, %c0_245] : memref<8x64xf32, #tpu.memory_space<vmem>>, vector<8x64xf32>
      %c1_246 = arith.constant 1 : index
      %c0_247 = arith.constant 0 : index
      %c0_248 = arith.constant 0 : index
      %377 = vector.load %arg30[%c1_246, %c0_247, %c0_248] : memref<3x64x32xf32, #tpu.memory_space<vmem>>, vector<1x64x32xf32>
      %378 = vector.shape_cast %377 : vector<1x64x32xf32> to vector<64x32xf32>
      %cst_249 = arith.constant dense<0.000000e+00> : vector<8x32xf32>
      %379 = tpu.matmul %376, %378, %cst_249 {dimension_numbers = #tpu.dot_dimension_numbers<[1], [0], [0], [1], [0, 0, 1, 1], [], []>} : vector<8x64xf32>, vector<64x32xf32>, vector<8x32xf32> -> vector<8x32xf32>
      %c0_250 = arith.constant 0 : index
      %c0_251 = arith.constant 0 : index
      %380 = vector.load %arg31[%c0_250, %c0_251] : memref<1x32xf32, #tpu.memory_space<vmem>>, vector<1x32xf32>
      %381 = vector.broadcast %380 : vector<1x32xf32> to vector<8x32xf32>
      %382 = arith.addf %379, %381 : vector<8x32xf32>
      %c0_252 = arith.constant 0 : index
      %c0_253 = arith.constant 0 : index
      %383 = vector.load %arg43[%c0_252, %c0_253] : memref<8x32xf32, #tpu.memory_space<vmem>>, vector<8x32xf32>
      tpu.vector_store %arg43[%c0_252, %c0_253], %382 {strides = array<i32>} : memref<8x32xf32, #tpu.memory_space<vmem>>, vector<8x32xf32>,
      %c1_254 = arith.constant 1 : index
      %c0_255 = arith.constant 0 : index
      %384 = vector.load %arg43[%c1_254, %c0_255] : memref<8x32xf32, #tpu.memory_space<vmem>>, vector<7x32xf32>
      %c0_256 = arith.constant 0 : index
      %c0_257 = arith.constant 0 : index
      %385 = vector.load %arg40[%c0_256, %c0_257] : memref<8x64xf32, #tpu.memory_space<vmem>>, vector<7x64xf32>
      %c0_258 = arith.constant 0 : index
      %c0_259 = arith.constant 0 : index
      %c0_260 = arith.constant 0 : index
      %386 = vector.load %arg30[%c0_258, %c0_259, %c0_260] : memref<3x64x32xf32, #tpu.memory_space<vmem>>, vector<1x64x32xf32>
      %387 = vector.shape_cast %386 : vector<1x64x32xf32> to vector<64x32xf32>
      %cst_261 = arith.constant dense<0.000000e+00> : vector<7x32xf32>
      %388 = tpu.matmul %385, %387, %cst_261 {dimension_numbers = #tpu.dot_dimension_numbers<[1], [0], [0], [1], [0, 0, 1, 1], [], []>} : vector<7x64xf32>, vector<64x32xf32>, vector<7x32xf32> -> vector<7x32xf32>
      %389 = arith.addf %384, %388 : vector<7x32xf32>
      %c1_262 = arith.constant 1 : index
      %c0_263 = arith.constant 0 : index
      %390 = vector.load %arg43[%c1_262, %c0_263] : memref<8x32xf32, #tpu.memory_space<vmem>>, vector<7x32xf32>
      tpu.vector_store %arg43[%c1_262, %c0_263], %389 {strides = array<i32>} : memref<8x32xf32, #tpu.memory_space<vmem>>, vector<7x32xf32>,
      %c0_264 = arith.constant 0 : index
      %c0_265 = arith.constant 0 : index
      %391 = vector.load %arg43[%c0_264, %c0_265] : memref<8x32xf32, #tpu.memory_space<vmem>>, vector<7x32xf32>
      %c1_266 = arith.constant 1 : index
      %c0_267 = arith.constant 0 : index
      %392 = vector.load %arg40[%c1_266, %c0_267] : memref<8x64xf32, #tpu.memory_space<vmem>>, vector<7x64xf32>
      %c2_268 = arith.constant 2 : index
      %c0_269 = arith.constant 0 : index
      %c0_270 = arith.constant 0 : index
      %393 = vector.load %arg30[%c2_268, %c0_269, %c0_270] : memref<3x64x32xf32, #tpu.memory_space<vmem>>, vector<1x64x32xf32>
      %394 = vector.shape_cast %393 : vector<1x64x32xf32> to vector<64x32xf32>
      %cst_271 = arith.constant dense<0.000000e+00> : vector<7x32xf32>
      %395 = tpu.matmul %392, %394, %cst_271 {dimension_numbers = #tpu.dot_dimension_numbers<[1], [0], [0], [1], [0, 0, 1, 1], [], []>} : vector<7x64xf32>, vector<64x32xf32>, vector<7x32xf32> -> vector<7x32xf32>
      %396 = arith.addf %391, %395 : vector<7x32xf32>
      %c0_272 = arith.constant 0 : index
      %c0_273 = arith.constant 0 : index
      %397 = vector.load %arg43[%c0_272, %c0_273] : memref<8x32xf32, #tpu.memory_space<vmem>>, vector<7x32xf32>
      tpu.vector_store %arg43[%c0_272, %c0_273], %396 {strides = array<i32>} : memref<8x32xf32, #tpu.memory_space<vmem>>, vector<7x32xf32>,
      %c0_274 = arith.constant 0 : index
      %c0_275 = arith.constant 0 : index
      %398 = vector.load %arg43[%c0_274, %c0_275] : memref<8x32xf32, #tpu.memory_space<vmem>>, vector<8x32xf32>
      %cst_276 = arith.constant 0.000000e+00 : f32
      %399 = vector.broadcast %cst_276 : f32 to vector<8x32xf32>
      %400 = arith.maximumf %398, %399 : vector<8x32xf32>
      %c0_277 = arith.constant 0 : index
      %c0_278 = arith.constant 0 : index
      %401 = vector.load %arg32[%c0_277, %c0_278] : memref<32x128xf32, #tpu.memory_space<vmem>>, vector<32x128xf32>
      %cst_279 = arith.constant dense<0.000000e+00> : vector<8x128xf32>
      %402 = tpu.matmul %400, %401, %cst_279 {dimension_numbers = #tpu.dot_dimension_numbers<[1], [0], [0], [1], [0, 0, 1, 1], [], []>} : vector<8x32xf32>, vector<32x128xf32>, vector<8x128xf32> -> vector<8x128xf32>
      %c0_280 = arith.constant 0 : index
      %c0_281 = arith.constant 0 : index
      %403 = vector.load %arg33[%c0_280, %c0_281] : memref<1x128xf32, #tpu.memory_space<vmem>>, vector<1x128xf32>
      %404 = vector.broadcast %403 : vector<1x128xf32> to vector<8x128xf32>
      %405 = arith.addf %402, %404 : vector<8x128xf32>
      %406 = arith.index_cast %2 : i32 to index
      %c0_282 = arith.constant 0 : index
      %c0_283 = arith.constant 0 : index
      %407 = vector.load %arg34[%406, %c0_282, %c0_283] : memref<8x8x128xf32, #tpu.memory_space<vmem>>, vector<1x8x128xf32>
      %408 = vector.shape_cast %407 : vector<1x8x128xf32> to vector<8x128xf32>
      %409 = vector.shape_cast %405 : vector<8x128xf32> to vector<1x8x128xf32>
      tpu.vector_store %arg34[%406, %c0_282, %c0_283], %409 {strides = array<i32>} : memref<8x8x128xf32, #tpu.memory_space<vmem>>, vector<1x8x128xf32>,
    }
    %c8_i32_0 = arith.constant 8 : i32
    return
  }
  func.func @transform_0(%arg0: i32) -> (i32, i32, i32) {
    %c0_i32 = arith.constant 0 : i32
    %c0_i32_0 = arith.constant 0 : i32
    %c0_i32_1 = arith.constant 0 : i32
    return %arg0, %c0_i32, %c0_i32_0 : i32, i32, i32
  }
  func.func @transform_1(%arg0: i32) -> (i32, i32) {
    %c0_i32 = arith.constant 0 : i32
    %c0_i32_0 = arith.constant 0 : i32
    %c0_i32_1 = arith.constant 0 : i32
    return %c0_i32, %c0_i32_0 : i32, i32
  }
  func.func @transform_2(%arg0: i32) -> (i32, i32) {
    %c0_i32 = arith.constant 0 : i32
    %c0_i32_0 = arith.constant 0 : i32
    %c0_i32_1 = arith.constant 0 : i32
    return %c0_i32, %c0_i32_0 : i32, i32
  }
  func.func @transform_3(%arg0: i32) -> (i32, i32) {
    %c0_i32 = arith.constant 0 : i32
    %c0_i32_0 = arith.constant 0 : i32
    %c0_i32_1 = arith.constant 0 : i32
    return %c0_i32, %c0_i32_0 : i32, i32
  }
  func.func @transform_4(%arg0: i32) -> (i32, i32) {
    %c0_i32 = arith.constant 0 : i32
    %c0_i32_0 = arith.constant 0 : i32
    %c0_i32_1 = arith.constant 0 : i32
    return %c0_i32, %c0_i32_0 : i32, i32
  }
  func.func @transform_5(%arg0: i32) -> (i32, i32) {
    %c0_i32 = arith.constant 0 : i32
    %c0_i32_0 = arith.constant 0 : i32
    %c0_i32_1 = arith.constant 0 : i32
    return %c0_i32, %c0_i32_0 : i32, i32
  }
  func.func @transform_6(%arg0: i32) -> (i32, i32) {
    %c0_i32 = arith.constant 0 : i32
    %c0_i32_0 = arith.constant 0 : i32
    %c0_i32_1 = arith.constant 0 : i32
    return %c0_i32, %c0_i32_0 : i32, i32
  }
  func.func @transform_7(%arg0: i32) -> (i32, i32) {
    %c0_i32 = arith.constant 0 : i32
    %c0_i32_0 = arith.constant 0 : i32
    %c0_i32_1 = arith.constant 0 : i32
    return %c0_i32, %c0_i32_0 : i32, i32
  }
  func.func @transform_8(%arg0: i32) -> (i32, i32) {
    %c0_i32 = arith.constant 0 : i32
    %c0_i32_0 = arith.constant 0 : i32
    %c0_i32_1 = arith.constant 0 : i32
    return %c0_i32, %c0_i32_0 : i32, i32
  }
  func.func @transform_9(%arg0: i32) -> (i32, i32) {
    %c0_i32 = arith.constant 0 : i32
    %c0_i32_0 = arith.constant 0 : i32
    %c0_i32_1 = arith.constant 0 : i32
    return %c0_i32, %c0_i32_0 : i32, i32
  }
  func.func @transform_10(%arg0: i32) -> (i32, i32) {
    %c0_i32 = arith.constant 0 : i32
    %c0_i32_0 = arith.constant 0 : i32
    %c0_i32_1 = arith.constant 0 : i32
    return %c0_i32, %c0_i32_0 : i32, i32
  }
  func.func @transform_11(%arg0: i32) -> (i32, i32) {
    %c0_i32 = arith.constant 0 : i32
    %c0_i32_0 = arith.constant 0 : i32
    %c0_i32_1 = arith.constant 0 : i32
    return %c0_i32, %c0_i32_0 : i32, i32
  }
  func.func @transform_12(%arg0: i32) -> (i32, i32) {
    %c0_i32 = arith.constant 0 : i32
    %c0_i32_0 = arith.constant 0 : i32
    %c0_i32_1 = arith.constant 0 : i32
    return %c0_i32, %c0_i32_0 : i32, i32
  }
  func.func @transform_13(%arg0: i32) -> (i32, i32) {
    %c0_i32 = arith.constant 0 : i32
    %c0_i32_0 = arith.constant 0 : i32
    %c0_i32_1 = arith.constant 0 : i32
    return %c0_i32, %c0_i32_0 : i32, i32
  }
  func.func @transform_14(%arg0: i32) -> (i32, i32) {
    %c0_i32 = arith.constant 0 : i32
    %c0_i32_0 = arith.constant 0 : i32
    %c0_i32_1 = arith.constant 0 : i32
    return %c0_i32, %c0_i32_0 : i32, i32
  }
  func.func @transform_15(%arg0: i32) -> (i32, i32, i32) {
    %c0_i32 = arith.constant 0 : i32
    %c0_i32_0 = arith.constant 0 : i32
    %c0_i32_1 = arith.constant 0 : i32
    %c0_i32_2 = arith.constant 0 : i32
    return %c0_i32, %c0_i32_0, %c0_i32_1 : i32, i32, i32
  }
  func.func @transform_16(%arg0: i32) -> (i32, i32) {
    %c0_i32 = arith.constant 0 : i32
    %c0_i32_0 = arith.constant 0 : i32
    %c0_i32_1 = arith.constant 0 : i32
    return %c0_i32, %c0_i32_0 : i32, i32
  }
  func.func @transform_17(%arg0: i32) -> (i32, i32) {
    %c0_i32 = arith.constant 0 : i32
    %c0_i32_0 = arith.constant 0 : i32
    %c0_i32_1 = arith.constant 0 : i32
    return %c0_i32, %c0_i32_0 : i32, i32
  }
  func.func @transform_18(%arg0: i32) -> (i32, i32) {
    %c0_i32 = arith.constant 0 : i32
    %c0_i32_0 = arith.constant 0 : i32
    %c0_i32_1 = arith.constant 0 : i32
    return %c0_i32, %c0_i32_0 : i32, i32
  }
  func.func @transform_19(%arg0: i32) -> (i32, i32) {
    %c0_i32 = arith.constant 0 : i32
    %c0_i32_0 = arith.constant 0 : i32
    %c0_i32_1 = arith.constant 0 : i32
    return %c0_i32, %c0_i32_0 : i32, i32
  }
  func.func @transform_20(%arg0: i32) -> (i32, i32) {
    %c0_i32 = arith.constant 0 : i32
    %c0_i32_0 = arith.constant 0 : i32
    %c0_i32_1 = arith.constant 0 : i32
    return %c0_i32, %c0_i32_0 : i32, i32
  }
  func.func @transform_21(%arg0: i32) -> (i32, i32) {
    %c0_i32 = arith.constant 0 : i32
    %c0_i32_0 = arith.constant 0 : i32
    %c0_i32_1 = arith.constant 0 : i32
    return %c0_i32, %c0_i32_0 : i32, i32
  }
  func.func @transform_22(%arg0: i32) -> (i32, i32) {
    %c0_i32 = arith.constant 0 : i32
    %c0_i32_0 = arith.constant 0 : i32
    %c0_i32_1 = arith.constant 0 : i32
    return %c0_i32, %c0_i32_0 : i32, i32
  }
  func.func @transform_23(%arg0: i32) -> (i32, i32) {
    %c0_i32 = arith.constant 0 : i32
    %c0_i32_0 = arith.constant 0 : i32
    %c0_i32_1 = arith.constant 0 : i32
    return %c0_i32, %c0_i32_0 : i32, i32
  }
  func.func @transform_24(%arg0: i32) -> (i32, i32) {
    %c0_i32 = arith.constant 0 : i32
    %c0_i32_0 = arith.constant 0 : i32
    %c0_i32_1 = arith.constant 0 : i32
    return %c0_i32, %c0_i32_0 : i32, i32
  }
  func.func @transform_25(%arg0: i32) -> (i32, i32) {
    %c0_i32 = arith.constant 0 : i32
    %c0_i32_0 = arith.constant 0 : i32
    %c0_i32_1 = arith.constant 0 : i32
    return %c0_i32, %c0_i32_0 : i32, i32
  }
  func.func @transform_26(%arg0: i32) -> (i32, i32) {
    %c0_i32 = arith.constant 0 : i32
    %c0_i32_0 = arith.constant 0 : i32
    %c0_i32_1 = arith.constant 0 : i32
    return %c0_i32, %c0_i32_0 : i32, i32
  }
  func.func @transform_27(%arg0: i32) -> (i32, i32) {
    %c0_i32 = arith.constant 0 : i32
    %c0_i32_0 = arith.constant 0 : i32
    %c0_i32_1 = arith.constant 0 : i32
    return %c0_i32, %c0_i32_0 : i32, i32
  }
  func.func @transform_28(%arg0: i32) -> (i32, i32) {
    %c0_i32 = arith.constant 0 : i32
    %c0_i32_0 = arith.constant 0 : i32
    %c0_i32_1 = arith.constant 0 : i32
    return %c0_i32, %c0_i32_0 : i32, i32
  }
  func.func @transform_29(%arg0: i32) -> (i32, i32, i32) {
    %c0_i32 = arith.constant 0 : i32
    %c0_i32_0 = arith.constant 0 : i32
    %c0_i32_1 = arith.constant 0 : i32
    %c0_i32_2 = arith.constant 0 : i32
    return %c0_i32, %c0_i32_0, %c0_i32_1 : i32, i32, i32
  }
  func.func @transform_30(%arg0: i32) -> (i32, i32) {
    %c0_i32 = arith.constant 0 : i32
    %c0_i32_0 = arith.constant 0 : i32
    %c0_i32_1 = arith.constant 0 : i32
    return %c0_i32, %c0_i32_0 : i32, i32
  }
  func.func @transform_31(%arg0: i32) -> (i32, i32) {
    %c0_i32 = arith.constant 0 : i32
    %c0_i32_0 = arith.constant 0 : i32
    %c0_i32_1 = arith.constant 0 : i32
    return %c0_i32, %c0_i32_0 : i32, i32
  }
  func.func @transform_32(%arg0: i32) -> (i32, i32) {
    %c0_i32 = arith.constant 0 : i32
    %c0_i32_0 = arith.constant 0 : i32
    %c0_i32_1 = arith.constant 0 : i32
    return %c0_i32, %c0_i32_0 : i32, i32
  }
  func.func @transform_33(%arg0: i32) -> (i32, i32, i32) {
    %c0_i32 = arith.constant 0 : i32
    %c0_i32_0 = arith.constant 0 : i32
    %c0_i32_1 = arith.constant 0 : i32
    return %arg0, %c0_i32, %c0_i32_0 : i32, i32, i32
  }
}

</mosaic_0001>

<bundles_post_ra>
// kernel: tpu_custom_call.1
= control target key start
LH: loop header
LB: loop body
LE: loop exit
PB: predicated region body
PF: predicated region fallthrough
CT: control target
= control target key end

     0   :  { %s5477_s6 = smov 1   ;;  %s5478_s10 = smov 2   ;;  %s6239_s0 = inlined_call_operand.smem [shape: u32[34], index: -1, kind: input, shape index: {}] }
   0x1   :  { %s5540_s5 = sld [smem:[%s6239_s0]]   ;;  %s5479_s14 = smov 3  }
   0x2   :  { %s5545_s9 = sld [smem:[%s6239_s0 + %s5477_s6]]   ;;  %s5480_s18 = smov 4  }
   0x3   :  { %s5550_s13 = sld [smem:[%s6239_s0 + %s5478_s10]]   ;;  %s5481_s22 = smov 5  }
   0x4   :  { %s5555_s17 = sld [smem:[%s6239_s0 + %s5479_s14]]   ;;  %s5482_s26 = smov 6  }
   0x5   :  { %s5560_s21 = sld [smem:[%s6239_s0 + %s5480_s18]]   ;;  %s5483_s30 = smov 7  }
   0x6   :  { %s5565_s25 = sld [smem:[%s6239_s0 + %s5481_s22]]   ;;  %s5484_s4 = smov 8  }
   0x7   :  { %6270 = sst [smem:[#allocation14_spill]] %s5540_s5  ;;  %s5485_s10 = smov 9  }
   0x8   :  { %s5570_s29 = sld [smem:[%s6239_s0 + %s5482_s26]]   ;;  %s5486_s15 = smov 10  }
   0x9   :  { %s5575_s3 = sld [smem:[%s6239_s0 + %s5483_s30]]   ;;  %s5487_s20 = smov 11  }
   0xa   :  { %s5580_s8 = sld [smem:[%s6239_s0 + %s5484_s4]]   ;;  %s5488_s26 = smov 12  }
   0xb   :  { %s5585_s14 = sld [smem:[%s6239_s0 + %s5485_s10]]   ;;  %s5489_s1 = smov 13  }
   0xc   :  { %s5590_s19 = sld [smem:[%s6239_s0 + %s5486_s15]]   ;;  %s5490_s7 = smov 14  }
   0xd   :  { %s5595_s24 = sld [smem:[%s6239_s0 + %s5487_s20]]   ;;  %s5491_s15 = smov 15  }
   0xe   :  { %s5600_s30 = sld [smem:[%s6239_s0 + %s5488_s26]]   ;;  %s5492_s22 = smov 16  }
   0xf   :  { %6271 = sst [smem:[#allocation15_spill]] %s5575_s3  ;;  %s5493_s28 = smov 17  }
  0x10   :  { %s5605_s6 = sld [smem:[%s6239_s0 + %s5489_s1]]  }
  0x11   :  { %s5610_s12 = sld [smem:[%s6239_s0 + %s5490_s7]]   ;;  %s5494_s7 = smov 18  }
  0x12   :  { %s5615_s20 = sld [smem:[%s6239_s0 + %s5491_s15]]   ;;  %s5495_s15 = smov 19  }
  0x13   :  { %s5620_s27 = sld [smem:[%s6239_s0 + %s5492_s22]]   ;;  %s5496_s22 = smov 20  }
  0x14   :  { %s5625_s4 = sld [smem:[%s6239_s0 + %s5493_s28]]   ;;  %s5497_s28 = smov 21  }
  0x16   :  { %6272 = sst [smem:[#allocation16_spill]] %s5605_s6 }
  0x17   :  { %6273 = sst [smem:[#allocation17_spill]] %s5610_s12 }
  0x18   :  { %6274 = sst [smem:[#allocation18_spill]] %s5615_s20 }
  0x19   :  { %6275 = sst [smem:[#allocation19_spill]] %s5620_s27 }
  0x1a   :  { %6276 = sst [smem:[#allocation20_spill]] %s5625_s4 }
  0x1b   :  { %s5630_s12 = sld [smem:[%s6239_s0 + %s5494_s7]]   ;;  %s5498_s7 = smov 22  }
  0x1c   :  { %s5635_s20 = sld [smem:[%s6239_s0 + %s5495_s15]]   ;;  %s5499_s15 = smov 23  }
  0x1d   :  { %s5640_s27 = sld [smem:[%s6239_s0 + %s5496_s22]]   ;;  %s5500_s22 = smov 24  }
  0x1e   :  { %s5645_s4 = sld [smem:[%s6239_s0 + %s5497_s28]]   ;;  %s5501_s28 = smov 25  }
  0x21   :  { %6277 = sst [smem:[#allocation21_spill]] %s5630_s12 }
  0x22   :  { %6278 = sst [smem:[#allocation22_spill]] %s5635_s20 }
  0x23   :  { %6279 = sst [smem:[#allocation23_spill]] %s5640_s27 }
  0x24   :  { %6280 = sst [smem:[#allocation24_spill]] %s5645_s4 }
  0x25   :  { %s5650_s12 = sld [smem:[%s6239_s0 + %s5498_s7]]   ;;  %s5502_s7 = smov 26  }
  0x26   :  { %s5655_s20 = sld [smem:[%s6239_s0 + %s5499_s15]]   ;;  %s5503_s15 = smov 27  }
  0x27   :  { %s5660_s27 = sld [smem:[%s6239_s0 + %s5500_s22]]   ;;  %s5504_s22 = smov 28  }
  0x28   :  { %s5665_s4 = sld [smem:[%s6239_s0 + %s5501_s28]]   ;;  %s5505_s28 = smov 29  }
  0x2b   :  { %6281 = sst [smem:[#allocation25_spill]] %s5650_s12 }
  0x2c   :  { %6282 = sst [smem:[#allocation26_spill]] %s5655_s20 }
  0x2d   :  { %6283 = sst [smem:[#allocation27_spill]] %s5660_s27 }
  0x2e   :  { %6284 = sst [smem:[#allocation28_spill]] %s5665_s4 }
  0x2f   :  { %s5670_s12 = sld [smem:[%s6239_s0 + %s5502_s7]]   ;;  %s5506_s7 = smov 30  }
  0x30   :  { %s5675_s20 = sld [smem:[%s6239_s0 + %s5503_s15]]   ;;  %s5507_s15 = smov 31  }
  0x31   :  { %s5680_s27 = sld [smem:[%s6239_s0 + %s5504_s22]]   ;;  %s5508_s22 = smov 32  }
  0x32   :  { %s5685_s4 = sld [smem:[%s6239_s0 + %s5505_s28]]   ;;  %s5509_s28 = smov 33  }
  0x35   :  { %6285 = sst [smem:[#allocation29_spill]] %s5670_s12 }
  0x36   :  { %6286 = sst [smem:[#allocation30_spill]] %s5675_s20 }
  0x37   :  { %6287 = sst [smem:[#allocation31_spill]] %s5680_s27 }
  0x38   :  { %6288 = sst [smem:[#allocation32_spill]] %s5685_s4 }
  0x39   :  { %s5690_s12 = sld [smem:[%s6239_s0 + %s5506_s7]]  }
  0x3a   :  { %s5695_s20 = sld [smem:[%s6239_s0 + %s5507_s15]]  }
  0x3b   :  { %s5700_s27 = sld [smem:[%s6239_s0 + %s5508_s22]]  }
  0x3c   :  { %s5705_s4 = sld [smem:[%s6239_s0 + %s5509_s28]]  }
  0x3d   :  { %72 = vsyncpa [#allocation12], 0 }
  0x3e   :  { %74 = vsyncpa [#allocation12 + $0x1], 0  ;;  %s5707_s7 = smov 0   ;;  %s5709_s10 = smov 0  }
  0x3f   :  { %s5711_s11 = smov 0   ;;  %s5713_s15 = smov 0  }
  0x40 LB: > { %s6289_s6 = sld [smem:[#allocation16_spill]]  ;;  %6290 = sst [smem:[#allocation33_spill]] %s5467_s11  ;;  %s5459_s7 = sphi %s5707_s7, %s6331_s7   ;;  %s5471_s15 = sphi %s5713_s15, %s6328_s15   ;;  %s5467_s11 = sphi %s5711_s11, %s6330_s11   ;;  %s5463_s10 = sphi %s5709_s10, %s6332_s10  }
  0x41   : > { %s5728_s0 = sadd.s32 4294967295, %s5471_s15   ;;  %s4429_s16 = sadd.s32 4294967294, %s5471_s15  }
  0x42   : > { %s5732_s18 = sadd.s32 1, %s5471_s15   ;;  %s785_s22 = sadd.s32 1, %s5467_s11 }
  0x43   : > { %6291 = sst [smem:[#allocation34_spill]] %s5732_s18  ;;  %s782_s23 = ssub.s32 %s5471_s15, %s5732_s18 }
  0x44   : > { %p795_p0 = scmp.ne.s32.totalorder %s5467_s11, %s5463_s10  ;;  %p783_p1 = scmp.eq.s32.totalorder %s782_s23, 0 }
  0x45   : > { %p796_p2 = scmp.eq.s32.totalorder %s5728_s0, 1  ;;  %p801_p3 = scmp.ne.s32.totalorder %s5463_s10, %s5459_s7 }
  0x46   : > { %p802_p4 = scmp.eq.s32.totalorder %s4429_s16, 1  ;;  %p4432_p7 = scmp.ge.s32.totalorder %s5471_s15, 1 }
  0x47   : > { %s5743_s26 = scalar_select %p783_p1, %s5467_s11, %s785_s22  }
  0x48   : > { %p5745_p5 = por %p796_p2, %p795_p0  ;;  %p5749_p6 = por %p802_p4, %p801_p3 }
  0x49   : > { %6292 = sst [smem:[#allocation35_spill]] %s5743_s26  ;;  %p926_p8 = scmp.lt.s32.totalorder %s5471_s15, 3 }
  0x4a   : > { %s6294_s1 = scalar_select %p5749_p6, 1, 0 }
  0x4b   : > { %p927_p9 = pnand %p4432_p7, %p926_p8 }
  0x4c   : > { %6295 = sst [smem:[#allocation36_spill]] %s6294_s1  ;;  %s6296_s5 = sld [smem:[#allocation14_spill]] (!%p927_p9) }
  0x4d   : > { %930 = sbr.rel (%p927_p9) target bundleno = 7243 (0x1c4b), region = 152  ;;  %s6249_s2 = sand.u32 (!%p927_p9), 1, %s5463_s10  }
  0x4e   : > { %s4434_s16 = sshll.u32 (!%p927_p9), %s5728_s0, 3  ;;  %s5759_s22 = sshll.u32 (!%p927_p9), %s6249_s2, 6 }
  0x4f   : > { %p1012_p10 = scmp.lt.s32.totalorder (!%p927_p9), %s4434_s16, 15  ;;  %s5765_s18 = smov (!%p927_p9), 0  }
  0x54   : > { %s6334_s16 = smov (!%p1012_p10, %s4434_s16), 15 }
  0x55   : > { %s4551_s23 = sshll.u32 %s6334_s16, 5 }
  0x56   : > { %s5762_s26 = scalar_lea.vmem %s6296_s5, %s4551_s23 }
  0x57 LB: >> { %s6297_s3 = sld [smem:[#allocation15_spill]]  ;;  %v5510_v0 = vmov 0   ;;  %s4437_s2 = sshll.u32 %s5475_s18, 5  ;;  %v4438_v10 = vld [vmem:[%s5545_s9 + $0x1] ss:$0 sm:$0xff]  ;;  %vm1071_vm0 = vcmask 261120   ;;  %s5475_s18 = sphi %s5765_s18, %s1024_s18  }
  0x58   : >> { %5292 = vset.pattern.permute.xlu1 %v5510_v0  ;;  %5291 = vset.pattern.permute.xlu0 %v5510_v0  ;;  %s1026_s1 = scalar_lea.vmem %s5762_s26, %s4437_s2  ;;  %v4439_v11 = vld [vmem:[%s5550_s13] ss:$0 sm:$0xff]  ;;  %vm1120_vm1 = vcmask 260096   ;;  %v4441_v43 = vld [vmem:[%s5545_s9 + $0x2] ss:$0 sm:$0xff]  ;;  %vm1319_vm2 = vcmask 785408  }
  0x59   : >> { %v1029_v1 = vld [vmem:[%s1026_s1 + $0x10] sm:$0xff]  ;;  %v1027_v2 = vld [vmem:[%s1026_s1] sm:$0xff]  ;;  %v1030_v3 = vld [vmem:[%s1026_s1 + $0x18] sm:$0xff]  ;;  %vm1332_vm3 = vcmask 64512   ;;  %s5512_s2 = smov 88   ;;  %s5513_s16 = smov 120  }
  0x5a   : >> { %1044 = vperm.xlu1 %5292, %v1029_v1   ;;  %1034 = vperm.xlu0 %5291, %v1027_v2   ;;  %v1028_v4 = vld [vmem:[%s1026_s1 + $0x8] sm:$0xff]  ;;  %v1083_v5 = vld [vmem:[%s1026_s1 + $0x18] sm:$0x7f]  ;;  %v4440_v26 = vld [vmem:[%s5545_s9] ss:$0 sm:$0xff]  ;;  %s6251_s23 = smov 80  }
  0x5b   : >> { %v1127_v6 = vld [vmem:[%s1026_s1 + $0x9] sm:$0xff]  ;;  %v1126_v7 = vld [vmem:[%s1026_s1 + $0x1] sm:$0xff]  ;;  %v1129_v8 = vld [vmem:[%s1026_s1 + $0x19] sm:$0x7f]  ;;  %vm1418_vm5 = vcmask 130048   ;;  %s5517_s11 = smov 56  }
  0x5c   : >> { %v1128_v9 = vld [vmem:[%s1026_s1 + $0x11] sm:$0xff]  ;;  %s6253_s1 = smov 96   ;;  %vm5826_vm4 = vmpackc.low %vm1332_vm3, %vm1332_vm3  ;;  %vm1746_vm6 = vcmask 130112   ;;  %vm1965_vm7 = vcmask 195712   ;;  %vm2184_vm8 = vcmask 261312   ;;  %vm2626_vm9 = vcmask 523264  }
  0x5d   : >> { %vm2721_vm10 = vcmask 522240   ;;  %vm5526_vm11 = vmmov 0   ;;  %vm3299_vm12 = vcmask 261248   ;;  %vm3476_vm13 = vcmask 392448  }
  0x5e   : >> { %1049 = vperm.xlu1 %5292, %v1030_v3   ;;  %1039 = vperm.xlu0 %5291, %v1028_v4   ;;  %vm3653_vm14 = vcmask 523648  }
  0x62   : >> { %1092 = vperm.xlu1 %5292, %v1028_v4   ;;  %1087 = vperm.xlu0 %5291, %v1027_v2  }
  0x66   : >> { %1102 = vperm.xlu1 %5292, %v1083_v5   ;;  %1097 = vperm.xlu0 %5291, %v1029_v1  }
  0x6a   : >> { %1138 = vperm.xlu1 %5292, %v1127_v6   ;;  %1133 = vperm.xlu0 %5291, %v1126_v7  }
  0x6e   : >> { %1148 = vperm.xlu1 %5292, %v1129_v8   ;;  %1143 = vperm.xlu0 %5291, %v1128_v9  }
  0xd9   : >> { %v1045_v12 = vpop.permute.xlu1 %1044  ;;  %v1035_v13 = vpop.permute.xlu0 %1034 }
  0xda   : >> { %v1058_v14 = vmul.f32 %v4438_v10, %v1045_v12  ;;  %v1056_v15 = vmul.f32 %v4438_v10, %v1035_v13 }
  0xdc   : >> { %v1069_v16 = vadd.f32 %v4439_v11, %v1058_v14  ;;  %v1067_v17 = vadd.f32 %v4439_v11, %v1056_v15 }
  0xdd   : >> { %v1050_v18 = vpop.permute.xlu1 %1049  ;;  %v1040_v19 = vpop.permute.xlu0 %1039 }
  0xde   : >> { %1074 = vst.msk [vmem:[#allocation2 + $0x10] sm:$0xff] %vm1071_vm0, %v1069_v16  ;;  %1072 = vst.msk [vmem:[#allocation2] sm:$0xff] %vm1071_vm0, %v1067_v17  ;;  %v1059_v20 = vmul.f32 %v4438_v10, %v1050_v18  ;;  %v1057_v21 = vmul.f32 %v4438_v10, %v1040_v19  ;;  %v1227_v18 = vld [vmem:[%s5565_s25] sm:$0xff]  ;;  %v1228_v19 = vld [vmem:[%s5565_s25 + $0x8] sm:$0xff] }
  0xe0   : >> { %v1070_v22 = vadd.f32 %v4439_v11, %v1059_v20  ;;  %v1068_v23 = vadd.f32 %v4439_v11, %v1057_v21  ;;  %v1229_v20 = vld [vmem:[%s5565_s25 + $0x10] sm:$0xff]  ;;  %v5000_v21 = vpack.c.bf16 %v1228_v19, %v1227_v18 }
  0xe1   : >> { %v1093_v24 = vpop.permute.xlu1 %1092  ;;  %v1088_v25 = vpop.permute.xlu0 %1087 }
  0xe2   : >> { %1075 = vst.msk [vmem:[#allocation2 + $0x18] sm:$0xff] %vm1071_vm0, %v1070_v22  ;;  %1073 = vst.msk [vmem:[#allocation2 + $0x8] sm:$0xff] %vm1071_vm0, %v1068_v23  ;;  %v1110_v29 = vmul.f32 %v4440_v26, %v1093_v24  ;;  %v1109_v30 = vmul.f32 %v4440_v26, %v1088_v25  ;;  %v1230_v22 = vld [vmem:[%s5565_s25 + $0x18] sm:$0xff]  ;;  %5001 = vmatprep.subr.bf16.mxu0 %v5000_v21 }
  0xe3   : >> { %v5004_v23 = vpack.c.bf16 %v1230_v22, %v1229_v20  ;;  %5003 = vmatpush3.bf16.msra.mxu0 %v5000_v21 }
  0xe5   : >> { %v1103_v27 = vpop.permute.xlu1 %1102  ;;  %v1098_v28 = vpop.permute.xlu0 %1097  ;;  %5005 = vmatprep.subr.bf16.mxu0 %v5004_v23 }
  0xe6   : >> { %v1112_v31 = vmul.f32 %v4440_v26, %v1103_v27  ;;  %v1111_v35 = vmul.f32 %v4440_v26, %v1098_v28 }
  0xe7   : >> { %5007 = vmatpush3.bf16.msra.mxu0 %v5004_v23 }
  0xe9   : >> { %v1077_v32 = vld [vmem:[#allocation2 + $0x9] sm:$0xff]  ;;  %v1076_v33 = vld [vmem:[#allocation2 + $0x1] sm:$0xff]  ;;  %v1079_v34 = vld [vmem:[#allocation2 + $0x19] sm:$0x7f]  ;;  %v1139_v40 = vpop.permute.xlu1 %1138  ;;  %v1134_v41 = vpop.permute.xlu0 %1133 }
  0xea   : >> { %v1114_v36 = vadd.f32 %v1110_v29, %v1077_v32  ;;  %v1113_v37 = vadd.f32 %v1109_v30, %v1076_v33  ;;  %v1116_v38 = vadd.f32 %v1112_v31, %v1079_v34  ;;  %v1078_v39 = vld [vmem:[#allocation2 + $0x11] sm:$0xff]  ;;  %v1156_v46 = vmul.f32 %v4441_v43, %v1139_v40  ;;  %v4442_v31 = vld [vmem:[%s5555_s17] ss:$0 sm:$0xff] }
  0xeb   : >> { %v1115_v42 = vadd.f32 %v1111_v35, %v1078_v39  ;;  %v1155_v47 = vmul.f32 %v4441_v43, %v1134_v41  ;;  %v4443_v33 = vld [vmem:[%s5560_s21] ss:$0 sm:$0xff] }
  0xec   : >> { %1118 = vst.msk [vmem:[#allocation2 + $0x9] sm:$0xff] %vm1071_vm0, %v1114_v36  ;;  %1117 = vst.msk [vmem:[#allocation2 + $0x1] sm:$0xff] %vm1071_vm0, %v1113_v37  ;;  %v4444_v40 = vld [vmem:[%s5570_s29] ss:$0 sm:$0xff] }
  0xed   : >> { %1121 = vst.msk [vmem:[#allocation2 + $0x19] sm:$0x7f] %vm1120_vm1, %v1116_v38  ;;  %v1149_v44 = vpop.permute.xlu1 %1148  ;;  %v1144_v45 = vpop.permute.xlu0 %1143 }
  0xee   : >> { %1119 = vst.msk [vmem:[#allocation2 + $0x11] sm:$0xff] %vm1071_vm0, %v1115_v42  ;;  %v1158_v50 = vmul.f32 %v4441_v43, %v1149_v44  ;;  %v1157_v51 = vmul.f32 %v4441_v43, %v1144_v45 }
  0xf3   : >> { %v1123_v48 = vld [vmem:[#allocation2 + $0x8] sm:$0xff]  ;;  %v1122_v49 = vld [vmem:[#allocation2] sm:$0xff] }
  0xf4   : >> { %v1160_v52 = vadd.f32 %v1156_v46, %v1123_v48  ;;  %v1159_v53 = vadd.f32 %v1155_v47, %v1122_v49 }
  0xf5   : >> { %v1125_v54 = vld [vmem:[#allocation2 + $0x18] sm:$0x7f]  ;;  %v1124_v55 = vld [vmem:[#allocation2 + $0x10] sm:$0xff] }
  0xf6   : >> { %v1162_v56 = vadd.f32 %v1158_v50, %v1125_v54  ;;  %v1161_v57 = vadd.f32 %v1157_v51, %v1124_v55  ;;  %1164 = vst.msk [vmem:[#allocation2 + $0x8] sm:$0xff] %vm1071_vm0, %v1160_v52  ;;  %1163 = vst.msk [vmem:[#allocation2] sm:$0xff] %vm1071_vm0, %v1159_v53 }
  0xf8   : >> { %1166 = vst.msk [vmem:[#allocation2 + $0x18] sm:$0x7f] %vm1120_vm1, %v1162_v56 }
  0xf9   : >> { %1165 = vst.msk [vmem:[#allocation2 + $0x10] sm:$0xff] %vm1071_vm0, %v1161_v57 }
  0xfd   : >> { %v1167_v58 = vld [vmem:[#allocation2] ss:$2 sm:$0xff]  ;;  %v1173_v59 = vld [vmem:[#allocation2 + $0x1] ss:$2 sm:$0xff] }
  0xfe   : >> { %v1170_v60 = vmax.f32 %v1167_v58, 0.0  ;;  %v1176_v61 = vmax.f32 %v1173_v59, 0.0 }
 0x100   : >> { %v1169_v62 = vld [vmem:[#allocation2 + $0x10] ss:$2 sm:$0xff]  ;;  %v1175_v63 = vld [vmem:[#allocation2 + $0x11] ss:$2 sm:$0xff]  ;;  %v1178_v2 = vadd.f32 %v1176_v61, %v1170_v60 }
 0x101   : >> { %v1171_v0 = vmax.f32 %v1169_v62, 0.0  ;;  %v1177_v1 = vmax.f32 %v1175_v63, 0.0 }
 0x102   : >> { %v5788_v4 = vmul.f32 0.5, %v1178_v2 }
 0x103   : >> { %v1179_v3 = vadd.f32 %v1177_v1, %v1171_v0 }
 0x104   : >> { %v1184_v6 = vsel %vm1071_vm0, %v5788_v4, 0.0 }
 0x105   : >> { %v5790_v5 = vmul.f32 0.5, %v1179_v3  ;;  %1185 = vadd.xlane.f32.xlu0 %v1184_v6 }
 0x107   : >> { %v1187_v7 = vsel %vm1071_vm0, %v5790_v5, 0.0 }
 0x108   : >> { %1188 = vadd.xlane.f32.xlu1 %v1187_v7 }
 0x192   : >> { %v1186_v8 = vpop.xlane.xlu0 %1185 }
 0x193   : >> { %v1191_v10 = vmul.f32 0.03125, %v1186_v8 }
 0x195   : >> { %v1189_v9 = vpop.xlane.xlu1 %1188  ;;  %v1193_v12 = vsub.f32 %v5788_v4, %v1191_v10 }
 0x196   : >> { %v1192_v11 = vmul.f32 0.03125, %v1189_v9 }
 0x197   : >> { %v1195_v14 = vmul.f32 %v1193_v12, %v1193_v12 }
 0x198   : >> { %v1194_v13 = vsub.f32 %v5790_v5, %v1192_v11 }
 0x199   : >> { %v1197_v15 = vsel %vm1071_vm0, %v1195_v14, 0.0 }
 0x19a   : >> { %v1196_v16 = vmul.f32 %v1194_v13, %v1194_v13  ;;  %1198 = vadd.xlane.f32.xlu0 %v1197_v15 }
 0x19c   : >> { %v1200_v17 = vsel %vm1071_vm0, %v1196_v16, 0.0 }
 0x19e   : >> { %1201 = vadd.xlane.f32.xlu0 %v1200_v17 }
 0x227   : >> { %v1199_v24 = vpop.xlane.xlu0 %1198 }
 0x228   : >> { %v1203_v25 = vmul.f32 0.03125, %v1199_v24 }
 0x22a   : >> { %v1205_v26 = vadd.f32 1e-05, %v1203_v25 }
 0x22b   : >> { %v1202_v27 = vpop.xlane.xlu0 %1201 }
 0x22c   : >> { %5333 = vrsqrt.f32 %v1205_v26  ;;  %v1204_v28 = vmul.f32 0.03125, %v1202_v27 }
 0x22e   : >> { %v1206_v29 = vadd.f32 1e-05, %v1204_v28 }
 0x230   : >> { %5335 = vrsqrt.f32 %v1206_v29 }
 0x236   : >> { %v5334_v30 = vpop.eup %5333 }
 0x237   : >> { %v1209_v32 = vmul.f32 %v5334_v30, %v1193_v12 }
 0x239   : >> { %v1217_v34 = vmul.f32 %v4442_v31, %v1209_v32 }
 0x23a   : >> { %v5336_v35 = vpop.eup %5335 }
 0x23b   : >> { %v1210_v36 = vmul.f32 %v5336_v35, %v1194_v13  ;;  %v1225_v37 = vadd.f32 %v4443_v33, %v1217_v34 }
 0x23d   : >> { %v1218_v38 = vmul.f32 %v4442_v31, %v1210_v36  ;;  %4710 = vmatprep.mubr.msk.f32.mxu0 %vm1071_vm0, %v1225_v37 }
 0x23f   : >> { %v1226_v39 = vadd.f32 %v4443_v33, %v1218_v38 }
 0x241   : >> { %4711 = vmatmul.mubr.msk.f32.vlgmr.msra.gmra.mrb[0].mxu0 %vm1071_vm0, %v1226_v39 }
 0x314   : >> { %v4712_v41 = vpop.f32.mrb[0].mxu0 }
 0x315   : >> { %v1316_v42 = vadd.f32 %v4712_v41, %v4444_v40  ;;  %v1310_v43 = vpop.f32.mrb[1].mxu0 }
 0x316   : >> { %v1311_v44 = vadd.f32 %v4444_v40, %v1310_v43 }
 0x317   : >> { %1321 = vst.msk [vmem:[#allocation4 + $0x8] sm:$0xff] %vm1319_vm2, %v1316_v42 }
 0x318   : >> { %1320 = vst.msk [vmem:[#allocation4] sm:$0xff] %vm1319_vm2, %v1311_v44 }
 0x31e   : >> { %v1323_v45 = vld [vmem:[#allocation4 + $0x8] sm:$0xff] }
 0x31f   : >> { %v1322_v46 = vld [vmem:[#allocation4] sm:$0xff]  ;;  %v5819_v49 = vmul.f32 0.35355338, %v1323_v45 }
 0x320   : >> { %v5809_v47 = vpack.i.bf16 %v1323_v45, %v1322_v46  ;;  %v5811_v48 = vmul.f32 0.35355338, %v1322_v46 }
 0x322   : >> { %5294 = vrot.lane.b32.xlu1 %v5809_v47, %s6253_s1  ;;  %4717 = vmatprep.mubr.msk.f32.mxu1 %vm1332_vm3, %v5811_v48  ;;  %s5523_s1 = smov 8  }
 0x326   : >> { %5304 = vrot.lane.b32.xlu1 %v5809_v47, %s5512_s2  ;;  %s6259_s2 = smov 64  }
 0x32a   : >> { %1536 = vrot.lane.b32.xlu1 %v5811_v48, %s5513_s16 }
 0x32e   : >> { %1538 = vrot.lane.b32.xlu1 %v5819_v49, %s5513_s16  ;;  %s6255_s16 = smov 112  }
 0x332   : >> { %5314 = vrot.lane.b32.xlu1 %v5809_v47, %s6251_s23  ;;  %s5518_s23 = smov 72  }
 0x394   : >> { %v5295_v50 = vpop.permute.xlu1 %5294 }
 0x395   : >> { %v5297_v51 = vunpack.i.h.bf16 %v5295_v50  ;;  %v5296_v52 = vunpack.i.l.bf16 %v5295_v50 }
 0x397   : >> { %v5008_v54 = vpack.c.bf16 %v5297_v51, %v5296_v52 }
 0x398   : >> { %v5305_v62 = vpop.permute.xlu1 %5304 }
 0x399   : >> { %5010 = vmatprep.subr.msk.bf16.mxu1 %vm5826_vm4, %v5008_v54  ;;  %v5307_v2 = vunpack.i.h.bf16 %v5305_v62  ;;  %v5306_v6 = vunpack.i.l.bf16 %v5305_v62 }
 0x39a   : >> { %5013 = vmatpush3.bf16.xpose.msk.msra.mxu1 %vm5826_vm4, %v5008_v54 }
 0x39b   : >> { %v5018_v10 = vpack.c.bf16 %v5307_v2, %v5306_v6 }
 0x39c   : >> { %v1537_v13 = vpop.permute.xlu1 %1536 }
 0x3a0   : >> { %v1539_v14 = vpop.permute.xlu1 %1538 }
 0x3a1   : >> { %4718 = vmatmul.mubr.msk.f32.vlgmr.msra.gmra.mrb[0].mxu1 %vm1332_vm3, %v5819_v49 }
 0x3a4   : >> { %v5315_v21 = vpop.permute.xlu1 %5314 }
 0x3a5   : >> { %v5317_v29 = vunpack.i.h.bf16 %v5315_v21  ;;  %v5316_v30 = vunpack.i.l.bf16 %v5315_v21 }
 0x3a7   : >> { %v5028_v34 = vpack.c.bf16 %v5317_v29, %v5316_v30 }
 0x474   : >> { %v4719_v55 = vpop.f32.mrb[0].mxu1 }
 0x475   : >> { %v1409_v56 = vpop.f32.mrb[1].mxu1  ;;  %v1422_v57 = vsel %vm1418_vm5, %v4719_v55, -inf }
 0x476   : >> { %1423 = vmax.xlane.f32.xlu0 %v1422_v57  ;;  %v1419_v58 = vsel %vm1418_vm5, %v1409_v56, -inf }
 0x47a   : >> { %1420 = vmax.xlane.f32.xlu0 %v1419_v58 }
 0x490   : >> { %5299 = vrot.lane.b32.xlu0 %v5809_v47, %s6259_s2  ;;  %s6305_s2 = sld [smem:[#allocation21_spill]] }
 0x503   : >> { %v1424_v59 = vpop.xlane.xlu0 %1423 }
 0x504   : >> { %v1426_v60 = vsub.f32 %v4719_v55, %v1424_v59 }
 0x506   : >> { %v1429_v0 = vmul.f32 1.442695, %v1426_v60 }
 0x507   : >> { %v1421_v61 = vpop.xlane.xlu0 %1420 }
 0x508   : >> { %v1425_v63 = vsub.f32 %v1409_v56, %v1421_v61 }
 0x50a   : >> { %v1427_v1 = vmul.f32 1.442695, %v1425_v63 }
 0x50b   : >> { %v5300_v3 = vpop.permute.xlu0 %5299 }
 0x50c   : >> { %5337 = vpow2.f32 %v1427_v1  ;;  %v5302_v7 = vunpack.i.h.bf16 %v5300_v3  ;;  %v5301_v8 = vunpack.i.l.bf16 %v5300_v3 }
 0x50d   : >> { %5339 = vpow2.f32 %v1429_v0 }
 0x50e   : >> { %v5014_v9 = vpack.c.bf16 %v5302_v7, %v5301_v8 }
 0x510   : >> { %5015 = vmatprep.subr.bf16.mxu1 %v5014_v9 }
 0x511   : >> { %5017 = vmatpush3.bf16.msra.mxu1 %v5014_v9 }
 0x512   : >> { %5020 = vmatprep.subr.msk.bf16.mxu1 %vm5826_vm4, %v5018_v10 }
 0x516   : >> { %v5842_v11 = vpop.eup %5337 }
 0x517   : >> { %v5844_v12 = vpop.eup %5339  ;;  %4724 = vmatprep.mubr.msk.f32.mxu1 %vm1418_vm5, %v5842_v11 }
 0x518   : >> { %4725 = vmatmul.mubr.msk.f32.vlgmr.msra.gmra.mrb[2].mxu1 %vm1418_vm5, %v5844_v12 }
 0x519   : >> { %4731 = vmatprep.mubr.msk.f32.mxu1 %vm1332_vm3, %v1537_v13 }
 0x51a   : >> { %5023 = vmatpush3.bf16.xpose.msk.msra.mxu1 %vm5826_vm4, %v5018_v10 }
 0x521   : >> { %4732 = vmatmul.mubr.msk.f32.vlgmr.msra.gmra.mrb[4].mxu1 %vm1332_vm3, %v1539_v14  ;;  %v1431_v14 = vsel %vm1418_vm5, %v5842_v11, 0.0 }
 0x5eb   : >> { %v5854_v15 = vpop.f32.mrb[2].mxu1 }
 0x5ec   : >> { %v5856_v16 = vpop.f32.mrb[3].mxu1 }
 0x5f4   : >> { %v4733_v17 = vpop.f32.mrb[4].mxu1 }
 0x5f5   : >> { %v1620_v18 = vpop.f32.mrb[5].mxu1  ;;  %v1632_v19 = vsel %vm1418_vm5, %v4733_v17, -inf }
 0x5f6   : >> { %1633 = vmax.xlane.f32.xlu0 %v1632_v19  ;;  %v1629_v20 = vsel %vm1418_vm5, %v1620_v18, -inf }
 0x5f7   : >> { %1630 = vmax.xlane.f32.xlu1 %v1629_v20 }
 0x608   : >> { %1755 = vrot.lane.b32.xlu1 %v5811_v48, %s6255_s16 }
 0x60c   : >> { %5309 = vrot.lane.b32.xlu0 %v5809_v47, %s5517_s11  ;;  %5324 = vrot.lane.b32.xlu1 %v5809_v47, %s5518_s23  ;;  %s5519_s11 = smov 104   ;;  %s6260_s23 = smov 48  }
 0x610   : >> { %1757 = vrot.lane.b32.xlu0 %v5819_v49, %s6255_s16  ;;  %s6301_s16 = sld [smem:[#allocation17_spill]] }
 0x683   : >> { %v1634_v22 = vpop.xlane.xlu0 %1633 }
 0x684   : >> { %v1636_v23 = vsub.f32 %v4733_v17, %v1634_v22  ;;  %v1631_v24 = vpop.xlane.xlu1 %1630 }
 0x685   : >> { %v1635_v25 = vsub.f32 %v1620_v18, %v1631_v24 }
 0x686   : >> { %v1639_v26 = vmul.f32 1.442695, %v1636_v23 }
 0x687   : >> { %v1637_v27 = vmul.f32 1.442695, %v1635_v25  ;;  %v5310_v28 = vpop.permute.xlu0 %5309 }
 0x688   : >> { %v5312_v31 = vunpack.i.h.bf16 %v5310_v28  ;;  %v5311_v32 = vunpack.i.l.bf16 %v5310_v28  ;;  %v1756_v37 = vpop.permute.xlu1 %1755 }
 0x689   : >> { %5341 = vpow2.f32 %v1637_v27 }
 0x68a   : >> { %5343 = vpow2.f32 %v1639_v26  ;;  %v5024_v33 = vpack.c.bf16 %v5312_v31, %v5311_v32 }
 0x68b   : >> { %v1758_v38 = vpop.permute.xlu0 %1757 }
 0x68c   : >> { %5025 = vmatprep.subr.bf16.mxu0 %v5024_v33  ;;  %v5325_v45 = vpop.permute.xlu1 %5324 }
 0x68d   : >> { %5027 = vmatpush3.bf16.msra.mxu0 %v5024_v33  ;;  %v5327_v57 = vunpack.i.h.bf16 %v5325_v45  ;;  %v5326_v58 = vunpack.i.l.bf16 %v5325_v45  ;;  %v1434_v33 = vsel %vm1418_vm5, %v5844_v12, 0.0 }
 0x68e   : >> { %5030 = vmatprep.subr.msk.bf16.mxu0 %vm5826_vm4, %v5028_v34 }
 0x68f   : >> { %v5038_v61 = vpack.c.bf16 %v5327_v57, %v5326_v58  ;;  %v2190_v57 = vld [vmem:[%s6297_s3 + $0x8] sm:$0xff] }
 0x693   : >> { %v5342_v35 = vpop.eup %5341 }
 0x694   : >> { %v5344_v36 = vpop.eup %5343  ;;  %4738 = vmatprep.mubr.msk.f32.mxu0 %vm1418_vm5, %v5342_v35  ;;  %v1641_v9 = vsel %vm1418_vm5, %v5342_v35, 0.0 }
 0x695   : >> { %4739 = vmatmul.mubr.msk.f32.vlgmr.msra.gmra.mrb[2].mxu0 %vm1418_vm5, %v5344_v36  ;;  %v1644_v53 = vsel %vm1418_vm5, %v5344_v36, 0.0 }
 0x696   : >> { %5033 = vmatpush3.bf16.xpose.msk.msra.mxu0 %vm5826_vm4, %v5028_v34  ;;  %4745 = vmatprep.mubr.msk.f32.mxu0 %vm1332_vm3, %v1756_v37 }
 0x69d   : >> { %4746 = vmatmul.mubr.msk.f32.vlgmr.msra.gmra.mrb[4].mxu0 %vm1332_vm3, %v1758_v38 }
 0x768   : >> { %v5874_v39 = vpop.f32.mrb[2].mxu0 }
 0x769   : >> { %v5876_v40 = vpop.f32.mrb[3].mxu0 }
 0x770   : >> { %v4747_v41 = vpop.f32.mrb[4].mxu0 }
 0x771   : >> { %v1839_v42 = vpop.f32.mrb[5].mxu0  ;;  %v1851_v43 = vsel %vm1418_vm5, %v4747_v41, -inf }
 0x772   : >> { %1852 = vmax.xlane.f32.xlu0 %v1851_v43  ;;  %v1848_v44 = vsel %vm1418_vm5, %v1839_v42, -inf }
 0x773   : >> { %1849 = vmax.xlane.f32.xlu1 %v1848_v44 }
 0x784   : >> { %1974 = vrot.lane.b32.xlu1 %v5811_v48, %s5519_s11 }
 0x788   : >> { %5319 = vrot.lane.b32.xlu0 %v5809_v47, %s6260_s23  ;;  %s6306_s23 = sld [smem:[#allocation23_spill]] }
 0x78c   : >> { %1976 = vrot.lane.b32.xlu0 %v5819_v49, %s5519_s11  ;;  %s5521_s11 = smov 40  }
 0x7ff   : >> { %v1853_v46 = vpop.xlane.xlu0 %1852 }
 0x800   : >> { %v1855_v50 = vsub.f32 %v4747_v41, %v1853_v46  ;;  %v1850_v51 = vpop.xlane.xlu1 %1849 }
 0x801   : >> { %v1854_v52 = vsub.f32 %v1839_v42, %v1850_v51 }
 0x802   : >> { %v1858_v54 = vmul.f32 1.442695, %v1855_v50 }
 0x803   : >> { %v1856_v55 = vmul.f32 1.442695, %v1854_v52  ;;  %v5320_v56 = vpop.permute.xlu0 %5319 }
 0x804   : >> { %v5322_v59 = vunpack.i.h.bf16 %v5320_v56  ;;  %v5321_v60 = vunpack.i.l.bf16 %v5320_v56  ;;  %v1975_v63 = vpop.permute.xlu1 %1974  ;;  %v2189_v56 = vld [vmem:[%s6297_s3] sm:$0xff] }
 0x805   : >> { %5345 = vpow2.f32 %v1856_v55  ;;  %v5048_v58 = vpack.c.bf16 %v2190_v57, %v2189_v56 }
 0x806   : >> { %5347 = vpow2.f32 %v1858_v54  ;;  %v5034_v48 = vpack.c.bf16 %v5322_v59, %v5321_v60  ;;  %v2191_v59 = vld [vmem:[%s6297_s3 + $0x10] sm:$0xff]  ;;  %v2192_v60 = vld [vmem:[%s6297_s3 + $0x18] sm:$0xff]  ;;  %s6309_s3 = smov 16  }
 0x807   : >> { %v1977_v0 = vpop.permute.xlu0 %1976 }
 0x808   : >> { %5035 = vmatprep.subr.bf16.mxu1 %v5034_v48 }
 0x809   : >> { %5037 = vmatpush3.bf16.msra.mxu1 %v5034_v48  ;;  %v5052_v48 = vpack.c.bf16 %v2192_v60, %v2191_v59 }
 0x80a   : >> { %5040 = vmatprep.subr.msk.bf16.mxu1 %vm5826_vm4, %v5038_v61 }
 0x80f   : >> { %v5346_v49 = vpop.eup %5345 }
 0x810   : >> { %v5348_v62 = vpop.eup %5347  ;;  %4752 = vmatprep.mubr.msk.f32.mxu1 %vm1418_vm5, %v5346_v49  ;;  %v1860_v10 = vsel %vm1418_vm5, %v5346_v49, 0.0 }
 0x811   : >> { %4753 = vmatmul.mubr.msk.f32.vlgmr.msra.gmra.mrb[6].mxu1 %vm1418_vm5, %v5348_v62  ;;  %v1863_v13 = vsel %vm1418_vm5, %v5348_v62, 0.0 }
 0x812   : >> { %5043 = vmatpush3.bf16.xpose.msk.msra.mxu1 %vm5826_vm4, %v5038_v61  ;;  %4759 = vmatprep.mubr.msk.f32.mxu1 %vm1332_vm3, %v1975_v63 }
 0x819   : >> { %4760 = vmatmul.mubr.msk.f32.vlgmr.msra.gmra.mrb[8].mxu1 %vm1332_vm3, %v1977_v0 }
 0x8e4   : >> { %v4754_v1 = vpop.f32.mrb[6].mxu1 }
 0x8e5   : >> { %v5892_v2 = vpop.f32.mrb[7].mxu1 }
 0x8ec   : >> { %v4761_v3 = vpop.f32.mrb[8].mxu1 }
 0x8ed   : >> { %v2058_v6 = vpop.f32.mrb[9].mxu1  ;;  %v2070_v7 = vsel %vm1418_vm5, %v4761_v3, -inf }
 0x8ee   : >> { %2071 = vmax.xlane.f32.xlu0 %v2070_v7  ;;  %v2067_v8 = vsel %vm1418_vm5, %v2058_v6, -inf  ;;  %v4471_v7 = vld [vmem:[%s5580_s8] ss:$0 sm:$0xff] }
 0x8ef   : >> { %2068 = vmax.xlane.f32.xlu1 %v2067_v8 }
 0x8f3   : >> { %1642 = vadd.xlane.f32.xlu1 %v1641_v9 }
 0x8f7   : >> { %1645 = vadd.xlane.f32.xlu1 %v1644_v53 }
 0x8fb   : >> { %1861 = vadd.xlane.f32.xlu1 %v1860_v10 }
 0x8ff   : >> { %1864 = vadd.xlane.f32.xlu1 %v1863_v13 }
 0x904   : >> { %5329 = vrot.lane.b32.xlu0 %v5809_v47, %s5521_s11  ;;  %s6257_s11 = smov 16  }
 0x923   : >> { %1432 = vadd.xlane.f32.xlu0 %v1431_v14 }
 0x97b   : >> { %v2072_v17 = vpop.xlane.xlu0 %2071 }
 0x97c   : >> { %v2074_v18 = vsub.f32 %v4761_v3, %v2072_v17  ;;  %v2069_v19 = vpop.xlane.xlu1 %2068 }
 0x97d   : >> { %v2073_v20 = vsub.f32 %v2058_v6, %v2069_v19 }
 0x97e   : >> { %v2077_v21 = vmul.f32 1.442695, %v2074_v18 }
 0x97f   : >> { %v2075_v22 = vmul.f32 1.442695, %v2073_v20  ;;  %v5330_v23 = vpop.permute.xlu0 %5329 }
 0x980   : >> { %v5332_v24 = vunpack.i.h.bf16 %v5330_v23  ;;  %v5331_v25 = vunpack.i.l.bf16 %v5330_v23  ;;  %v1643_v26 = vpop.xlane.xlu1 %1642 }
 0x981   : >> { %5349 = vpow2.f32 %v2075_v22 }
 0x982   : >> { %5351 = vpow2.f32 %v2077_v21  ;;  %v5044_v27 = vpack.c.bf16 %v5332_v24, %v5331_v25 }
 0x984   : >> { %5045 = vmatprep.subr.bf16.mxu0 %v5044_v27  ;;  %v1646_v28 = vpop.xlane.xlu1 %1645 }
 0x985   : >> { %5047 = vmatpush3.bf16.msra.mxu0 %v5044_v27  ;;  %v2327_v27 = vld [vmem:[%s5595_s24] sm:$0xff] }
 0x986   : >> { %5049 = vmatprep.subr.bf16.mxu0 %v5048_v58 }
 0x988   : >> { %v1862_v47 = vpop.xlane.xlu1 %1861 }
 0x98b   : >> { %v5350_v29 = vpop.eup %5349 }
 0x98c   : >> { %v5352_v11 = vpop.eup %5351  ;;  %4766 = vmatprep.mubr.msk.f32.mxu0 %vm1418_vm5, %v5350_v29  ;;  %v1865_v30 = vpop.xlane.xlu1 %1864  ;;  %v2079_v31 = vsel %vm1418_vm5, %v5350_v29, 0.0  ;;  %v2329_v29 = vld [vmem:[%s5595_s24 + $0x10] sm:$0xff] }
 0x98d   : >> { %5353 = vrcp.f32 %v1865_v30  ;;  %4767 = vmatmul.mubr.msk.f32.vlgmr.msra.gmra.mrb[6].mxu0 %vm1418_vm5, %v5352_v11  ;;  %2080 = vadd.xlane.f32.xlu1 %v2079_v31  ;;  %v2082_v32 = vsel %vm1418_vm5, %v5352_v11, 0.0  ;;  %v2330_v11 = vld [vmem:[%s5595_s24 + $0x18] sm:$0xff] }
 0x98e   : >> { %5355 = vrcp.f32 %v1643_v26  ;;  %5051 = vmatpush3.bf16.msra.mxu0 %v5048_v58  ;;  %v5060_v30 = vpack.c.bf16 %v2330_v11, %v2329_v29 }
 0x98f   : >> { %5357 = vrcp.f32 %v1646_v28  ;;  %5053 = vmatprep.subr.bf16.mxu0 %v5052_v48  ;;  %v2328_v28 = vld [vmem:[%s5595_s24 + $0x8] sm:$0xff] }
 0x990   : >> { %5359 = vrcp.f32 %v1862_v47  ;;  %v5056_v47 = vpack.c.bf16 %v2328_v28, %v2327_v27 }
 0x991   : >> { %2083 = vadd.xlane.f32.xlu1 %v2082_v32 }
 0x992   : >> { %5055 = vmatpush3.bf16.msra.mxu0 %v5052_v48  ;;  %5057 = vmatprep.subr.bf16.mxu1 %v5056_v47 }
 0x993   : >> { %5059 = vmatpush3.bf16.msra.mxu1 %v5056_v47 }
 0x994   : >> { %5061 = vmatprep.subr.bf16.mxu1 %v5060_v30 }
 0x995   : >> { %1435 = vadd.xlane.f32.xlu1 %v1434_v33 }
 0x997   : >> { %v5354_v34 = vpop.eup %5353  ;;  %5063 = vmatpush3.bf16.msra.mxu1 %v5060_v30 }
 0x998   : >> { %v1956_v35 = vmul.f32 %v5354_v34, %v4754_v1  ;;  %v5356_v36 = vpop.eup %5355 }
 0x999   : >> { %v1736_v37 = vmul.f32 %v5356_v36, %v5876_v40  ;;  %v5358_v38 = vpop.eup %5357 }
 0x99a   : >> { %1961 = vrot.lane.b32.xlu0 %v1956_v35, %s6257_s11  ;;  %v1737_v41 = vmul.f32 %v5358_v38, %v5874_v39  ;;  %v5360_v42 = vpop.eup %5359  ;;  %v4474_v38 = vld [vmem:[%s5585_s14] ss:$0 sm:$0xff] }
 0x99b   : >> { %v1955_v12 = vmul.f32 %v5360_v42, %v5892_v2  ;;  %v4475_v42 = vld [vmem:[%s5590_s19] ss:$0 sm:$0xff] }
 0x9a6   : >> { %1740 = vrot.lane.b32.xlu1 %v1736_v37, %s5523_s1 }
 0x9aa   : >> { %1742 = vrot.lane.b32.xlu1 %v1737_v41, %s5523_s1  ;;  %s5524_s1 = smov 24  }
 0x9ae   : >> { %1959 = vrot.lane.b32.xlu1 %v1955_v12, %s6257_s11  ;;  %s6302_s11 = sld [smem:[#allocation19_spill]] }
 0x9b0   : >> { %v1433_v43 = vpop.xlane.xlu0 %1432 }
 0x9b1   : >> { %5361 = vrcp.f32 %v1433_v43 }
 0x9bb   : >> { %v5362_v44 = vpop.eup %5361 }
 0x9bc   : >> { %v1526_v45 = vmul.f32 %v5362_v44, %v5856_v16 }
 0x9be   : >> { %1528 = vst.msk [vmem:[#allocation5] sm:$0xff] %vm1332_vm3, %v1526_v45 }
 0xa0c   : >> { %v1962_v16 = vpop.permute.xlu0 %1961 }
 0xa1a   : >> { %v2081_v46 = vpop.xlane.xlu1 %2080 }
 0xa1e   : >> { %v2084_v40 = vpop.xlane.xlu1 %2083 }
 0xa22   : >> { %v1436_v50 = vpop.xlane.xlu1 %1435 }
 0xa23   : >> { %5363 = vrcp.f32 %v1436_v50  ;;  %v2433_v50 = vld [vmem:[%s6289_s6] sm:$0xff] }
 0xa24   : >> { %5365 = vrcp.f32 %v2081_v46 }
 0xa25   : >> { %5367 = vrcp.f32 %v2084_v40 }
 0xa26   : >> { %v1741_v39 = vpop.permute.xlu1 %1740 }
 0xa27   : >> { %1747 = vst.msk [vmem:[#allocation5] sm:$0xff] %vm1746_vm6, %v1741_v39  ;;  %v2434_v39 = vld [vmem:[%s6289_s6 + $0x8] sm:$0xff] }
 0xa2a   : >> { %v1743_v51 = vpop.permute.xlu1 %1742 }
 0xa2d   : >> { %v5364_v52 = vpop.eup %5363 }
 0xa2e   : >> { %v1527_v54 = vmul.f32 %v5364_v52, %v5854_v15  ;;  %v1960_v55 = vpop.permute.xlu1 %1959  ;;  %v5366_v15 = vpop.eup %5365  ;;  %v2435_v52 = vld [vmem:[%s6289_s6 + $0x10] sm:$0xff] }
 0xa2f   : >> { %1966 = vst.msk [vmem:[#allocation5] sm:$0xff] %vm1965_vm7, %v1960_v55  ;;  %v5368_v63 = vpop.eup %5367 }
 0xa30   : >> { %1529 = vst.msk [vmem:[#allocation5 + $0x8] sm:$0xff] %vm1332_vm3, %v1527_v54  ;;  %v2436_v54 = vld [vmem:[%s6289_s6 + $0x18] sm:$0xff] }
 0xa31   : >> { %1748 = vst.msk [vmem:[#allocation5 + $0x8] sm:$0xff] %vm1746_vm6, %v1743_v51  ;;  %v5064_v51 = vpack.c.bf16 %v2434_v39, %v2433_v50  ;;  %v5068_v55 = vpack.c.bf16 %v2436_v54, %v2435_v52 }
 0xa32   : >> { %1967 = vst.msk [vmem:[#allocation5 + $0x8] sm:$0xff] %vm1965_vm7, %v1962_v16  ;;  %v4476_v16 = vld [vmem:[%s5600_s30] ss:$0 sm:$0xff] }
 0xa33   : >> { %5065 = vmatprep.subr.bf16.mxu0 %v5064_v51 }
 0xa60   : >> { %v4768_v61 = vpop.f32.mrb[6].mxu0 }
 0xa61   : >> { %v2165_v49 = vpop.f32.mrb[7].mxu0  ;;  %v2175_v0 = vmul.f32 %v5368_v63, %v4768_v61 }
 0xa62   : >> { %v2174_v62 = vmul.f32 %v5366_v15, %v2165_v49 }
 0xa64   : >> { %2178 = vrot.lane.b32.xlu1 %v2174_v62, %s5524_s1 }
 0xa68   : >> { %2180 = vrot.lane.b32.xlu1 %v2175_v0, %s5524_s1  ;;  %s6300_s1 = sld [smem:[#allocation18_spill]] }
 0xa6e   : >> { %v4495_v29 = vld [vmem:[%s6300_s1 + $0x50] sm:$0xff]  ;;  %v4496_v11 = vld [vmem:[%s6300_s1 + $0x58] sm:$0xff] }
 0xad6   : >> { %v2179_v1 = vpop.permute.xlu1 %2178 }
 0xad7   : >> { %2185 = vst.msk [vmem:[#allocation5] sm:$0xff] %vm2184_vm8, %v2179_v1 }
 0xada   : >> { %v2181_v2 = vpop.permute.xlu1 %2180 }
 0xadb   : >> { %2186 = vst.msk [vmem:[#allocation5 + $0x8] sm:$0xff] %vm2184_vm8, %v2181_v2 }
 0xade   : >> { %v2187_v3 = vld [vmem:[#allocation5] sm:$0xff] }
 0xadf   : >> { %4777 = vmatprep.mubr.msk.f32.mxu0 %vm1071_vm0, %v2187_v3  ;;  %v4484_v3 = vld [vmem:[%s6300_s1 + $0x20] sm:$0xff] }
 0xae2   : >> { %v2188_v6 = vld [vmem:[#allocation5 + $0x8] sm:$0xff] }
 0xae3   : >> { %4778 = vmatmul.mubr.msk.f32.vlgmr.msra.gmra.mrb[8].mxu0 %vm1071_vm0, %v2188_v6  ;;  %v4485_v6 = vld [vmem:[%s6300_s1 + $0x28] sm:$0xff] }
 0xae4   : >> { %5067 = vmatpush3.bf16.msra.mxu0 %v5064_v51 }
 0xae5   : >> { %5069 = vmatprep.subr.bf16.mxu0 %v5068_v55 }
 0xae8   : >> { %5071 = vmatpush3.bf16.msra.mxu0 %v5068_v55 }
 0xbb6   : >> { %v4779_v8 = vpop.f32.mrb[8].mxu0 }
 0xbb7   : >> { %v2278_v9 = vadd.f32 %v4779_v8, %v4471_v7  ;;  %v2272_v53 = vpop.f32.mrb[9].mxu0  ;;  %v2633_v8 = vld [vmem:[%s6300_s1] sm:$0xff] }
 0xbb8   : >> { %v2273_v10 = vadd.f32 %v4471_v7, %v2272_v53  ;;  %v5072_v7 = vpack.c.bf16 %v4485_v6, %v4484_v3 }
 0xbb9   : >> { %v5926_v13 = vadd.f32 %v2278_v9, %v5790_v5  ;;  %v2634_v9 = vld [vmem:[%s6300_s1 + $0x8] sm:$0xff] }
 0xbba   : >> { %v5929_v14 = vadd.f32 %v2273_v10, %v5788_v4  ;;  %v5080_v53 = vpack.c.bf16 %v2634_v9, %v2633_v8  ;;  %v4486_v10 = vld [vmem:[%s6300_s1 + $0x30] sm:$0xff]  ;;  %5073 = vmatprep.subr.bf16.mxu1 %v5072_v7 }
 0xbbb   : >> { %v2288_v17 = vsel %vm1071_vm0, %v5926_v13, 0.0 }
 0xbbc   : >> { %2289 = vadd.xlane.f32.xlu0 %v2288_v17  ;;  %v2285_v18 = vsel %vm1071_vm0, %v5929_v14, 0.0  ;;  %v4487_v17 = vld [vmem:[%s6300_s1 + $0x38] sm:$0xff]  ;;  %5081 = vmatprep.subr.bf16.mxu0 %v5080_v53 }
 0xbbd   : >> { %2286 = vadd.xlane.f32.xlu1 %v2285_v18  ;;  %v2635_v18 = vld [vmem:[%s6300_s1 + $0x10] sm:$0xff] }
 0xc49   : >> { %v2290_v19 = vpop.xlane.xlu0 %2289 }
 0xc4a   : >> { %v2292_v20 = vmul.f32 0.03125, %v2290_v19  ;;  %v2287_v21 = vpop.xlane.xlu1 %2286  ;;  %v5076_v19 = vpack.c.bf16 %v4487_v17, %v4486_v10 }
 0xc4b   : >> { %v2291_v5 = vmul.f32 0.03125, %v2287_v21 }
 0xc4c   : >> { %v2294_v22 = vsub.f32 %v5926_v13, %v2292_v20  ;;  %v2636_v20 = vld [vmem:[%s6300_s1 + $0x18] sm:$0xff] }
 0xc4d   : >> { %v2293_v4 = vsub.f32 %v5929_v14, %v2291_v5  ;;  %v5084_v21 = vpack.c.bf16 %v2636_v20, %v2635_v18  ;;  %v4493_v5 = vld [vmem:[%s6300_s1 + $0x40] sm:$0xff] }
 0xc4e   : >> { %v2296_v25 = vmul.f32 %v2294_v22, %v2294_v22 }
 0xc4f   : >> { %v2295_v23 = vmul.f32 %v2293_v4, %v2293_v4 }
 0xc50   : >> { %v2300_v26 = vsel %vm1071_vm0, %v2296_v25, 0.0 }
 0xc51   : >> { %v2297_v24 = vsel %vm1071_vm0, %v2295_v23, 0.0 }
 0xc52   : >> { %2298 = vadd.xlane.f32.xlu1 %v2297_v24  ;;  %v4483_v24 = vld [vmem:[%s6301_s16] ss:$0 sm:$0xff]  ;;  %s6303_s16 = sld [smem:[#allocation22_spill]] }
 0xc56   : >> { %2301 = vadd.xlane.f32.xlu1 %v2300_v26 }
 0xc58   : >> { %v2859_v6 = vld [vmem:[%s6303_s16 + $0x28] sm:$0xff]  ;;  %v2858_v9 = vld [vmem:[%s6303_s16 + $0x20] sm:$0xff]  ;;  %v2865_v18 = vld [vmem:[%s6303_s16 + $0x58] sm:$0xff] }
 0xc59   : >> { %v2863_v17 = vld [vmem:[%s6303_s16 + $0x48] sm:$0xff]  ;;  %v2862_v20 = vld [vmem:[%s6303_s16 + $0x40] sm:$0xff] }
 0xcdf   : >> { %v2299_v31 = vpop.xlane.xlu1 %2298 }
 0xce0   : >> { %v2303_v32 = vmul.f32 0.03125, %v2299_v31  ;;  %v5092_v31 = vpack.c.bf16 %v4496_v11, %v4495_v29 }
 0xce2   : >> { %v2305_v33 = vadd.f32 1e-05, %v2303_v32 }
 0xce3   : >> { %v2302_v34 = vpop.xlane.xlu1 %2301 }
 0xce4   : >> { %5369 = vrsqrt.f32 %v2305_v33  ;;  %v2304_v35 = vmul.f32 0.03125, %v2302_v34  ;;  %v4488_v34 = vld [vmem:[%s6302_s11] ss:$0 sm:$0xff]  ;;  %s6304_s11 = sld [smem:[#allocation20_spill]] }
 0xce6   : >> { %v2306_v36 = vadd.f32 1e-05, %v2304_v35 }
 0xce8   : >> { %5371 = vrsqrt.f32 %v2306_v36 }
 0xcee   : >> { %v5370_v37 = vpop.eup %5369 }
 0xcef   : >> { %v2309_v41 = vmul.f32 %v5370_v37, %v2293_v4 }
 0xcf1   : >> { %v2317_v12 = vmul.f32 %v4474_v38, %v2309_v41 }
 0xcf2   : >> { %v5372_v43 = vpop.eup %5371 }
 0xcf3   : >> { %v2310_v44 = vmul.f32 %v5372_v43, %v2294_v22  ;;  %v2325_v45 = vadd.f32 %v4475_v42, %v2317_v12  ;;  %v4494_v22 = vld [vmem:[%s6300_s1 + $0x48] sm:$0xff]  ;;  %s6264_s1 = smov 32  }
 0xcf4   : >> { %v5088_v4 = vpack.c.bf16 %v4494_v22, %v4493_v5  ;;  %v2867_v22 = vld [vmem:[%s6303_s16 + $0x68] sm:$0xff] }
 0xcf5   : >> { %v2318_v46 = vmul.f32 %v4474_v38, %v2310_v44  ;;  %4788 = vmatprep.mubr.msk.f32.mxu1 %vm1071_vm0, %v2325_v45 }
 0xcf7   : >> { %v2326_v40 = vadd.f32 %v4475_v42, %v2318_v46 }
 0xcf9   : >> { %4789 = vmatmul.mubr.msk.f32.vlgmr.msra.gmra.mrb[10].mxu1 %vm1071_vm0, %v2326_v40 }
 0xcfa   : >> { %5075 = vmatpush3.bf16.msra.mxu1 %v5072_v7  ;;  %v2861_v7 = vld [vmem:[%s6303_s16 + $0x38] sm:$0xff] }
 0xcfb   : >> { %5077 = vmatprep.subr.bf16.mxu1 %v5076_v19  ;;  %v5100_v8 = vpack.c.bf16 %v2861_v7, %v2859_v6 }
 0xcfe   : >> { %5079 = vmatpush3.bf16.msra.mxu1 %v5076_v19  ;;  %v5104_v19 = vpack.c.bf16 %v2865_v18, %v2863_v17 }
 0xcff   : >> { %5089 = vmatprep.subr.bf16.mxu1 %v5088_v4 }
 0xdcc   : >> { %v4790_v56 = vpop.f32.mrb[10].mxu1 }
 0xdcd   : >> { %v2416_v57 = vadd.f32 %v4790_v56, %v4476_v16  ;;  %v2410_v58 = vpop.f32.mrb[11].mxu1 }
 0xdce   : >> { %v2411_v59 = vadd.f32 %v4476_v16, %v2410_v58 }
 0xdcf   : >> { %v4480_v60 = vmul.f32 -1.442695, %v2416_v57 }
 0xdd0   : >> { %v4479_v48 = vmul.f32 -1.442695, %v2411_v59 }
 0xdd1   : >> { %5373 = vpow2.f32 %v4480_v60 }
 0xdd2   : >> { %5375 = vpow2.f32 %v4479_v48 }
 0xddb   : >> { %v5374_v61 = vpop.eup %5373 }
 0xddc   : >> { %v5376_v15 = vpop.eup %5375  ;;  %v2426_v49 = vadd.f32 1.0, %v5374_v61 }
 0xddd   : >> { %v2425_v62 = vadd.f32 1.0, %v5376_v15 }
 0xdde   : >> { %5377 = vrcp.f32 %v2426_v49 }
 0xddf   : >> { %5379 = vrcp.f32 %v2425_v62  ;;  %v2855_v62 = vld [vmem:[%s6303_s16 + $0x8] sm:$0xff] }
 0xde8   : >> { %v5378_v63 = vpop.eup %5377 }
 0xde9   : >> { %v5380_v0 = vpop.eup %5379  ;;  %v2432_v2 = vmul.f32 %v5378_v63, %v2416_v57  ;;  %v2857_v63 = vld [vmem:[%s6303_s16 + $0x18] sm:$0xff] }
 0xdea   : >> { %v2431_v1 = vmul.f32 %v5380_v0, %v2411_v59  ;;  %v5096_v0 = vpack.c.bf16 %v2857_v63, %v2855_v62 }
 0xdec   : >> { %4799 = vmatprep.mubr.msk.f32.mxu0 %vm1071_vm0, %v2431_v1  ;;  %v2854_v1 = vld [vmem:[%s6303_s16] sm:$0xff] }
 0xded   : >> { %4800 = vmatmul.mubr.msk.f32.vlgmr.msra.gmra.mrb[10].mxu0 %vm1071_vm0, %v2432_v2  ;;  %v2856_v2 = vld [vmem:[%s6303_s16 + $0x10] sm:$0xff] }
 0xdee   : >> { %5083 = vmatpush3.bf16.msra.mxu0 %v5080_v53  ;;  %v5098_v3 = vpack.c.bf16 %v2856_v2, %v2854_v1  ;;  %v2860_v53 = vld [vmem:[%s6303_s16 + $0x30] sm:$0xff] }
 0xdef   : >> { %5085 = vmatprep.subr.bf16.mxu0 %v5084_v21  ;;  %v5102_v10 = vpack.c.bf16 %v2860_v53, %v2858_v9 }
 0xdf2   : >> { %5087 = vmatpush3.bf16.msra.mxu0 %v5084_v21  ;;  %v2864_v21 = vld [vmem:[%s6303_s16 + $0x50] sm:$0xff] }
 0xdf3   : >> { %5097 = vmatprep.subr.bf16.mxu0 %v5096_v0  ;;  %v5106_v5 = vpack.c.bf16 %v2864_v21, %v2862_v20 }
 0xec0   : >> { %v4801_v23 = vpop.f32.mrb[10].mxu0 }
 0xec1   : >> { %v2519_v25 = vadd.f32 %v4801_v23, %v5926_v13  ;;  %v2509_v26 = vpop.f32.mrb[11].mxu0  ;;  %v2866_v23 = vld [vmem:[%s6303_s16 + $0x60] sm:$0xff] }
 0xec2   : >> { %v2518_v27 = vadd.f32 %v2509_v26, %v5929_v14  ;;  %v5525_v26 = vmov 0.0  }
 0xec3   : >> { %v2528_v28 = vadd.f32 %v4483_v24, %v2519_v25  ;;  %v2868_v25 = vld [vmem:[%s6303_s16 + $0x70] sm:$0xff] }
 0xec4   : >> { %v2527_v47 = vadd.f32 %v4483_v24, %v2518_v27  ;;  %v5110_v27 = vpack.c.bf16 %v2868_v25, %v2866_v23 }
 0xec5   : >> { %2530 = vst.msk [vmem:[#allocation3 + $0x8] sm:$0xff] %vm1071_vm0, %v2528_v28 }
 0xec6   : >> { %2529 = vst.msk [vmem:[#allocation3] sm:$0xff] %vm1071_vm0, %v2527_v47 }
 0xecc   : >> { %v2532_v32 = vld [vmem:[#allocation3 + $0x8] sm:$0xff] }
 0xecd   : >> { %v2531_v30 = vld [vmem:[#allocation3] sm:$0xff]  ;;  %v2632_v13 = vld [vmem:[#allocation3 + $0x8] sm:$0x7f] }
 0xece   : >> { %4810 = vmatprep.mubr.msk.f32.mxu1 %vm1071_vm0, %v2531_v30  ;;  %4821 = vmatprep.mubr.msk.f32.mxu0 %vm1071_vm0, %v2531_v30  ;;  %v2725_v14 = vld [vmem:[#allocation3 + $0x1] sm:$0xff]  ;;  %v2726_v33 = vld [vmem:[#allocation3 + $0x9] sm:$0x7f]  ;;  %v4499_v30 = vld [vmem:[%s6304_s11] ss:$0 sm:$0xff]  ;;  %s6308_s11 = smov 64  }
 0xecf   : >> { %4811 = vmatmul.mubr.msk.f32.vlgmr.msra.gmra.mrb[12].mxu1 %vm1071_vm0, %v2532_v32  ;;  %4822 = vmatmul.mubr.msk.f32.vlgmr.msra.gmra.mrb[12].mxu0 %vm1071_vm0, %v2632_v13  ;;  %v4500_v32 = vld [vmem:[%s6305_s2] ss:$0 sm:$0xff]  ;;  %s6307_s2 = smov 48  }
 0xed0   : >> { %5091 = vmatpush3.bf16.msra.mxu1 %v5088_v4  ;;  %4832 = vmatprep.mubr.msk.f32.mxu1 %vm1071_vm0, %v2725_v14  ;;  %v2869_v4 = vld [vmem:[%s6303_s16 + $0x78] sm:$0xff] }
 0xed1   : >> { %5093 = vmatprep.subr.bf16.mxu1 %v5092_v31  ;;  %5099 = vmatpush1.bf16.msra.mxu0 %v5098_v3  ;;  %v5108_v24 = vpack.c.bf16 %v2869_v4, %v2867_v22 }
 0xed2   : >> { %5101 = vmatprep.subr.bf16.mxu0 %v5100_v8  ;;  %2949 = vmatprep.mubr.f32.mxu0 %v5525_v26 }
 0xed4   : >> { %5095 = vmatpush3.bf16.msra.mxu1 %v5092_v31 }
 0xed5   : >> { %5103 = vmatpush1.bf16.msra.mxu0 %v5102_v10  ;;  %4835 = vmatprep.subr.mxu1 %v5525_v26 }
 0xed6   : >> { %5105 = vmatprep.subr.bf16.mxu0 %v5104_v19 }
 0xed7   : >> { %4833 = vmatmul.mubr.msk.f32.vlgmr.msra.gmra.mrb[14].mxu1 %vm1071_vm0, %v2726_v33  ;;  %v2872_v33 = vlaneseq }
 0xed8   : >> { %4837 = vmatprep.mubr.msk.f32.mxu1 %vm5526_vm11, %v5525_v26 }
 0xed9   : >> { %5107 = vmatpush1.bf16.msra.mxu0 %v5106_v5 }
 0xeda   : >> { %5109 = vmatprep.subr.bf16.mxu0 %v5108_v24 }
 0xedd   : >> { %5111 = vmatpush1.bf16.msra.mxu0 %v5110_v27 }
 0xede   : >> { %4855 = vmatprep.subr.mxu0 %v5525_v26 }
 0xfa2   : >> { %v4812_v35 = vpop.f32.mrb[12].mxu1  ;;  %v4823_v36 = vpop.f32.mrb[12].mxu0 }
 0xfa3   : >> { %v2623_v37 = vadd.f32 %v4812_v35, %v4488_v34  ;;  %v2617_v38 = vpop.f32.mrb[13].mxu1  ;;  %v2709_v41 = vpop.f32.mrb[13].mxu0 }
 0xfa4   : >> { %v2618_v42 = vadd.f32 %v4488_v34, %v2617_v38  ;;  %v2873_v34 = vshrl.u32 %v2872_v33, 7 }
 0xfa5   : >> { %2628 = vst.msk [vmem:[#allocation6 + $0x8] sm:$0xff] %vm2626_vm9, %v2623_v37 }
 0xfa6   : >> { %2627 = vst.msk [vmem:[#allocation6] sm:$0xff] %vm2626_vm9, %v2618_v42  ;;  %v2874_v35 = vsub.s32 0, %v2873_v34  ;;  %v2878_v37 = vsub.s32 1, %v2873_v34 }
 0xfaa   : >> { %v4834_v12 = vpop.f32.mrb[14].mxu1 }
 0xfab   : >> { %v2804_v43 = vpop.f32.mrb[15].mxu1 }
 0xfac   : >> { %v2630_v44 = vld [vmem:[#allocation6 + $0x9] sm:$0x7f] }
 0xfad   : >> { %v2719_v45 = vadd.f32 %v4823_v36, %v2630_v44  ;;  %v2629_v46 = vld [vmem:[#allocation6 + $0x1] sm:$0xff]  ;;  %v2870_v36 = vld [vmem:[%s6306_s23] sm:$0x3]  ;;  %s6310_s23 = smov 112  }
 0xfae   : >> { %v2718_v40 = vadd.f32 %v2709_v41, %v2629_v46  ;;  %v2875_v38 = vrot.slane %v2870_v36, %v2874_v35  ;;  %v2879_v41 = vrot.slane %v2870_v36, %v2878_v37  ;;  %v5528_v37 = vmov 0.0|0.0  }
 0xfaf   : >> { %2722 = vst.msk [vmem:[#allocation6 + $0x9] sm:$0x7f] %vm2721_vm10, %v2719_v45 }
 0xfb0   : >> { %2720 = vst.msk [vmem:[#allocation6 + $0x1] sm:$0xff] %vm2626_vm9, %v2718_v40 }
 0xfb7   : >> { %v2724_v50 = vld [vmem:[#allocation6 + $0x8] sm:$0x7f]  ;;  %v2723_v39 = vld [vmem:[#allocation6] sm:$0xff] }
 0xfb8   : >> { %v2814_v51 = vadd.f32 %v4834_v12, %v2724_v50  ;;  %v2813_v52 = vadd.f32 %v2804_v43, %v2723_v39 }
 0xfba   : >> { %2816 = vst.msk [vmem:[#allocation6 + $0x8] sm:$0x7f] %vm2721_vm10, %v2814_v51 }
 0xfbb   : >> { %2815 = vst.msk [vmem:[#allocation6] sm:$0xff] %vm2626_vm9, %v2813_v52 }
 0xfc2   : >> { %v2817_v54 = vld [vmem:[#allocation6] ss:$2 sm:$0xff]  ;;  %v2820_v55 = vld [vmem:[#allocation6 + $0x1] ss:$2 sm:$0xff] }
 0xfc3   : >> { %v2818_v16 = vmax.f32 %v2817_v54, 0.0  ;;  %v2821_v56 = vmax.f32 %v2820_v55, 0.0 }
 0xfc5   : >> { %v2822_v57 = vadd.f32 %v2821_v56, %v2818_v16 }
 0xfc7   : >> { %v5982_v58 = vmul.f32 0.5, %v2822_v57 }
 0xfc9   : >> { %v2826_v59 = vsel %vm2626_vm9, %v5982_v58, 0.0 }
 0xfca   : >> { %2827 = vadd.xlane.f32.xlu0 %v2826_v59 }
0x1057   : >> { %v2828_v60 = vpop.xlane.xlu0 %2827 }
0x1058   : >> { %v2830_v48 = vmul.f32 0.015625, %v2828_v60 }
0x105a   : >> { %v2831_v61 = vsub.f32 %v5982_v58, %v2830_v48 }
0x105c   : >> { %v2832_v15 = vmul.f32 %v2831_v61, %v2831_v61 }
0x105e   : >> { %v2833_v49 = vsel %vm2626_vm9, %v2832_v15, 0.0 }
0x105f   : >> { %2834 = vadd.xlane.f32.xlu1 %v2833_v49 }
0x10ec   : >> { %v2835_v28 = vpop.xlane.xlu1 %2834 }
0x10ed   : >> { %v2836_v47 = vmul.f32 0.015625, %v2835_v28 }
0x10ef   : >> { %v2837_v29 = vadd.f32 1e-05, %v2836_v47 }
0x10f1   : >> { %5381 = vrsqrt.f32 %v2837_v29 }
0x10fb   : >> { %v5382_v11 = vpop.eup %5381 }
0x10fc   : >> { %v2839_v31 = vmul.f32 %v5382_v11, %v2831_v61 }
0x10fe   : >> { %v2846_v13 = vmul.f32 %v4499_v30, %v2839_v31 }
0x1100   : >> { %v2853_v14 = vadd.f32 %v4500_v32, %v2846_v13 }
0x1102   : >> { %4501 = vmatmul.mubr.msk.f32.vlgmr.msra.gmra.mrb[14].mxu0 %vm2626_vm9, %v2853_v14 }
0x1103   : >> { %4857 = vmatprep.mubr.msk.f32.mxu0 %vm5526_vm11, %v5525_v26 }
0x11d5   : >> { %v2951_v42 = vpop.f32.mrb[14].mxu0 }
0x11d6   : >> { %v2952_v12 = vadd.f32 %v2951_v42, %v2875_v38  ;;  %v2953_v43 = vpop.f32.mrb[15].mxu0 }
0x11d7   : >> { %v2954_v44 = vadd.f32 %v2953_v43, %v2879_v41 }
0x11d8   : >> { %3131 = vrot.lane.b32.xlu1 %v2952_v12, %s6307_s2  ;;  %2962 = vrot.lane.b32.xlu0 %v2952_v12, %s6308_s11  ;;  %v3125_v46 = vmul.f32 0.25, %v2952_v12  ;;  %s6311_s11 = smov 96  }
0x11d9   : >> { %2957 = vst.msk [vmem:[#allocation8 + $0x8] sm:$0xff] %vm2626_vm9, %v2954_v44 }
0x11dc   : >> { %3308 = vrot.lane.b32.xlu0 %v2952_v12, %s6264_s1  ;;  %s6312_s1 = smov 80  }
0x11e0   : >> { %3485 = vrot.lane.b32.xlu0 %v2952_v12, %s6309_s3  ;;  %v2960_v50 = vld [vmem:[#allocation8 + $0x8] sm:$0xff] }
0x124a   : >> { %v2963_v45 = vpop.permute.xlu0 %2962  ;;  %v3132_v54 = vpop.permute.xlu1 %3131 }
0x124b   : >> { %4836 = vmatpush3.xpose.msk.msra.mxu1 %vm1418_vm5, %v2963_v45 }
0x124c   : >> { %4840 = vmatprep.subr.mxu1 %v5525_v26 }
0x124e   : >> { %v3309_v40 = vpop.permute.xlu0 %3308  ;;  %4838 = vmatmul.mubr.msk.f32.vlgmr.msra.gmra.mrb[16].mxu1 %vm1418_vm5, %v3125_v46 }
0x124f   : >> { %4841 = vmatpush3.msra.mxu1 %v2960_v50  ;;  %4856 = vmatpush3.xpose.msk.msra.mxu0 %vm1418_vm5, %v3309_v40 }
0x1250   : >> { %4865 = vmatprep.subr.mxu0 %v5525_v26  ;;  %4842 = vmatprep.mubr.msk.f32.mxu1 %vm5526_vm11, %v5525_v26 }
0x1251   : >> { %4845 = vmatprep.subr.mxu1 %v5525_v26 }
0x1252   : >> { %v3486_v60 = vpop.permute.xlu0 %3485 }
0x1321   : >> { %v3035_v39 = vpop.f32.mrb[16].mxu1 }
0x1322   : >> { %v4839_v51 = vpop.f32.mrb[17].mxu1  ;;  %v3039_v52 = vsel %vm1332_vm3, %v3035_v39, -inf }
0x1323   : >> { %3040 = vmax.xlane.f32.xlu1 %v3039_v52 }
0x1334   : >> { %3128 = vrot.lane.b32.xlu1 %v3125_v46, %s6310_s23 }
0x1338   : >> { %3305 = vrot.lane.b32.xlu1 %v3125_v46, %s6311_s11 }
0x133c   : >> { %3482 = vrot.lane.b32.xlu1 %v3125_v46, %s6312_s1 }
0x13b0   : >> { %v3041_v55 = vpop.xlane.xlu1 %3040 }
0x13b1   : >> { %v3042_v16 = vsub.f32 %v3035_v39, %v3041_v55 }
0x13b3   : >> { %v3043_v56 = vmul.f32 1.442695, %v3042_v16 }
0x13b4   : >> { %v3129_v57 = vpop.permute.xlu1 %3128 }
0x13b5   : >> { %5383 = vpow2.f32 %v3043_v56 }
0x13b8   : >> { %v3306_v59 = vpop.permute.xlu1 %3305 }
0x13b9   : >> { %4858 = vmatmul.mubr.msk.f32.vlgmr.msra.gmra.mrb[16].mxu0 %vm1418_vm5, %v3306_v59 }
0x13ba   : >> { %4866 = vmatpush3.xpose.msk.msra.mxu0 %vm1418_vm5, %v3486_v60  ;;  %4867 = vmatprep.mubr.msk.f32.mxu0 %vm5526_vm11, %v5525_v26 }
0x13bb   : >> { %5112 = vmatprep.subr.bf16.mxu0 %v5528_v37 }
0x13bc   : >> { %v3483_v48 = vpop.permute.xlu1 %3482 }
0x13bd   : >> { %4868 = vmatmul.mubr.msk.f32.vlgmr.msra.gmra.mrb[18].mxu0 %vm1418_vm5, %v3483_v48 }
0x13be   : >> { %4891 = vmatprep.mubr.msk.f32.mxu0 %vm5526_vm11, %v5525_v26 }
0x13bf   : >> { %v5384_v61 = vpop.eup %5383 }
0x13c0   : >> { %4843 = vmatmul.mubr.msk.f32.vlgmr.msra.gmra.mrb[18].mxu1 %vm1332_vm3, %v5384_v61  ;;  %v3045_v11 = vsel %vm1332_vm3, %v5384_v61, 0.0 }
0x13c1   : >> { %4846 = vmatpush3.xpose.msk.msra.mxu1 %vm1418_vm5, %v3132_v54  ;;  %4847 = vmatprep.mubr.msk.f32.mxu1 %vm5526_vm11, %v5525_v26 }
0x13c2   : >> { %4850 = vmatprep.subr.mxu1 %v5525_v26 }
0x13c4   : >> { %4848 = vmatmul.mubr.msk.f32.vlgmr.msra.gmra.mrb[20].mxu1 %vm1418_vm5, %v3129_v57 }
0x13c5   : >> { %4852 = vmatprep.mubr.msk.f32.mxu1 %vm5526_vm11, %v5525_v26 }
0x148c   : >> { %v3380_v15 = vpop.f32.mrb[16].mxu0 }
0x148d   : >> { %v4859_v49 = vpop.f32.mrb[17].mxu0  ;;  %v3384_v62 = vsel %vm1332_vm3, %v3380_v15, -inf }
0x148e   : >> { %3385 = vmax.xlane.f32.xlu1 %v3384_v62 }
0x1490   : >> { %v3557_v63 = vpop.f32.mrb[18].mxu0 }
0x1491   : >> { %v4869_v0 = vpop.f32.mrb[19].mxu0  ;;  %v3561_v1 = vsel %vm1332_vm3, %v3557_v63, -inf }
0x1492   : >> { %3562 = vmax.xlane.f32.xlu0 %v3561_v1 }
0x1493   : >> { %v3118_v2 = vpop.f32.mrb[18].mxu1 }
0x1494   : >> { %v4844_v3 = vpop.f32.mrb[19].mxu1 }
0x1497   : >> { %v3203_v6 = vpop.f32.mrb[20].mxu1 }
0x1498   : >> { %v4849_v7 = vpop.f32.mrb[21].mxu1  ;;  %v3207_v8 = vsel %vm1332_vm3, %v3203_v6, -inf }
0x1499   : >> { %3208 = vmax.xlane.f32.xlu0 %v3207_v8 }
0x149f   : >> { %3395 = vrot.lane.b32.xlu1 %v2960_v50, %s6311_s11  ;;  %s6315_s11 = sld [smem:[#allocation25_spill]] }
0x14a3   : >> { %3572 = vrot.lane.b32.xlu1 %v2960_v50, %s6312_s1  ;;  %s6313_s1 = sld [smem:[#allocation24_spill]] }
0x14a9   : >> { %v3656_v33 = vld [vmem:[%s6313_s1] sm:$0xff]  ;;  %v3657_v34 = vld [vmem:[%s6313_s1 + $0x8] sm:$0xff]  ;;  %v3658_v38 = vld [vmem:[%s6313_s1 + $0x10] sm:$0xff] }
0x14aa   : >> { %v5113_v35 = vpack.c.bf16 %v3657_v34, %v3656_v33  ;;  %v3659_v41 = vld [vmem:[%s6313_s1 + $0x18] sm:$0xff]  ;;  %v3660_v12 = vld [vmem:[%s6313_s1 + $0x20] sm:$0xff]  ;;  %v3661_v43 = vld [vmem:[%s6313_s1 + $0x28] sm:$0xff] }
0x14ab   : >> { %v5116_v42 = vpack.c.bf16 %v3659_v41, %v3658_v38  ;;  %v5119_v44 = vpack.c.bf16 %v3661_v43, %v3660_v12  ;;  %v3662_v45 = vld [vmem:[%s6313_s1 + $0x30] sm:$0xff]  ;;  %v3663_v46 = vld [vmem:[%s6313_s1 + $0x38] sm:$0xff] }
0x14ac   : >> { %5114 = vmatpush3.bf16.msra.mxu0 %v5113_v35  ;;  %v5122_v39 = vpack.c.bf16 %v3663_v46, %v3662_v45 }
0x14ad   : >> { %5115 = vmatprep.subr.bf16.mxu0 %v5528_v37 }
0x14af   : >> { %3218 = vrot.lane.b32.xlu0 %v2960_v50, %s6310_s23  ;;  %s6314_s23 = smov 32  }
0x14b0   : >> { %5117 = vmatpush3.bf16.msra.mxu0 %v5116_v42 }
0x14b1   : >> { %5118 = vmatprep.subr.bf16.mxu0 %v5528_v37 }
0x14b4   : >> { %5120 = vmatpush3.bf16.msra.mxu0 %v5119_v44 }
0x14b5   : >> { %5121 = vmatprep.subr.bf16.mxu0 %v5528_v37 }
0x14b8   : >> { %5123 = vmatpush3.bf16.msra.mxu0 %v5122_v39 }
0x14b9   : >> { %5136 = vmatprep.subr.bf16.mxu0 %v5528_v37 }
0x151b   : >> { %v3386_v9 = vpop.xlane.xlu1 %3385 }
0x151c   : >> { %v3387_v53 = vsub.f32 %v3380_v15, %v3386_v9 }
0x151e   : >> { %v3388_v10 = vmul.f32 1.442695, %v3387_v53 }
0x151f   : >> { %v3563_v17 = vpop.xlane.xlu0 %3562  ;;  %v3396_v24 = vpop.permute.xlu1 %3395 }
0x1520   : >> { %5385 = vpow2.f32 %v3388_v10  ;;  %v3564_v18 = vsub.f32 %v3557_v63, %v3563_v17  ;;  %v4514_v63 = vld [vmem:[%s6315_s11] ss:$0 sm:$0xff]  ;;  %s6319_s11 = sld [smem:[#allocation30_spill]] }
0x1522   : >> { %v3565_v21 = vmul.f32 1.442695, %v3564_v18 }
0x1523   : >> { %v3573_v47 = vpop.permute.xlu1 %3572 }
0x1526   : >> { %v3209_v19 = vpop.xlane.xlu0 %3208  ;;  %s6320_s1 = smov %s6319_s11 }
0x1527   : >> { %v3210_v20 = vsub.f32 %v3203_v6, %v3209_v19  ;;  %v3870_v33 = vld [vmem:[%s6320_s1 + $0x8] sm:$0xff]  ;;  %v3871_v35 = vld [vmem:[%s6320_s1 + $0x10] sm:$0xff]  ;;  %v3873_v41 = vld [vmem:[%s6320_s1 + $0x20] sm:$0xff] }
0x1528   : >> { %v3874_v42 = vld [vmem:[%s6320_s1 + $0x28] sm:$0xff]  ;;  %v3875_v43 = vld [vmem:[%s6320_s1 + $0x30] sm:$0xff]  ;;  %v3876_v44 = vld [vmem:[%s6320_s1 + $0x38] sm:$0xff] }
0x1529   : >> { %v3211_v5 = vmul.f32 1.442695, %v3210_v20  ;;  %v5143_v12 = vpack.c.bf16 %v3874_v42, %v3873_v41  ;;  %v5146_v45 = vpack.c.bf16 %v3876_v44, %v3875_v43  ;;  %v4227_v41 = vld [vmem:[%s5695_s20 + $0x18] sm:$0xff] }
0x152a   : >> { %v5386_v22 = vpop.eup %5385  ;;  %v3219_v4 = vpop.permute.xlu0 %3218 }
0x152b   : >> { %5387 = vpow2.f32 %v3211_v5  ;;  %4851 = vmatpush3.msra.mxu1 %v3219_v4  ;;  %v3390_v23 = vsel %vm1332_vm3, %v5386_v22, 0.0 }
0x152c   : >> { %3391 = vadd.xlane.f32.xlu1 %v3390_v23  ;;  %4860 = vmatprep.subr.mxu1 %v5525_v26  ;;  %5389 = vpow2.f32 %v3565_v21 }
0x1535   : >> { %v5388_v25 = vpop.eup %5387 }
0x1536   : >> { %4853 = vmatmul.mubr.msk.f32.vlgmr.msra.gmra.mrb[22].mxu1 %vm1332_vm3, %v5388_v25  ;;  %v3213_v27 = vsel %vm1332_vm3, %v5388_v25, 0.0  ;;  %v5390_v28 = vpop.eup %5389 }
0x1537   : >> { %4861 = vmatpush3.msra.mxu1 %v3396_v24  ;;  %3214 = vadd.xlane.f32.xlu0 %v3213_v27  ;;  %v3567_v29 = vsel %vm1332_vm3, %v5390_v28, 0.0 }
0x1538   : >> { %4862 = vmatprep.mubr.msk.f32.mxu1 %vm5526_vm11, %v5525_v26  ;;  %4870 = vmatprep.subr.mxu1 %v5525_v26 }
0x153a   : >> { %4863 = vmatmul.mubr.msk.f32.vlgmr.msra.gmra.mrb[24].mxu1 %vm1332_vm3, %v5386_v22 }
0x153b   : >> { %4871 = vmatpush3.msra.mxu1 %v3573_v47  ;;  %3568 = vadd.xlane.f32.xlu0 %v3567_v29 }
0x153c   : >> { %4872 = vmatprep.mubr.msk.f32.mxu1 %vm5526_vm11, %v5525_v26  ;;  %5124 = vmatprep.subr.bf16.mxu1 %v5528_v37 }
0x153e   : >> { %4873 = vmatmul.mubr.msk.f32.vlgmr.msra.gmra.mrb[26].mxu1 %vm1332_vm3, %v5390_v28 }
0x153f   : >> { %3046 = vadd.xlane.f32.xlu0 %v3045_v11  ;;  %4910 = vmatprep.mubr.msk.f32.mxu1 %vm5526_vm11, %v5525_v26 }
0x15b9   : >> { %v3392_v36 = vpop.xlane.xlu1 %3391 }
0x15c4   : >> { %v3215_v30 = vpop.xlane.xlu0 %3214 }
0x15c8   : >> { %v3569_v31 = vpop.xlane.xlu0 %3568 }
0x15cc   : >> { %v3047_v32 = vpop.xlane.xlu0 %3046 }
0x15cd   : >> { %5391 = vrcp.f32 %v3047_v32 }
0x15ce   : >> { %5393 = vrcp.f32 %v3215_v30 }
0x15cf   : >> { %5395 = vrcp.f32 %v3392_v36  ;;  %v3872_v36 = vld [vmem:[%s6320_s1 + $0x18] sm:$0xff] }
0x15d0   : >> { %5397 = vrcp.f32 %v3569_v31  ;;  %v5140_v38 = vpack.c.bf16 %v3872_v36, %v3871_v35  ;;  %v4224_v35 = vld [vmem:[%s5695_s20] sm:$0xff]  ;;  %v4225_v36 = vld [vmem:[%s5695_s20 + $0x8] sm:$0xff] }
0x15d7   : >> { %v5392_v13 = vpop.eup %5391 }
0x15d8   : >> { %v3122_v14 = vmul.f32 %v5392_v13, %v3118_v2  ;;  %v5394_v40 = vpop.eup %5393 }
0x15d9   : >> { %v5396_v54 = vpop.eup %5395 }
0x15da   : >> { %3123 = vst.msk [vmem:[#allocation9] sm:$0xff] %vm1418_vm5, %v3122_v14  ;;  %v5398_v57 = vpop.eup %5397  ;;  %v3869_v14 = vld [vmem:[%s6319_s11] sm:$0xff]  ;;  %s6323_s11 = sld [smem:[#allocation31_spill]] }
0x15db   : >> { %v5137_v34 = vpack.c.bf16 %v3870_v33, %v3869_v14 }
0x1609   : >> { %v3290_v50 = vpop.f32.mrb[22].mxu1 }
0x160a   : >> { %v3294_v51 = vmul.f32 %v5394_v40, %v3290_v50  ;;  %v4854_v52 = vpop.f32.mrb[23].mxu1 }
0x160c   : >> { %3296 = vrot.lane.b32.xlu0 %v3294_v51, %s6309_s3  ;;  %s6316_s3 = sld [smem:[#allocation28_spill]] }
0x160d   : >> { %v3467_v55 = vpop.f32.mrb[24].mxu1 }
0x160e   : >> { %v3471_v16 = vmul.f32 %v5396_v54, %v3467_v55  ;;  %v4864_v56 = vpop.f32.mrb[25].mxu1 }
0x1610   : >> { %3473 = vrot.lane.b32.xlu1 %v3471_v16, %s6314_s23  ;;  %s6318_s23 = sld [smem:[#allocation27_spill]] }
0x1611   : >> { %v3644_v59 = vpop.f32.mrb[26].mxu1 }
0x1612   : >> { %v3648_v60 = vmul.f32 %v5398_v57, %v3644_v59  ;;  %v4874_v48 = vpop.f32.mrb[27].mxu1  ;;  %v3774_v17 = vld [vmem:[%s6316_s3] sm:$0xff]  ;;  %v3775_v18 = vld [vmem:[%s6316_s3 + $0x8] sm:$0xff]  ;;  %v3776_v19 = vld [vmem:[%s6316_s3 + $0x10] sm:$0xff] }
0x1613   : >> { %v3777_v20 = vld [vmem:[%s6316_s3 + $0x18] sm:$0xff]  ;;  %v3778_v5 = vld [vmem:[%s6316_s3 + $0x20] sm:$0xff]  ;;  %v3779_v22 = vld [vmem:[%s6316_s3 + $0x28] sm:$0xff] }
0x1614   : >> { %3650 = vrot.lane.b32.xlu1 %v3648_v60, %s6307_s2  ;;  %v5128_v21 = vpack.c.bf16 %v3777_v20, %v3776_v19  ;;  %s6317_s2 = sld [smem:[#allocation26_spill]]  ;;  %v5131_v4 = vpack.c.bf16 %v3779_v22, %v3778_v5  ;;  %v3780_v23 = vld [vmem:[%s6316_s3 + $0x30] sm:$0xff]  ;;  %v3781_v24 = vld [vmem:[%s6316_s3 + $0x38] sm:$0xff]  ;;  %v4522_v5 = vld [vmem:[%s6323_s11] ss:$0 sm:$0xff]  ;;  %s6324_s11 = scalar_lea.vmem [#allocation11], %s5759_s22 }
0x1615   : >> { %v5134_v25 = vpack.c.bf16 %v3781_v24, %v3780_v23 }
0x1616   : >> { %v4517_v31 = vld [vmem:[%s6318_s23] ss:$0 sm:$0xff]  ;;  %s6322_s23 = sld [smem:[#allocation29_spill]] }
0x161a   : >> { %v4516_v11 = vld [vmem:[%s6317_s2] ss:$0 sm:$0xff]  ;;  %s6321_s2 = sld [smem:[#allocation32_spill]] }
0x161c   : >> { %v4518_v39 = vld [vmem:[%s6322_s23] ss:$0 sm:$0xff]  ;;  %s4545_s23 = sshll.u32 %s5475_s18, 3  ;;  %s1024_s18 = sadd.s32 1, %s5475_s18  }
0x161d   : >> { %s4309_s1 = scalar_lea.vmem %s6324_s11, %s4545_s23 [#allocation11]  ;;  %p1021_p11 = scmp.ge.s32.totalorder %s1024_s18, 8  }
0x161e   : > { %s6325_s5 = scalar_lea.vmem (%p1021_p11), [#allocation11], %s5759_s22  ;;  %s6326_s23 = sand.u32 (%p1021_p11), 1, %s5463_s10  }
0x161f   : > { %s4325_s6 = sshll.u32 (%p1021_p11), %s6325_s5, 4  ;;  %s5529_s26 = smov (%p1021_p11), [#allocation11]   ;;  %s6198_s6 = int_to_ptr.vmem [resolvable:$true] %s4325_s6 }
0x1620   : >> { %v4523_v46 = vld [vmem:[%s6321_s2 + $0x40] sm:$0xff]  ;;  %v4524_v40 = vld [vmem:[%s6321_s2 + $0x48] sm:$0xff]  ;;  %v4060_v19 = vld [vmem:[%s6321_s2 + $0x38] sm:$0xff]  ;;  %s5405_s18 = scalar_lea.vmem (%p1021_p11), %s6198_s6, 1024  ;;  %s5409_s11 = sshll.u32 (%p1021_p11), %s5529_s26, 4  ;;  %s5410_s11 = int_to_ptr.vmem [resolvable:$false] %s5409_s11 }
0x1621   : >> { %v5149_v50 = vpack.c.bf16 %v4524_v40, %v4523_v46  ;;  %v4053_v57 = vld [vmem:[%s6321_s2] sm:$0xff]  ;;  %v4054_v59 = vld [vmem:[%s6321_s2 + $0x8] sm:$0xff]  ;;  %v4541_v14 = vld [vmem:[%s6321_s2 + $0xb8] sm:$0xff]  ;;  %p5406_p12 = scmp.ne.s32.totalorder (%p1021_p11), %s6198_s6, %s5405_s18  ;;  %p5412_p1 = scmp.lt.s32.totalorder (%p1021_p11), %s6198_s6, %s5410_s11 }
0x1622   : >> { %v5161_v48 = vpack.c.bf16 %v4054_v59, %v4053_v57  ;;  %v4534_v24 = vld [vmem:[%s6321_s2 + $0x80] sm:$0xff] }
0x1623   : > { %p5407_p13 = pnand (%p1021_p11), %p5406_p12, %p5745_p5 }
0x1625   : > { %p5408_p0 = pneg (%p1021_p11), %p5407_p13 }
0x167e   : >> { %v3297_v61 = vpop.permute.xlu0 %3296 }
0x167f   : >> { %3300 = vst.msk [vmem:[#allocation9] sm:$0xff] %vm3299_vm12, %v3297_v61 }
0x1682   : >> { %v3474_v15 = vpop.permute.xlu1 %3473 }
0x1683   : >> { %3477 = vst.msk [vmem:[#allocation9] sm:$0xff] %vm3476_vm13, %v3474_v15  ;;  %v4525_v15 = vld [vmem:[%s6321_s2 + $0x50] sm:$0xff] }
0x1686   : >> { %v3651_v49 = vpop.permute.xlu1 %3650 }
0x1687   : >> { %3654 = vst.msk [vmem:[#allocation9] sm:$0xff] %vm3653_vm14, %v3651_v49  ;;  %v4526_v49 = vld [vmem:[%s6321_s2 + $0x58] sm:$0xff] }
0x168e   : >> { %v3655_v62 = vld [vmem:[#allocation9] sm:$0xff] }
0x168f   : >> { %4892 = vmatmul.mubr.msk.f32.vlgmr.msra.gmra.mrb[20].mxu0 %vm2626_vm9, %v3655_v62  ;;  %v5152_v62 = vpack.c.bf16 %v4526_v49, %v4525_v15 }
0x1690   : >> { %4929 = vmatprep.mubr.msk.f32.mxu0 %vm5526_vm11, %v5525_v26  ;;  %5138 = vmatpush3.bf16.msra.mxu0 %v5137_v34 }
0x1691   : >> { %5139 = vmatprep.subr.bf16.mxu0 %v5528_v37 }
0x1694   : >> { %5141 = vmatpush3.bf16.msra.mxu0 %v5140_v38  ;;  %v4226_v38 = vld [vmem:[%s5695_s20 + $0x10] sm:$0xff] }
0x1695   : >> { %5142 = vmatprep.subr.bf16.mxu0 %v5528_v37  ;;  %v5188_v42 = vpack.c.bf16 %v4227_v41, %v4226_v38 }
0x1698   : >> { %5144 = vmatpush3.bf16.msra.mxu0 %v5143_v12  ;;  %v4531_v12 = vld [vmem:[%s5690_s12] ss:$0 sm:$0xff] }
0x1699   : >> { %5145 = vmatprep.subr.bf16.mxu0 %v5528_v37 }
0x169c   : >> { %5147 = vmatpush3.bf16.msra.mxu0 %v5146_v45 }
0x169d   : >> { %5160 = vmatprep.subr.bf16.mxu0 %v5528_v37 }
0x1762   : >> { %v3740_v0 = vpop.f32.mrb[20].mxu0 }
0x1763   : >> { %v3741_v1 = vadd.f32 %v4514_v63, %v3740_v0  ;;  %v4893_v2 = vpop.f32.mrb[21].mxu0  ;;  %v4055_v63 = vld [vmem:[%s6321_s2 + $0x10] sm:$0xff]  ;;  %v4056_v0 = vld [vmem:[%s6321_s2 + $0x18] sm:$0xff] }
0x1764   : >> { %v4527_v2 = vld [vmem:[%s6321_s2 + $0x60] sm:$0xff] }
0x1765   : >> { %v6091_v3 = vadd.f32 %v3741_v1, %v5982_v58  ;;  %v5125_v58 = vpack.c.bf16 %v3775_v18, %v3774_v17  ;;  %v5164_v1 = vpack.c.bf16 %v4056_v0, %v4055_v63  ;;  %v4530_v17 = vld [vmem:[%s6321_s2 + $0x78] sm:$0xff]  ;;  %v4059_v18 = vld [vmem:[%s6321_s2 + $0x30] sm:$0xff] }
0x1766   : >> { %v5170_v20 = vpack.c.bf16 %v4060_v19, %v4059_v18 }
0x1767   : >> { %v3747_v6 = vsel %vm2626_vm9, %v6091_v3, 0.0  ;;  %5126 = vmatpush3.bf16.msra.mxu1 %v5125_v58 }
0x1768   : >> { %3748 = vadd.xlane.f32.xlu1 %v3747_v6  ;;  %5127 = vmatprep.subr.bf16.mxu1 %v5528_v37  ;;  %v4528_v6 = vld [vmem:[%s6321_s2 + $0x68] sm:$0xff] }
0x176b   : >> { %5129 = vmatpush3.bf16.msra.mxu1 %v5128_v21 }
0x176c   : >> { %5130 = vmatprep.subr.bf16.mxu1 %v5528_v37 }
0x176f   : >> { %5132 = vmatpush3.bf16.msra.mxu1 %v5131_v4 }
0x1770   : >> { %5133 = vmatprep.subr.bf16.mxu1 %v5528_v37 }
0x1773   : >> { %5135 = vmatpush3.bf16.msra.mxu1 %v5134_v25  ;;  %v4535_v25 = vld [vmem:[%s6321_s2 + $0x88] sm:$0xff] }
0x1774   : >> { %5148 = vmatprep.subr.bf16.mxu1 %v5528_v37 }
0x17f5   : >> { %v3749_v7 = vpop.xlane.xlu1 %3748 }
0x17f6   : >> { %v3750_v8 = vmul.f32 0.015625, %v3749_v7  ;;  %v5155_v7 = vpack.c.bf16 %v4528_v6, %v4527_v2 }
0x17f8   : >> { %v3751_v9 = vsub.f32 %v6091_v3, %v3750_v8  ;;  %v4057_v8 = vld [vmem:[%s6321_s2 + $0x20] sm:$0xff] }
0x17fa   : >> { %v3752_v53 = vmul.f32 %v3751_v9, %v3751_v9 }
0x17fc   : >> { %v3753_v10 = vsel %vm2626_vm9, %v3752_v53, 0.0 }
0x17fd   : >> { %3754 = vadd.xlane.f32.xlu0 %v3753_v10  ;;  %v4529_v10 = vld [vmem:[%s6321_s2 + $0x70] sm:$0xff] }
0x17fe   : >> { %v5158_v58 = vpack.c.bf16 %v4530_v17, %v4529_v10 }
0x188a   : >> { %v3755_v27 = vpop.xlane.xlu0 %3754 }
0x188b   : >> { %v3756_v28 = vmul.f32 0.015625, %v3755_v27  ;;  %v5173_v27 = vpack.c.bf16 %v4535_v25, %v4534_v24 }
0x188d   : >> { %v3757_v47 = vadd.f32 1e-05, %v3756_v28  ;;  %v4536_v28 = vld [vmem:[%s6321_s2 + $0x90] sm:$0xff] }
0x188f   : >> { %5399 = vrsqrt.f32 %v3757_v47  ;;  %v4537_v47 = vld [vmem:[%s6321_s2 + $0x98] sm:$0xff] }
0x1899   : >> { %v5400_v29 = vpop.eup %5399 }
0x189a   : >> { %v3759_v30 = vmul.f32 %v5400_v29, %v3751_v9  ;;  %v4058_v9 = vld [vmem:[%s6321_s2 + $0x28] sm:$0xff] }
0x189b   : >> { %v5167_v53 = vpack.c.bf16 %v4058_v9, %v4057_v8 }
0x189c   : >> { %v3766_v32 = vmul.f32 %v4516_v11, %v3759_v30  ;;  %v4538_v30 = vld [vmem:[%s6321_s2 + $0xa0] sm:$0xff] }
0x189e   : >> { %v3773_v13 = vadd.f32 %v4517_v31, %v3766_v32  ;;  %v4539_v31 = vld [vmem:[%s6321_s2 + $0xa8] sm:$0xff] }
0x189f   : >> { %v5179_v32 = vpack.c.bf16 %v4539_v31, %v4538_v30 }
0x18a0   : >> { %4911 = vmatmul.mubr.msk.f32.vlgmr.msra.gmra.mrb[28].mxu1 %vm2626_vm9, %v3773_v13  ;;  %v4540_v13 = vld [vmem:[%s6321_s2 + $0xb0] sm:$0xff]  ;;  %s4552_s2 = sshll.u32 (%p1021_p11), %s5728_s0, 10  ;;  %s5411_s0 = scalar_lea.vmem (%p1021_p11), %s5410_s11, 2048 }
0x18a1   : >> { %4948 = vmatprep.mubr.msk.f32.mxu1 %vm5526_vm11, %v5525_v26  ;;  %5150 = vmatpush3.bf16.msra.mxu1 %v5149_v50  ;;  %v5182_v33 = vpack.c.bf16 %v4541_v14, %v4540_v13  ;;  %s6194_s3 = scalar_lea.hbm (%p1021_p11), %s5705_s4, %s4552_s2  ;;  %p5413_p2 = scmp.lt.s32.totalorder (%p1021_p11), %s5411_s0, %s5405_s18 }
0x18a2   : >> { %5151 = vmatprep.subr.bf16.mxu1 %v5528_v37 }
0x18a3   : > { %p5414_p3 = por (%p1021_p11), %p5413_p2, %p5412_p1 }
0x18a5   : >> { %5153 = vmatpush3.bf16.msra.mxu1 %v5152_v62  ;;  %p5415_p4 = pnand (%p1021_p11), %p5414_p3, %p5408_p0 }
0x18a6   : >> { %5154 = vmatprep.subr.bf16.mxu1 %v5528_v37 }
0x18a9   : >> { %5156 = vmatpush3.bf16.msra.mxu1 %v5155_v7 }
0x18aa   : >> { %5157 = vmatprep.subr.bf16.mxu1 %v5528_v37 }
0x18ad   : >> { %5159 = vmatpush3.bf16.msra.mxu1 %v5158_v58 }
0x18ae   : >> { %5172 = vmatprep.subr.bf16.mxu1 %v5528_v37 }
0x1973   : >> { %v3858_v51 = vpop.f32.mrb[28].mxu1 }
0x1974   : >> { %v3859_v52 = vadd.f32 %v4518_v39, %v3858_v51  ;;  %v4912_v54 = vpop.f32.mrb[29].mxu1 }
0x1976   : >> { %v4520_v55 = vmul.f32 -1.442695, %v3859_v52 }
0x1978   : >> { %5401 = vpow2.f32 %v4520_v55 }
0x1982   : >> { %v5402_v16 = vpop.eup %5401 }
0x1983   : >> { %v3865_v56 = vadd.f32 1.0, %v5402_v16 }
0x1985   : >> { %5403 = vrcp.f32 %v3865_v56  ;;  %v4543_v56 = vld [vmem:[%s5700_s27] ss:$0 sm:$0xff] }
0x198f   : >> { %v5404_v60 = vpop.eup %5403 }
0x1990   : >> { %v3868_v61 = vmul.f32 %v5404_v60, %v3859_v52 }
0x1992   : >> { %4930 = vmatmul.mubr.msk.f32.vlgmr.msra.gmra.mrb[22].mxu0 %vm2626_vm9, %v3868_v61 }
0x1993   : >> { %5162 = vmatpush3.bf16.msra.mxu0 %v5161_v48  ;;  %4967 = vmatprep.mubr.msk.f32.mxu0 %vm5526_vm11, %v5525_v26 }
0x1994   : >> { %5163 = vmatprep.subr.bf16.mxu0 %v5528_v37 }
0x1997   : >> { %5165 = vmatpush3.bf16.msra.mxu0 %v5164_v1 }
0x1998   : >> { %5166 = vmatprep.subr.bf16.mxu0 %v5528_v37 }
0x199b   : >> { %5168 = vmatpush3.bf16.msra.mxu0 %v5167_v53 }
0x199c   : >> { %5169 = vmatprep.subr.bf16.mxu0 %v5528_v37 }
0x199f   : >> { %5171 = vmatpush3.bf16.msra.mxu0 %v5170_v20 }
0x19a0   : >> { %5184 = vmatprep.subr.bf16.mxu0 %v5528_v37 }
0x1a65   : >> { %v3946_v21 = vpop.f32.mrb[22].mxu0 }
0x1a66   : >> { %v3950_v22 = vadd.f32 %v3946_v21, %v6091_v3  ;;  %v4931_v4 = vpop.f32.mrb[23].mxu0  ;;  %v5176_v3 = vpack.c.bf16 %v4537_v47, %v4536_v28 }
0x1a68   : >> { %v3958_v23 = vadd.f32 %v4522_v5, %v3950_v22 }
0x1a6a   : >> { %3959 = vst.msk [vmem:[#allocation7] sm:$0xff] %vm2626_vm9, %v3958_v23 }
0x1a71   : >> { %v3960_v29 = vld [vmem:[#allocation7] sm:$0xff] }
0x1a72   : >> { %v4052_v11 = vld [vmem:[#allocation7] sm:$0x7f]  ;;  %4949 = vmatmul.mubr.msk.f32.vlgmr.msra.gmra.mrb[30].mxu1 %vm2626_vm9, %v3960_v29 }
0x1a73   : >> { %4968 = vmatmul.mubr.msk.f32.vlgmr.msra.gmra.mrb[24].mxu0 %vm2626_vm9, %v4052_v11  ;;  %5174 = vmatpush3.bf16.msra.mxu1 %v5173_v27  ;;  %v4137_v34 = vld [vmem:[#allocation7 + $0x1] sm:$0x7f] }
0x1a74   : >> { %4986 = vmatprep.mubr.msk.f32.mxu1 %vm5526_vm11, %v5525_v26  ;;  %5175 = vmatprep.subr.bf16.mxu1 %v5528_v37 }
0x1a75   : >> { %4997 = vmatprep.mubr.msk.f32.mxu0 %vm5526_vm11, %v5525_v26  ;;  %v5185_v26 = vpack.c.bf16 %v4225_v36, %v4224_v35 }
0x1a77   : >> { %5177 = vmatpush3.bf16.msra.mxu1 %v5176_v3  ;;  %5186 = vmatpush3.bf16.msra.mxu0 %v5185_v26 }
0x1a78   : >> { %5178 = vmatprep.subr.bf16.mxu1 %v5528_v37  ;;  %5187 = vmatprep.subr.bf16.mxu0 %v5528_v37 }
0x1a7b   : >> { %5180 = vmatpush3.bf16.msra.mxu1 %v5179_v32  ;;  %5189 = vmatpush3.bf16.msra.mxu0 %v5188_v42 }
0x1a7c   : >> { %5181 = vmatprep.subr.bf16.mxu1 %v5528_v37 }
0x1a7f   : >> { %5183 = vmatpush3.bf16.msra.mxu1 %v5182_v33 }
0x1a82   : >> { %4987 = vmatmul.mubr.msk.f32.vlgmr.msra.gmra.mrb[32].mxu1 %vm2626_vm9, %v4137_v34 }
0x1b45   : >> { %v4046_v43 = vpop.f32.mrb[30].mxu1 }
0x1b46   : >> { %v4130_v44 = vpop.f32.mrb[24].mxu0  ;;  %v4047_v45 = vadd.f32 %v4531_v12, %v4046_v43  ;;  %v4950_v46 = vpop.f32.mrb[31].mxu1 }
0x1b47   : >> { %v4969_v40 = vpop.f32.mrb[25].mxu0 }
0x1b48   : >> { %4050 = vst.msk [vmem:[#allocation10] sm:$0xff] %vm1071_vm0, %v4047_v45 }
0x1b4f   : >> { %v4051_v50 = vld [vmem:[#allocation10 + $0x1] sm:$0x7f] }
0x1b50   : >> { %v4134_v39 = vadd.f32 %v4130_v44, %v4051_v50 }
0x1b52   : >> { %4135 = vst.msk [vmem:[#allocation10 + $0x1] sm:$0x7f] %vm1120_vm1, %v4134_v39 }
0x1b55   : >> { %v4216_v51 = vpop.f32.mrb[32].mxu1 }
0x1b56   : >> { %v4988_v52 = vpop.f32.mrb[33].mxu1 }
0x1b59   : >> { %v4136_v54 = vld [vmem:[#allocation10] sm:$0x7f] }
0x1b5a   : >> { %v4220_v37 = vadd.f32 %v4216_v51, %v4136_v54 }
0x1b5c   : >> { %4221 = vst.msk [vmem:[#allocation10] sm:$0x7f] %vm1120_vm1, %v4220_v37 }
0x1b63   : >> { %v4222_v55 = vld [vmem:[#allocation10] sm:$0xff] }
0x1b64   : >> { %v4223_v16 = vmax.f32 %v4222_v55, 0.0 }
0x1b66   : >> { %4998 = vmatmul.mubr.msk.f32.vlgmr.msra.gmra.mrb[26].mxu0 %vm1071_vm0, %v4223_v16 }
0x1c36   : > { %1023 = sbr.rel (!%p1021_p11) target bundleno = 87 (0x57), region = 237 }
0x1c39   : >> { %v4304_v57 = vpop.f32.mrb[26].mxu0 }
0x1c3a   : >> { %v4305_v59 = vadd.f32 %v4543_v56, %v4304_v57  ;;  %v4999_v60 = vpop.f32.mrb[27].mxu0 }
0x1c3c   : >> { %4310 = vst [vmem:[%s4309_s1] sm:$0xff] %v4305_v59  ;;  %s6202_s1 = scalar_lea.sflag (%p1021_p11), [#allocation12], %s6326_s23 }
0x1c3d   : > { %5418 = shalt.err (!%p5415_p4)
}
0x1c3e   : > { %s5419_s5 = scalar_lea.hbm %s6194_s3, 1024  ;;  %s5423_s22 = scalar_lea.hbm %s5705_s4, 2048 }
0x1c3f   : > { %p5420_p7 = scmp.ne.s32.totalorder %s6194_s3, %s5419_s5  ;;  %p5424_p10 = scmp.lt.u32.totalorder %s6194_s3, %s5705_s4 }
0x1c40   : > { %p5425_p11 = scmp.lt.u32.totalorder %s5423_s22, %s5419_s5  ;;  %p5427_p13 = scmp.lt.u32.totalorder %s5419_s5, %s6194_s3 }
0x1c41   : > { %p5421_p8 = pnand %p5420_p7, %p5745_p5 }
0x1c42   : > { %p5426_p12 = por %p5425_p11, %p5424_p10 }
0x1c43   : > { %p5422_p9 = pneg %p5421_p8 }
0x1c44   : > { %p5428_p1 = por %p5427_p13, %p5426_p12 }
0x1c46   : > { %p5429_p0 = pnand %p5428_p1, %p5422_p9 }
0x1c48   : > { %5432 = shalt.err (!%p5429_p0)
}
0x1c49   : > { %s5530_s2 = smov 128   ;;  %s5531_s23 = smov 8  }
0x1c4a   : > { %5190 = dma.vmem_to_hbm [thread:$0]  (%p5745_p5), %s6198_s6, 1024, %s6194_s3, %s6202_s1, %s5530_s2, %s5530_s2, %s5531_s23  }
0x1c4b PF: > { %p5196_p2 = scmp.ge.s32.totalorder %s5471_s15, 2  ;;  %s4340_s26 = sand.u32 1, %s5459_s7  }
0x1c4c   : > { %s4341_s11 = scalar_lea.sflag [#allocation12], %s4340_s26 }
0x1c4d   : > { %p5193_p3 = pnand %p5196_p2, %p5749_p6 }
0x1c4f   : > { %5454 = dma.done.wait (!%p5193_p3), %s4341_s11, 1024  }
0x1c50   : > { %5456 = vsyncadd (!%p5193_p3), %s4341_s11, 4294966272  ;;  %s6328_s15 = sld [smem:[#allocation34_spill]]  ;;  %s6329_s0 = sld [smem:[#allocation33_spill]] }
0x1c51   : > { %s6330_s11 = sld [smem:[#allocation35_spill]]  ;;  %s6331_s7 = smov %s5463_s10 }
0x1c56   : > { %p77_p4 = scmp.ge.s32.totalorder %s6328_s15, 4   ;;  %s6332_s10 = smov %s6329_s0 }
0x1c58   :  { %79 = sbr.rel (!%p77_p4) target bundleno = 64 (0x40), region = 248 }
0x1c5f   :  { %4346 = vsyncpa [#allocation12], 1 }
0x1c60   :  { %4348 = vsyncpa [#allocation12 + $0x1], 1 }

</bundles_post_ra>
